<compile_context>
chip_gen: v7x
topology: tpu7x:2x2x1
jax: 0.10.0
libtpu: 0.0.40
codegen_flags: <defaults>
</compile_context>

<pallas_src>
import jax
import jax.numpy as jnp
from jax import lax
from jax.experimental import pallas as pl
from jax.experimental.pallas import tpu as pltpu

EPS = 1e-5
LANE = 128


def _round_up(x, m):
    return ((x + m - 1) // m) * m


def _pick_tile(hp, Wp, cop):
    """Largest divisor TH of hp keeping the f32 accumulator (TH*Wp, cop) ~<= 4 MiB."""
    max_rows = max(256, min(4096, (4 * 1024 * 1024) // (4 * cop)))
    best = hp                                     # fallback: one tile per image
    for th in range(1, hp + 1):
        if hp % th:
            continue
        rows = th * Wp
        if rows > max_rows:
            continue
        if th != hp and rows % 8 != 0:            # block dim -2 must be 8-aligned unless full
            continue
        best = th
    return best


# ----------------------------- in-kernel helpers -----------------------------

def _conv9(pad_ref, w_ref, TH, Wp, cop):
    """3x3 'same' conv as 9 MXU matmuls; each LHS is a contiguous leading-dim slice of
    the flat zero-padded input scratch (rows = flattened (TH+2, Wp))."""
    M = TH * Wp
    acc = jnp.zeros((M, cop), jnp.float32)
    for t in range(9):
        dh, dw = divmod(t, 3)
        lhs = pad_ref[pl.ds(dh * Wp + dw, M), :]
        acc = acc + jnp.dot(lhs, w_ref[t], preferred_element_type=jnp.float32)
    return acc


def _epilogue(acc, valid, y_ref, s_ref, ss_ref):
    vals = jnp.where(valid, acc, 0.0)             # zero the W-halo columns (and any junk)
    y_ref[0] = vals.astype(y_ref.dtype)           # bf16 pre-BN activation
    s_ref[0, 0] = jnp.sum(vals, axis=0, keepdims=True)        # per-channel sum (f32)
    ss_ref[0, 0] = jnp.sum(vals * vals, axis=0, keepdims=True)


# --------------------------------- kernels -----------------------------------

def _pool_conv_kernel(xb_ref, xh_ref, w_ref, mk_ref, y_ref, s_ref, ss_ref, pad_ref):
    """2x2 max-pool fused with conv1 + BN1 partial stats for one (image, H-tile)."""
    M, cop = y_ref.shape[1], y_ref.shape[2]
    cin = xb_ref.shape[3] // 2
    Wp = xh_ref.shape[2]
    TH = M // Wp

    # pool: W-parity folded into lanes, H-parity is dim 1 of the body block.
    x0 = xb_ref[0, 0]
    x1 = xb_ref[0, 1]
    body = jnp.maximum(jnp.maximum(x0[:, :cin], x0[:, cin:]),
                       jnp.maximum(x1[:, :cin], x1[:, cin:]))          # (M, cin) bf16

    xh = xh_ref[0]                                                      # (4, Wp, 2cin)
    hm = jnp.maximum(xh[..., :cin], xh[..., cin:])
    top = jnp.maximum(hm[0], hm[1])                                     # (Wp, cin)
    bot = jnp.maximum(hm[2], hm[3])

    # flat padded conv input: [top halo row | body | bottom halo row]; W-halo zeros
    # arrive pre-stored in the data, so no scratch zeroing is needed.
    pad_ref[pl.ds(1, Wp), :] = top
    pad_ref[pl.ds(1 + Wp, M), :] = body
    pad_ref[pl.ds(1 + (TH + 1) * Wp, Wp), :] = bot

    acc = _conv9(pad_ref, w_ref, TH, Wp, cop)
    _epilogue(acc, mk_ref[...] > 0.5, y_ref, s_ref, ss_ref)


def _bn_relu_conv_kernel(yb_ref, yh_ref, sc_ref, sh_ref, w_ref, mk_ref,
                         y2_ref, s_ref, ss_ref, pad_ref):
    """BN1-affine + ReLU fused with conv2 + BN2 partial stats."""
    M, cop = y2_ref.shape[1], y2_ref.shape[2]
    Wp = yh_ref.shape[2]
    TH = M // Wp
    j = pl.program_id(1)
    last = pl.num_programs(1) - 1

    sc = sc_ref[...]                                   # (1, cop) f32
    sh = sh_ref[...]
    valid = mk_ref[...] > 0.5                          # (M, 1)  column-validity mask
    valid_row = mk_ref[pl.ds(0, Wp), :] > 0.5          # (Wp, 1) one period of the mask

    def act(v):                                        # training-mode BN affine + ReLU
        return jnp.maximum(v.astype(jnp.float32) * sc + sh, 0.0)

    body = jnp.where(valid, act(yb_ref[0]), 0.0).astype(jnp.bfloat16)
    top = jnp.where(valid_row & (j > 0), act(yh_ref[0, 0]), 0.0).astype(jnp.bfloat16)
    bot = jnp.where(valid_row & (j < last), act(yh_ref[0, 1]), 0.0).astype(jnp.bfloat16)

    pad_ref[pl.ds(1, Wp), :] = top
    pad_ref[pl.ds(1 + Wp, M), :] = body
    pad_ref[pl.ds(1 + (TH + 1) * Wp, Wp), :] = bot

    acc = _conv9(pad_ref, w_ref, TH, Wp, cop)
    _epilogue(acc, valid, y2_ref, s_ref, ss_ref)


def _bn_relu_kernel(y_ref, sc_ref, sh_ref, o_ref):
    o_ref[0] = jnp.maximum(y_ref[0].astype(jnp.float32) * sc_ref[...] + sh_ref[...], 0.0)


# ------------------------------ pallas_call wrappers --------------------------

def _cparams():
    try:
        phys = pltpu.get_tpu_info().vmem_capacity_bytes
    except Exception:
        phys = 64 * 1024 * 1024                        # conservative (v7x-sized) fallback
    return pltpu.CompilerParams(
        dimension_semantics=("parallel", "parallel"),
        vmem_limit_bytes=min(int(phys * 3 // 4), 100 * 1024 * 1024),
    )


def _conv_out_shapes(n, n_tiles, M, cop):
    return (
        jax.ShapeDtypeStruct((n, n_tiles * M, cop), jnp.bfloat16),   # pre-BN activation
        jax.ShapeDtypeStruct((n, n_tiles, 1, cop), jnp.float32),     # per-tile channel sum
        jax.ShapeDtypeStruct((n, n_tiles, 1, cop), jnp.float32),     # per-tile channel sumsq
    )


def _conv_out_specs(M, cop):
    return [
        pl.BlockSpec((1, M, cop), lambda b, j: (b, j, 0)),
        pl.BlockSpec((1, 1, 1, cop), lambda b, j: (b, j, 0, 0)),
        pl.BlockSpec((1, 1, 1, cop), lambda b, j: (b, j, 0, 0)),
    ]


def _pool_conv(x_par, x_halo, w1, mask, n, n_tiles, TH, Wp, cin, cop):
    M = TH * Wp
    return pl.pallas_call(
        _pool_conv_kernel,
        out_shape=_conv_out_shapes(n, n_tiles, M, cop),
        grid_spec=pltpu.PrefetchScalarGridSpec(
            num_scalar_prefetch=0,
            grid=(n, n_tiles),
            in_specs=[
                pl.BlockSpec((1, 2, M, 2 * cin), lambda b, j: (b, 0, j, 0)),
                pl.BlockSpec((1, 4, Wp, 2 * cin), lambda b, j: (b, j, 0, 0)),
                pl.BlockSpec((9, cin, cop), lambda b, j: (0, 0, 0)),
                pl.BlockSpec((M, 1), lambda b, j: (j, 0)),
            ],
            out_specs=_conv_out_specs(M, cop),
            scratch_shapes=[pltpu.VMEM(((TH + 2) * Wp + 8, cin), jnp.bfloat16)],
        ),
        compiler_params=_cparams(),
    )(x_par, x_halo, w1, mask)


def _bn_relu_conv(y1, y1_halo, sc, sh, w2, mask, n, n_tiles, TH, Wp, cop):
    M = TH * Wp
    return pl.pallas_call(
        _bn_relu_conv_kernel,
        out_shape=_conv_out_shapes(n, n_tiles, M, cop),
        grid_spec=pltpu.PrefetchScalarGridSpec(
            num_scalar_prefetch=0,
            grid=(n, n_tiles),
            in_specs=[
                pl.BlockSpec((1, M, cop), lambda b, j: (b, j, 0)),
                pl.BlockSpec((1, 2, Wp, cop), lambda b, j: (b, j, 0, 0)),
                pl.BlockSpec((1, cop), lambda b, j: (0, 0)),
                pl.BlockSpec((1, cop), lambda b, j: (0, 0)),
                pl.BlockSpec((9, cop, cop), lambda b, j: (0, 0, 0)),
                pl.BlockSpec((M, 1), lambda b, j: (j, 0)),
            ],
            out_specs=_conv_out_specs(M, cop),
            scratch_shapes=[pltpu.VMEM(((TH + 2) * Wp + 8, cop), jnp.bfloat16)],
        ),
        compiler_params=_cparams(),
    )(y1, y1_halo, sc, sh, w2, mask)


def _bn_relu(y2, sc, sh, n, n_tiles, TH, Wp, cop):
    M = TH * Wp
    return pl.pallas_call(
        _bn_relu_kernel,
        out_shape=jax.ShapeDtypeStruct((n, n_tiles * M, cop), jnp.float32),
        grid_spec=pltpu.PrefetchScalarGridSpec(
            num_scalar_prefetch=0,
            grid=(n, n_tiles),
            in_specs=[
                pl.BlockSpec((1, M, cop), lambda b, j: (b, j, 0)),
                pl.BlockSpec((1, cop), lambda b, j: (0, 0)),
                pl.BlockSpec((1, cop), lambda b, j: (0, 0)),
            ],
            out_specs=pl.BlockSpec((1, M, cop), lambda b, j: (b, j, 0)),
        ),
        compiler_params=_cparams(),
    )(y2, sc, sh)


# ------------------------------ host-side glue --------------------------------

def _bn_affine(s_part, ss_part, gamma, beta, m):
    """Fold training-mode BatchNorm batch stats into a per-channel scale/shift."""
    s = jnp.sum(s_part, axis=(0, 1))                 # (1, cop)
    ss = jnp.sum(ss_part, axis=(0, 1))
    mean = s / m
    var = jnp.maximum(ss / m - mean * mean, 0.0)     # biased variance
    scale = gamma[None, :] * lax.rsqrt(var + EPS)
    shift = beta[None, :] - mean * scale
    return scale, shift


def _make_halo_rows(y_flat, n, hp, Wp, c, TH, n_tiles):
    """Per-H-tile (top, bottom) neighbour rows of a flat activation; zeros at borders."""
    yr = y_flat.reshape(n, hp, Wp, c)
    zero = jnp.zeros((n, 1, Wp, c), y_flat.dtype)
    top = jnp.concatenate([zero, yr[:, TH - 1::TH][:, :n_tiles - 1]], axis=1)
    bot = jnp.concatenate([yr[:, TH::TH], zero], axis=1)
    halo = jnp.stack([top, bot], axis=2)             # (n, n_tiles, 2, Wp, c)
    return halo.reshape(n, n_tiles * 2, Wp, c)


def _make_halo_x(x5, n, Wp, c2, TH, n_tiles):
    """Per-H-tile unpooled halo rows (both H parities) for pass 1; zeros at borders."""
    zero = jnp.zeros((n, 2, 1, Wp, c2), x5.dtype)
    top = jnp.concatenate([zero, x5[:, :, TH - 1::TH][:, :, :n_tiles - 1]], axis=2)
    bot = jnp.concatenate([x5[:, :, TH::TH], zero], axis=2)
    top = jnp.transpose(top, (0, 2, 1, 3, 4))        # (n, n_tiles, 2, Wp, c2)
    bot = jnp.transpose(bot, (0, 2, 1, 3, 4))
    halo = jnp.concatenate([top, bot], axis=2)       # (n, n_tiles, 4, Wp, c2)
    return halo.reshape(n, n_tiles * 4, Wp, c2)


def init_down_params(key, in_ch, out_ch):
    cop = _round_up(out_ch, LANE)
    k1, k2 = jax.random.split(key)

    def xavier_conv(k, ci, co, ci_pad, co_pad):
        # xavier_normal_ on the PyTorch OIHW conv weight; bias (0) is dropped because it
        # cancels exactly under training-mode BN mean subtraction.
        fan_in, fan_out = ci * 9, co * 9
        std = (2.0 / (fan_in + fan_out)) ** 0.5
        w = std * jax.random.normal(k, (co, ci, 3, 3), jnp.float32)      # OIHW
        w = jnp.transpose(w, (2, 3, 1, 0)).reshape(9, ci, co)            # (tap, ci, co)
        w = jnp.pad(w, ((0, 0), (0, ci_pad - ci), (0, co_pad - co)))
        return w.astype(jnp.bfloat16)

    def bn_params(co, co_pad):
        g = jnp.concatenate([jnp.ones((co,), jnp.float32),
                             jnp.zeros((co_pad - co,), jnp.float32)])
        return g, jnp.zeros((co_pad,), jnp.float32)

    g1, b1 = bn_params(out_ch, cop)
    g2, b2 = bn_params(out_ch, cop)
    return {
        # conv1 keeps the TRUE in_ch in the K dim (no 128-padding of cin);
        # conv2's cin equals the 128-padded cout of conv1.
        "w1": xavier_conv(k1, in_ch, out_ch, in_ch, cop), "g1": g1, "beta1": b1,
        "w2": xavier_conv(k2, out_ch, out_ch, cop, cop), "g2": g2, "beta2": b2,
    }


def down_forward(x_nchw, params, out_ch, to_nchw=True):
    n, c, h, w = x_nchw.shape
    assert h % 2 == 0 and w % 2 == 0, "MaxPool2d(2) expects even H and W"
    hp, wp = h // 2, w // 2
    Wp = wp + 2                                       # stored W incl. the two zero halo cols
    cin = params["w1"].shape[1]
    cop = params["w1"].shape[2]
    assert cin == c
    m = n * hp * wp                                   # BN sample count per channel
    TH = _pick_tile(hp, Wp, cop)
    n_tiles = hp // TH

    # Prologue (XLA): NCHW -> pool-folded, W-pre-padded layout (n, 2, hp*Wp, 2c), bf16.
    # When chaining `down` blocks, feed the padded NHWC output of the previous block
    # directly and skip this transpose.
    xt = jnp.transpose(x_nchw, (0, 2, 3, 1)).astype(jnp.bfloat16)    # (n, h, w, c)
    xt = xt.reshape(n, hp, 2, wp, 2 * c)                             # fold 2x2 pool window
    xt = jnp.transpose(xt, (0, 2, 1, 3, 4))                          # (n, 2, hp, wp, 2c)
    xt = jnp.pad(xt, ((0, 0), (0, 0), (0, 0), (1, 1), (0, 0)))       # zero W halo
    x_par = xt.reshape(n, 2, hp * Wp, 2 * c)
    x_halo = _make_halo_x(xt, n, Wp, 2 * c, TH, n_tiles)

    col = jnp.arange(Wp, dtype=jnp.int32)
    mask = jnp.tile(((col >= 1) & (col <= wp)).astype(jnp.float32), hp).reshape(hp * Wp, 1)

    # Pass 1: fused 2x2 max-pool + conv1 + BN1 partial stats.
    y1, s1, ss1 = _pool_conv(x_par, x_halo, params["w1"], mask, n, n_tiles, TH, Wp, c, cop)
    sc1, sh1 = _bn_affine(s1, ss1, params["g1"], params["beta1"], m)

    # Pass 2: BN1 + ReLU + conv2 + BN2 partial stats.
    y1_halo = _make_halo_rows(y1, n, hp, Wp, cop, TH, n_tiles)
    y2, s2, ss2 = _bn_relu_conv(y1, y1_halo, sc1, sh1, params["w2"], mask,
                                n, n_tiles, TH, Wp, cop)
    sc2, sh2 = _bn_affine(s2, ss2, params["g2"], params["beta2"], m)

    # Pass 3: BN2 + ReLU.
    out = _bn_relu(y2, sc2, sh2, n, n_tiles, TH, Wp, cop)            # (n, hp*Wp, cop) f32
    out = out.reshape(n, hp, Wp, cop)
    if not to_nchw:
        return out            # lane/W-padded NHWC for feeding the next Pallas stage directly
    out = out[:, :, 1:wp + 1, :out_ch]                # drop W halo + lane padding
    return jnp.transpose(out, (0, 3, 1, 2))           # NHWC -> NCHW (PyTorch convention)


# ----------------------------------- main ------------------------------------

if __name__ == "__main__":
    key = jax.random.PRNGKey(0)
    kx, kp = jax.random.split(key)

    in_ch, out_ch = 4, 8
    x = jax.random.normal(kx, (2, in_ch, 16, 16), jnp.float32)       # NCHW, like PyTorch
    params = init_down_params(kp, in_ch, out_ch)

    fwd = jax.jit(lambda a, p: down_forward(a, p, out_ch))
    y = fwd(x, params)
    jax.block_until_ready(y)

    assert y.shape == (2, out_ch, 8, 8), y.shape
    assert bool(jnp.all(y >= 0.0))          # ReLU output
    assert bool(jnp.all(jnp.isfinite(y)))
    print("KERNEL_OK")
</pallas_src>

<mosaic_0001>
module attributes {stable_mosaic.version = 11 : i64} {
  func.func @_pool_conv_kernel(%arg0: i32, %arg1: i32, %arg2: memref<1x2x80x8xbf16, #tpu.memory_space<vmem>>, %arg3: memref<1x4x10x8xbf16, #tpu.memory_space<vmem>>, %arg4: memref<9x4x128xbf16, #tpu.memory_space<vmem>>, %arg5: memref<80x1xf32, #tpu.memory_space<vmem>>, %arg6: memref<1x80x128xbf16, #tpu.memory_space<vmem>>, %arg7: memref<1x1x1x128xf32, #tpu.memory_space<vmem>>, %arg8: memref<1x1x1x128xf32, #tpu.memory_space<vmem>>, %arg9: memref<108x4xbf16, #tpu.memory_space<vmem>>) attributes {dimension_semantics = [#tpu.dimension_semantics<parallel>, #tpu.dimension_semantics<parallel>], iteration_bounds = array<i64: 2, 1>, scalar_prefetch = 0 : i64, scratch_operands = 1 : i64, tpu.core_type = #tpu.core_type<tc>, window_params = [{transform_indices = @transform_0, window_bounds = array<i64: 1, 2, 80, 8>}, {transform_indices = @transform_1, window_bounds = array<i64: 1, 4, 10, 8>}, {pipeline_mode = #tpu.pipeline_mode<synchronous>, transform_indices = @transform_2, window_bounds = array<i64: 9, 4, 128>}, {transform_indices = @transform_3, window_bounds = array<i64: 80, 1>}, {transform_indices = @transform_4, window_bounds = array<i64: 1, 80, 128>}, {transform_indices = @transform_5, window_bounds = array<i64: 1, 1, 1, 128>}, {transform_indices = @transform_6, window_bounds = array<i64: 1, 1, 1, 128>}]} {
    %c0 = arith.constant 0 : index
    %c0_0 = arith.constant 0 : index
    %c0_1 = arith.constant 0 : index
    %c0_2 = arith.constant 0 : index
    %0 = vector.load %arg2[%c0, %c0_0, %c0_1, %c0_2] : memref<1x2x80x8xbf16, #tpu.memory_space<vmem>>, vector<1x1x80x8xbf16>
    %1 = vector.shape_cast %0 : vector<1x1x80x8xbf16> to vector<80x8xbf16>
    %c0_3 = arith.constant 0 : index
    %c1 = arith.constant 1 : index
    %c0_4 = arith.constant 0 : index
    %c0_5 = arith.constant 0 : index
    %2 = vector.load %arg2[%c0_3, %c1, %c0_4, %c0_5] : memref<1x2x80x8xbf16, #tpu.memory_space<vmem>>, vector<1x1x80x8xbf16>
    %3 = vector.shape_cast %2 : vector<1x1x80x8xbf16> to vector<80x8xbf16>
    %4 = vector.extract_strided_slice %1 {offsets = [0, 0], sizes = [80, 4], strides = [1, 1]} : vector<80x8xbf16> to vector<80x4xbf16>
    %5 = vector.extract_strided_slice %1 {offsets = [0, 4], sizes = [80, 4], strides = [1, 1]} : vector<80x8xbf16> to vector<80x4xbf16>
    %6 = arith.maximumf %4, %5 : vector<80x4xbf16>
    %7 = vector.extract_strided_slice %3 {offsets = [0, 0], sizes = [80, 4], strides = [1, 1]} : vector<80x8xbf16> to vector<80x4xbf16>
    %8 = vector.extract_strided_slice %3 {offsets = [0, 4], sizes = [80, 4], strides = [1, 1]} : vector<80x8xbf16> to vector<80x4xbf16>
    %9 = arith.maximumf %7, %8 : vector<80x4xbf16>
    %10 = arith.maximumf %6, %9 : vector<80x4xbf16>
    %c0_6 = arith.constant 0 : index
    %c0_7 = arith.constant 0 : index
    %c0_8 = arith.constant 0 : index
    %c0_9 = arith.constant 0 : index
    %11 = vector.load %arg3[%c0_6, %c0_7, %c0_8, %c0_9] : memref<1x4x10x8xbf16, #tpu.memory_space<vmem>>, vector<1x4x10x8xbf16>
    %12 = vector.shape_cast %11 : vector<1x4x10x8xbf16> to vector<4x10x8xbf16>
    %13 = vector.extract_strided_slice %12 {offsets = [0, 0, 0], sizes = [4, 10, 4], strides = [1, 1, 1]} : vector<4x10x8xbf16> to vector<4x10x4xbf16>
    %14 = vector.extract_strided_slice %12 {offsets = [0, 0, 4], sizes = [4, 10, 4], strides = [1, 1, 1]} : vector<4x10x8xbf16> to vector<4x10x4xbf16>
    %15 = arith.maximumf %13, %14 : vector<4x10x4xbf16>
    %16 = vector.extract_strided_slice %15 {offsets = [0, 0, 0], sizes = [1, 10, 4], strides = [1, 1, 1]} : vector<4x10x4xbf16> to vector<1x10x4xbf16>
    %17 = vector.shape_cast %16 : vector<1x10x4xbf16> to vector<10x4xbf16>
    %18 = vector.extract_strided_slice %15 {offsets = [1, 0, 0], sizes = [1, 10, 4], strides = [1, 1, 1]} : vector<4x10x4xbf16> to vector<1x10x4xbf16>
    %19 = vector.shape_cast %18 : vector<1x10x4xbf16> to vector<10x4xbf16>
    %20 = arith.maximumf %17, %19 : vector<10x4xbf16>
    %21 = vector.extract_strided_slice %15 {offsets = [2, 0, 0], sizes = [1, 10, 4], strides = [1, 1, 1]} : vector<4x10x4xbf16> to vector<1x10x4xbf16>
    %22 = vector.shape_cast %21 : vector<1x10x4xbf16> to vector<10x4xbf16>
    %23 = vector.extract_strided_slice %15 {offsets = [3, 0, 0], sizes = [1, 10, 4], strides = [1, 1, 1]} : vector<4x10x4xbf16> to vector<1x10x4xbf16>
    %24 = vector.shape_cast %23 : vector<1x10x4xbf16> to vector<10x4xbf16>
    %25 = arith.maximumf %22, %24 : vector<10x4xbf16>
    %c1_10 = arith.constant 1 : index
    %c0_11 = arith.constant 0 : index
    %26 = vector.load %arg9[%c1_10, %c0_11] : memref<108x4xbf16, #tpu.memory_space<vmem>>, vector<10x4xbf16>
    tpu.vector_store %arg9[%c1_10, %c0_11], %20 {strides = array<i32>} : memref<108x4xbf16, #tpu.memory_space<vmem>>, vector<10x4xbf16>,
    %c11 = arith.constant 11 : index
    %c0_12 = arith.constant 0 : index
    %27 = vector.load %arg9[%c11, %c0_12] : memref<108x4xbf16, #tpu.memory_space<vmem>>, vector<80x4xbf16>
    tpu.vector_store %arg9[%c11, %c0_12], %10 {strides = array<i32>} : memref<108x4xbf16, #tpu.memory_space<vmem>>, vector<80x4xbf16>,
    %c91 = arith.constant 91 : index
    %c0_13 = arith.constant 0 : index
    %28 = vector.load %arg9[%c91, %c0_13] : memref<108x4xbf16, #tpu.memory_space<vmem>>, vector<10x4xbf16>
    tpu.vector_store %arg9[%c91, %c0_13], %25 {strides = array<i32>} : memref<108x4xbf16, #tpu.memory_space<vmem>>, vector<10x4xbf16>,
    %cst = arith.constant 0.000000e+00 : f32
    %29 = vector.broadcast %cst : f32 to vector<80x128xf32>
    %c0_14 = arith.constant 0 : index
    %c0_15 = arith.constant 0 : index
    %30 = vector.load %arg9[%c0_14, %c0_15] : memref<108x4xbf16, #tpu.memory_space<vmem>>, vector<80x4xbf16>
    %c0_16 = arith.constant 0 : index
    %c0_17 = arith.constant 0 : index
    %c0_18 = arith.constant 0 : index
    %31 = vector.load %arg4[%c0_16, %c0_17, %c0_18] : memref<9x4x128xbf16, #tpu.memory_space<vmem>>, vector<1x4x128xbf16>
    %32 = vector.shape_cast %31 : vector<1x4x128xbf16> to vector<4x128xbf16>
    %cst_19 = arith.constant dense<0.000000e+00> : vector<80x128xf32>
    %33 = tpu.matmul %30, %32, %cst_19 {dimension_numbers = #tpu.dot_dimension_numbers<[1], [0], [0], [1], [0, 0, 1, 1], [], []>} : vector<80x4xbf16>, vector<4x128xbf16>, vector<80x128xf32> -> vector<80x128xf32>
    %34 = arith.addf %29, %33 : vector<80x128xf32>
    %c1_20 = arith.constant 1 : index
    %c0_21 = arith.constant 0 : index
    %35 = vector.load %arg9[%c1_20, %c0_21] : memref<108x4xbf16, #tpu.memory_space<vmem>>, vector<80x4xbf16>
    %c1_22 = arith.constant 1 : index
    %c0_23 = arith.constant 0 : index
    %c0_24 = arith.constant 0 : index
    %36 = vector.load %arg4[%c1_22, %c0_23, %c0_24] : memref<9x4x128xbf16, #tpu.memory_space<vmem>>, vector<1x4x128xbf16>
    %37 = vector.shape_cast %36 : vector<1x4x128xbf16> to vector<4x128xbf16>
    %cst_25 = arith.constant dense<0.000000e+00> : vector<80x128xf32>
    %38 = tpu.matmul %35, %37, %cst_25 {dimension_numbers = #tpu.dot_dimension_numbers<[1], [0], [0], [1], [0, 0, 1, 1], [], []>} : vector<80x4xbf16>, vector<4x128xbf16>, vector<80x128xf32> -> vector<80x128xf32>
    %39 = arith.addf %34, %38 : vector<80x128xf32>
    %c2 = arith.constant 2 : index
    %c0_26 = arith.constant 0 : index
    %40 = vector.load %arg9[%c2, %c0_26] : memref<108x4xbf16, #tpu.memory_space<vmem>>, vector<80x4xbf16>
    %c2_27 = arith.constant 2 : index
    %c0_28 = arith.constant 0 : index
    %c0_29 = arith.constant 0 : index
    %41 = vector.load %arg4[%c2_27, %c0_28, %c0_29] : memref<9x4x128xbf16, #tpu.memory_space<vmem>>, vector<1x4x128xbf16>
    %42 = vector.shape_cast %41 : vector<1x4x128xbf16> to vector<4x128xbf16>
    %cst_30 = arith.constant dense<0.000000e+00> : vector<80x128xf32>
    %43 = tpu.matmul %40, %42, %cst_30 {dimension_numbers = #tpu.dot_dimension_numbers<[1], [0], [0], [1], [0, 0, 1, 1], [], []>} : vector<80x4xbf16>, vector<4x128xbf16>, vector<80x128xf32> -> vector<80x128xf32>
    %44 = arith.addf %39, %43 : vector<80x128xf32>
    %c10 = arith.constant 10 : index
    %c0_31 = arith.constant 0 : index
    %45 = vector.load %arg9[%c10, %c0_31] : memref<108x4xbf16, #tpu.memory_space<vmem>>, vector<80x4xbf16>
    %c3 = arith.constant 3 : index
    %c0_32 = arith.constant 0 : index
    %c0_33 = arith.constant 0 : index
    %46 = vector.load %arg4[%c3, %c0_32, %c0_33] : memref<9x4x128xbf16, #tpu.memory_space<vmem>>, vector<1x4x128xbf16>
    %47 = vector.shape_cast %46 : vector<1x4x128xbf16> to vector<4x128xbf16>
    %cst_34 = arith.constant dense<0.000000e+00> : vector<80x128xf32>
    %48 = tpu.matmul %45, %47, %cst_34 {dimension_numbers = #tpu.dot_dimension_numbers<[1], [0], [0], [1], [0, 0, 1, 1], [], []>} : vector<80x4xbf16>, vector<4x128xbf16>, vector<80x128xf32> -> vector<80x128xf32>
    %49 = arith.addf %44, %48 : vector<80x128xf32>
    %c11_35 = arith.constant 11 : index
    %c0_36 = arith.constant 0 : index
    %50 = vector.load %arg9[%c11_35, %c0_36] : memref<108x4xbf16, #tpu.memory_space<vmem>>, vector<80x4xbf16>
    %c4 = arith.constant 4 : index
    %c0_37 = arith.constant 0 : index
    %c0_38 = arith.constant 0 : index
    %51 = vector.load %arg4[%c4, %c0_37, %c0_38] : memref<9x4x128xbf16, #tpu.memory_space<vmem>>, vector<1x4x128xbf16>
    %52 = vector.shape_cast %51 : vector<1x4x128xbf16> to vector<4x128xbf16>
    %cst_39 = arith.constant dense<0.000000e+00> : vector<80x128xf32>
    %53 = tpu.matmul %50, %52, %cst_39 {dimension_numbers = #tpu.dot_dimension_numbers<[1], [0], [0], [1], [0, 0, 1, 1], [], []>} : vector<80x4xbf16>, vector<4x128xbf16>, vector<80x128xf32> -> vector<80x128xf32>
    %54 = arith.addf %49, %53 : vector<80x128xf32>
    %c12 = arith.constant 12 : index
    %c0_40 = arith.constant 0 : index
    %55 = vector.load %arg9[%c12, %c0_40] : memref<108x4xbf16, #tpu.memory_space<vmem>>, vector<80x4xbf16>
    %c5 = arith.constant 5 : index
    %c0_41 = arith.constant 0 : index
    %c0_42 = arith.constant 0 : index
    %56 = vector.load %arg4[%c5, %c0_41, %c0_42] : memref<9x4x128xbf16, #tpu.memory_space<vmem>>, vector<1x4x128xbf16>
    %57 = vector.shape_cast %56 : vector<1x4x128xbf16> to vector<4x128xbf16>
    %cst_43 = arith.constant dense<0.000000e+00> : vector<80x128xf32>
    %58 = tpu.matmul %55, %57, %cst_43 {dimension_numbers = #tpu.dot_dimension_numbers<[1], [0], [0], [1], [0, 0, 1, 1], [], []>} : vector<80x4xbf16>, vector<4x128xbf16>, vector<80x128xf32> -> vector<80x128xf32>
    %59 = arith.addf %54, %58 : vector<80x128xf32>
    %c20 = arith.constant 20 : index
    %c0_44 = arith.constant 0 : index
    %60 = vector.load %arg9[%c20, %c0_44] : memref<108x4xbf16, #tpu.memory_space<vmem>>, vector<80x4xbf16>
    %c6 = arith.constant 6 : index
    %c0_45 = arith.constant 0 : index
    %c0_46 = arith.constant 0 : index
    %61 = vector.load %arg4[%c6, %c0_45, %c0_46] : memref<9x4x128xbf16, #tpu.memory_space<vmem>>, vector<1x4x128xbf16>
    %62 = vector.shape_cast %61 : vector<1x4x128xbf16> to vector<4x128xbf16>
    %cst_47 = arith.constant dense<0.000000e+00> : vector<80x128xf32>
    %63 = tpu.matmul %60, %62, %cst_47 {dimension_numbers = #tpu.dot_dimension_numbers<[1], [0], [0], [1], [0, 0, 1, 1], [], []>} : vector<80x4xbf16>, vector<4x128xbf16>, vector<80x128xf32> -> vector<80x128xf32>
    %64 = arith.addf %59, %63 : vector<80x128xf32>
    %c21 = arith.constant 21 : index
    %c0_48 = arith.constant 0 : index
    %65 = vector.load %arg9[%c21, %c0_48] : memref<108x4xbf16, #tpu.memory_space<vmem>>, vector<80x4xbf16>
    %c7 = arith.constant 7 : index
    %c0_49 = arith.constant 0 : index
    %c0_50 = arith.constant 0 : index
    %66 = vector.load %arg4[%c7, %c0_49, %c0_50] : memref<9x4x128xbf16, #tpu.memory_space<vmem>>, vector<1x4x128xbf16>
    %67 = vector.shape_cast %66 : vector<1x4x128xbf16> to vector<4x128xbf16>
    %cst_51 = arith.constant dense<0.000000e+00> : vector<80x128xf32>
    %68 = tpu.matmul %65, %67, %cst_51 {dimension_numbers = #tpu.dot_dimension_numbers<[1], [0], [0], [1], [0, 0, 1, 1], [], []>} : vector<80x4xbf16>, vector<4x128xbf16>, vector<80x128xf32> -> vector<80x128xf32>
    %69 = arith.addf %64, %68 : vector<80x128xf32>
    %c22 = arith.constant 22 : index
    %c0_52 = arith.constant 0 : index
    %70 = vector.load %arg9[%c22, %c0_52] : memref<108x4xbf16, #tpu.memory_space<vmem>>, vector<80x4xbf16>
    %c8 = arith.constant 8 : index
    %c0_53 = arith.constant 0 : index
    %c0_54 = arith.constant 0 : index
    %71 = vector.load %arg4[%c8, %c0_53, %c0_54] : memref<9x4x128xbf16, #tpu.memory_space<vmem>>, vector<1x4x128xbf16>
    %72 = vector.shape_cast %71 : vector<1x4x128xbf16> to vector<4x128xbf16>
    %cst_55 = arith.constant dense<0.000000e+00> : vector<80x128xf32>
    %73 = tpu.matmul %70, %72, %cst_55 {dimension_numbers = #tpu.dot_dimension_numbers<[1], [0], [0], [1], [0, 0, 1, 1], [], []>} : vector<80x4xbf16>, vector<4x128xbf16>, vector<80x128xf32> -> vector<80x128xf32>
    %74 = arith.addf %69, %73 : vector<80x128xf32>
    %c0_56 = arith.constant 0 : index
    %c0_57 = arith.constant 0 : index
    %75 = vector.load %arg5[%c0_56, %c0_57] : memref<80x1xf32, #tpu.memory_space<vmem>>, vector<80x1xf32>
    %cst_58 = arith.constant 5.000000e-01 : f32
    %76 = vector.broadcast %cst_58 : f32 to vector<80x1xf32>
    %77 = arith.cmpf ogt, %75, %76 : vector<80x1xf32>
    %cst_59 = arith.constant 0.000000e+00 : f32
    %78 = vector.shape_cast %77 : vector<80x1xi1> to vector<80x1xi1>
    %79 = vector.broadcast %78 : vector<80x1xi1> to vector<80x128xi1>
    %80 = vector.broadcast %cst_59 : f32 to vector<80x128xf32>
    %81 = arith.select %79, %74, %80 : vector<80x128xi1>, vector<80x128xf32>
    %82 = arith.truncf %81 : vector<80x128xf32> to vector<80x128xbf16>
    %c0_60 = arith.constant 0 : index
    %c0_61 = arith.constant 0 : index
    %c0_62 = arith.constant 0 : index
    %83 = vector.load %arg6[%c0_60, %c0_61, %c0_62] : memref<1x80x128xbf16, #tpu.memory_space<vmem>>, vector<1x80x128xbf16>
    %84 = vector.shape_cast %83 : vector<1x80x128xbf16> to vector<80x128xbf16>
    %85 = vector.shape_cast %82 : vector<80x128xbf16> to vector<1x80x128xbf16>
    tpu.vector_store %arg6[%c0_60, %c0_61, %c0_62], %85 {strides = array<i32>} : memref<1x80x128xbf16, #tpu.memory_space<vmem>>, vector<1x80x128xbf16>,
    %cst_63 = arith.constant dense<0.000000e+00> : vector<128xf32>
    %86 = vector.multi_reduction <add>, %81, %cst_63 [0] : vector<80x128xf32> to vector<128xf32>
    %87 = vector.shape_cast %86 : vector<128xf32> to vector<1x128xf32>
    %c0_64 = arith.constant 0 : index
    %c0_65 = arith.constant 0 : index
    %c0_66 = arith.constant 0 : index
    %c0_67 = arith.constant 0 : index
    %88 = vector.load %arg7[%c0_64, %c0_65, %c0_66, %c0_67] : memref<1x1x1x128xf32, #tpu.memory_space<vmem>>, vector<1x1x1x128xf32>
    %89 = vector.shape_cast %88 : vector<1x1x1x128xf32> to vector<1x128xf32>
    %90 = vector.shape_cast %87 : vector<1x128xf32> to vector<1x1x1x128xf32>
    tpu.vector_store %arg7[%c0_64, %c0_65, %c0_66, %c0_67], %90 {strides = array<i32>} : memref<1x1x1x128xf32, #tpu.memory_space<vmem>>, vector<1x1x1x128xf32>,
    %91 = arith.mulf %81, %81 : vector<80x128xf32>
    %cst_68 = arith.constant dense<0.000000e+00> : vector<128xf32>
    %92 = vector.multi_reduction <add>, %91, %cst_68 [0] : vector<80x128xf32> to vector<128xf32>
    %93 = vector.shape_cast %92 : vector<128xf32> to vector<1x128xf32>
    %c0_69 = arith.constant 0 : index
    %c0_70 = arith.constant 0 : index
    %c0_71 = arith.constant 0 : index
    %c0_72 = arith.constant 0 : index
    %94 = vector.load %arg8[%c0_69, %c0_70, %c0_71, %c0_72] : memref<1x1x1x128xf32, #tpu.memory_space<vmem>>, vector<1x1x1x128xf32>
    %95 = vector.shape_cast %94 : vector<1x1x1x128xf32> to vector<1x128xf32>
    %96 = vector.shape_cast %93 : vector<1x128xf32> to vector<1x1x1x128xf32>
    tpu.vector_store %arg8[%c0_69, %c0_70, %c0_71, %c0_72], %96 {strides = array<i32>} : memref<1x1x1x128xf32, #tpu.memory_space<vmem>>, vector<1x1x1x128xf32>,
    return
  }
  func.func @transform_0(%arg0: i32, %arg1: i32) -> (i32, i32, i32, i32) {
    %c0_i32 = arith.constant 0 : i32
    %c0_i32_0 = arith.constant 0 : i32
    %c0_i32_1 = arith.constant 0 : i32
    return %arg0, %c0_i32, %arg1, %c0_i32_0 : i32, i32, i32, i32
  }
  func.func @transform_1(%arg0: i32, %arg1: i32) -> (i32, i32, i32, i32) {
    %c0_i32 = arith.constant 0 : i32
    %c0_i32_0 = arith.constant 0 : i32
    %c0_i32_1 = arith.constant 0 : i32
    return %arg0, %arg1, %c0_i32, %c0_i32_0 : i32, i32, i32, i32
  }
  func.func @transform_2(%arg0: i32, %arg1: i32) -> (i32, i32, i32) {
    %c0_i32 = arith.constant 0 : i32
    %c0_i32_0 = arith.constant 0 : i32
    %c0_i32_1 = arith.constant 0 : i32
    %c0_i32_2 = arith.constant 0 : i32
    return %c0_i32, %c0_i32_0, %c0_i32_1 : i32, i32, i32
  }
  func.func @transform_3(%arg0: i32, %arg1: i32) -> (i32, i32) {
    %c0_i32 = arith.constant 0 : i32
    %c0_i32_0 = arith.constant 0 : i32
    return %arg1, %c0_i32 : i32, i32
  }
  func.func @transform_4(%arg0: i32, %arg1: i32) -> (i32, i32, i32) {
    %c0_i32 = arith.constant 0 : i32
    %c0_i32_0 = arith.constant 0 : i32
    return %arg0, %arg1, %c0_i32 : i32, i32, i32
  }
  func.func @transform_5(%arg0: i32, %arg1: i32) -> (i32, i32, i32, i32) {
    %c0_i32 = arith.constant 0 : i32
    %c0_i32_0 = arith.constant 0 : i32
    %c0_i32_1 = arith.constant 0 : i32
    return %arg0, %arg1, %c0_i32, %c0_i32_0 : i32, i32, i32, i32
  }
  func.func @transform_6(%arg0: i32, %arg1: i32) -> (i32, i32, i32, i32) {
    %c0_i32 = arith.constant 0 : i32
    %c0_i32_0 = arith.constant 0 : i32
    %c0_i32_1 = arith.constant 0 : i32
    return %arg0, %arg1, %c0_i32, %c0_i32_0 : i32, i32, i32, i32
  }
}

module attributes {stable_mosaic.version = 11 : i64} {
  func.func @_bn_relu_kernel(%arg0: i32, %arg1: i32, %arg2: memref<1x80x128xbf16, #tpu.memory_space<vmem>>, %arg3: memref<1x128xf32, #tpu.memory_space<vmem>>, %arg4: memref<1x128xf32, #tpu.memory_space<vmem>>, %arg5: memref<1x80x128xf32, #tpu.memory_space<vmem>>) attributes {dimension_semantics = [#tpu.dimension_semantics<parallel>, #tpu.dimension_semantics<parallel>], iteration_bounds = array<i64: 2, 1>, scalar_prefetch = 0 : i64, scratch_operands = 0 : i64, tpu.core_type = #tpu.core_type<tc>, window_params = [{transform_indices = @transform_0, window_bounds = array<i64: 1, 80, 128>}, {pipeline_mode = #tpu.pipeline_mode<synchronous>, transform_indices = @transform_1, window_bounds = array<i64: 1, 128>}, {pipeline_mode = #tpu.pipeline_mode<synchronous>, transform_indices = @transform_2, window_bounds = array<i64: 1, 128>}, {transform_indices = @transform_3, window_bounds = array<i64: 1, 80, 128>}]} {
    %c0 = arith.constant 0 : index
    %c0_0 = arith.constant 0 : index
    %c0_1 = arith.constant 0 : index
    %0 = vector.load %arg2[%c0, %c0_0, %c0_1] : memref<1x80x128xbf16, #tpu.memory_space<vmem>>, vector<1x80x128xbf16>
    %1 = vector.shape_cast %0 : vector<1x80x128xbf16> to vector<80x128xbf16>
    %2 = arith.extf %1 : vector<80x128xbf16> to vector<80x128xf32>
    %c0_2 = arith.constant 0 : index
    %c0_3 = arith.constant 0 : index
    %3 = vector.load %arg3[%c0_2, %c0_3] : memref<1x128xf32, #tpu.memory_space<vmem>>, vector<1x128xf32>
    %4 = vector.broadcast %3 : vector<1x128xf32> to vector<80x128xf32>
    %5 = arith.mulf %2, %4 : vector<80x128xf32>
    %c0_4 = arith.constant 0 : index
    %c0_5 = arith.constant 0 : index
    %6 = vector.load %arg4[%c0_4, %c0_5] : memref<1x128xf32, #tpu.memory_space<vmem>>, vector<1x128xf32>
    %7 = vector.broadcast %6 : vector<1x128xf32> to vector<80x128xf32>
    %8 = arith.addf %5, %7 : vector<80x128xf32>
    %cst = arith.constant 0.000000e+00 : f32
    %9 = vector.broadcast %cst : f32 to vector<80x128xf32>
    %10 = arith.maximumf %8, %9 : vector<80x128xf32>
    %c0_6 = arith.constant 0 : index
    %c0_7 = arith.constant 0 : index
    %c0_8 = arith.constant 0 : index
    %11 = vector.load %arg5[%c0_6, %c0_7, %c0_8] : memref<1x80x128xf32, #tpu.memory_space<vmem>>, vector<1x80x128xf32>
    %12 = vector.shape_cast %11 : vector<1x80x128xf32> to vector<80x128xf32>
    %13 = vector.shape_cast %10 : vector<80x128xf32> to vector<1x80x128xf32>
    tpu.vector_store %arg5[%c0_6, %c0_7, %c0_8], %13 {strides = array<i32>} : memref<1x80x128xf32, #tpu.memory_space<vmem>>, vector<1x80x128xf32>,
    return
  }
  func.func @transform_0(%arg0: i32, %arg1: i32) -> (i32, i32, i32) {
    %c0_i32 = arith.constant 0 : i32
    %c0_i32_0 = arith.constant 0 : i32
    return %arg0, %arg1, %c0_i32 : i32, i32, i32
  }
  func.func @transform_1(%arg0: i32, %arg1: i32) -> (i32, i32) {
    %c0_i32 = arith.constant 0 : i32
    %c0_i32_0 = arith.constant 0 : i32
    %c0_i32_1 = arith.constant 0 : i32
    return %c0_i32, %c0_i32_0 : i32, i32
  }
  func.func @transform_2(%arg0: i32, %arg1: i32) -> (i32, i32) {
    %c0_i32 = arith.constant 0 : i32
    %c0_i32_0 = arith.constant 0 : i32
    %c0_i32_1 = arith.constant 0 : i32
    return %c0_i32, %c0_i32_0 : i32, i32
  }
  func.func @transform_3(%arg0: i32, %arg1: i32) -> (i32, i32, i32) {
    %c0_i32 = arith.constant 0 : i32
    %c0_i32_0 = arith.constant 0 : i32
    return %arg0, %arg1, %c0_i32 : i32, i32, i32
  }
}

module attributes {stable_mosaic.version = 11 : i64} {
  func.func @_bn_relu_conv_kernel(%arg0: i32, %arg1: i32, %arg2: memref<1x80x128xbf16, #tpu.memory_space<vmem>>, %arg3: memref<1x2x10x128xbf16, #tpu.memory_space<vmem>>, %arg4: memref<1x128xf32, #tpu.memory_space<vmem>>, %arg5: memref<1x128xf32, #tpu.memory_space<vmem>>, %arg6: memref<9x128x128xbf16, #tpu.memory_space<vmem>>, %arg7: memref<80x1xf32, #tpu.memory_space<vmem>>, %arg8: memref<1x80x128xbf16, #tpu.memory_space<vmem>>, %arg9: memref<1x1x1x128xf32, #tpu.memory_space<vmem>>, %arg10: memref<1x1x1x128xf32, #tpu.memory_space<vmem>>, %arg11: memref<108x128xbf16, #tpu.memory_space<vmem>>) attributes {dimension_semantics = [#tpu.dimension_semantics<parallel>, #tpu.dimension_semantics<parallel>], iteration_bounds = array<i64: 2, 1>, scalar_prefetch = 0 : i64, scratch_operands = 1 : i64, tpu.core_type = #tpu.core_type<tc>, window_params = [{transform_indices = @transform_0, window_bounds = array<i64: 1, 80, 128>}, {transform_indices = @transform_1, window_bounds = array<i64: 1, 2, 10, 128>}, {pipeline_mode = #tpu.pipeline_mode<synchronous>, transform_indices = @transform_2, window_bounds = array<i64: 1, 128>}, {pipeline_mode = #tpu.pipeline_mode<synchronous>, transform_indices = @transform_3, window_bounds = array<i64: 1, 128>}, {pipeline_mode = #tpu.pipeline_mode<synchronous>, transform_indices = @transform_4, window_bounds = array<i64: 9, 128, 128>}, {transform_indices = @transform_5, window_bounds = array<i64: 80, 1>}, {transform_indices = @transform_6, window_bounds = array<i64: 1, 80, 128>}, {transform_indices = @transform_7, window_bounds = array<i64: 1, 1, 1, 128>}, {transform_indices = @transform_8, window_bounds = array<i64: 1, 1, 1, 128>}]} {
    %c0 = arith.constant 0 : index
    %c0_0 = arith.constant 0 : index
    %0 = vector.load %arg4[%c0, %c0_0] : memref<1x128xf32, #tpu.memory_space<vmem>>, vector<1x128xf32>
    %c0_1 = arith.constant 0 : index
    %c0_2 = arith.constant 0 : index
    %1 = vector.load %arg5[%c0_1, %c0_2] : memref<1x128xf32, #tpu.memory_space<vmem>>, vector<1x128xf32>
    %c0_3 = arith.constant 0 : index
    %c0_4 = arith.constant 0 : index
    %2 = vector.load %arg7[%c0_3, %c0_4] : memref<80x1xf32, #tpu.memory_space<vmem>>, vector<80x1xf32>
    %cst = arith.constant 5.000000e-01 : f32
    %3 = vector.broadcast %cst : f32 to vector<80x1xf32>
    %4 = arith.cmpf ogt, %2, %3 : vector<80x1xf32>
    %c0_5 = arith.constant 0 : index
    %c0_6 = arith.constant 0 : index
    %5 = vector.load %arg7[%c0_5, %c0_6] : memref<80x1xf32, #tpu.memory_space<vmem>>, vector<10x1xf32>
    %cst_7 = arith.constant 5.000000e-01 : f32
    %6 = vector.broadcast %cst_7 : f32 to vector<10x1xf32>
    %7 = arith.cmpf ogt, %5, %6 : vector<10x1xf32>
    %c0_8 = arith.constant 0 : index
    %c0_9 = arith.constant 0 : index
    %c0_10 = arith.constant 0 : index
    %8 = vector.load %arg2[%c0_8, %c0_9, %c0_10] : memref<1x80x128xbf16, #tpu.memory_space<vmem>>, vector<1x80x128xbf16>
    %9 = vector.shape_cast %8 : vector<1x80x128xbf16> to vector<80x128xbf16>
    %10 = arith.extf %9 : vector<80x128xbf16> to vector<80x128xf32>
    %11 = vector.broadcast %0 : vector<1x128xf32> to vector<80x128xf32>
    %12 = arith.mulf %10, %11 : vector<80x128xf32>
    %13 = vector.broadcast %1 : vector<1x128xf32> to vector<80x128xf32>
    %14 = arith.addf %12, %13 : vector<80x128xf32>
    %cst_11 = arith.constant 0.000000e+00 : f32
    %15 = vector.broadcast %cst_11 : f32 to vector<80x128xf32>
    %16 = arith.maximumf %14, %15 : vector<80x128xf32>
    %cst_12 = arith.constant 0.000000e+00 : f32
    %17 = vector.shape_cast %4 : vector<80x1xi1> to vector<80x1xi1>
    %18 = vector.broadcast %17 : vector<80x1xi1> to vector<80x128xi1>
    %19 = vector.broadcast %cst_12 : f32 to vector<80x128xf32>
    %20 = arith.select %18, %16, %19 : vector<80x128xi1>, vector<80x128xf32>
    %21 = arith.truncf %20 : vector<80x128xf32> to vector<80x128xbf16>
    %c0_i32 = arith.constant 0 : i32
    %22 = arith.cmpi sgt, %arg1, %c0_i32 : i32
    %23 = vector.broadcast %22 : i1 to vector<10x1xi1>
    %24 = arith.andi %7, %23 : vector<10x1xi1>
    %c0_13 = arith.constant 0 : index
    %c0_14 = arith.constant 0 : index
    %c0_15 = arith.constant 0 : index
    %c0_16 = arith.constant 0 : index
    %25 = vector.load %arg3[%c0_13, %c0_14, %c0_15, %c0_16] : memref<1x2x10x128xbf16, #tpu.memory_space<vmem>>, vector<1x1x10x128xbf16>
    %26 = vector.shape_cast %25 : vector<1x1x10x128xbf16> to vector<10x128xbf16>
    %27 = arith.extf %26 : vector<10x128xbf16> to vector<10x128xf32>
    %28 = vector.broadcast %0 : vector<1x128xf32> to vector<10x128xf32>
    %29 = arith.mulf %27, %28 : vector<10x128xf32>
    %30 = vector.broadcast %1 : vector<1x128xf32> to vector<10x128xf32>
    %31 = arith.addf %29, %30 : vector<10x128xf32>
    %cst_17 = arith.constant 0.000000e+00 : f32
    %32 = vector.broadcast %cst_17 : f32 to vector<10x128xf32>
    %33 = arith.maximumf %31, %32 : vector<10x128xf32>
    %cst_18 = arith.constant 0.000000e+00 : f32
    %34 = vector.shape_cast %24 : vector<10x1xi1> to vector<10x1xi1>
    %35 = vector.broadcast %34 : vector<10x1xi1> to vector<10x128xi1>
    %36 = vector.broadcast %cst_18 : f32 to vector<10x128xf32>
    %37 = arith.select %35, %33, %36 : vector<10x128xi1>, vector<10x128xf32>
    %38 = arith.truncf %37 : vector<10x128xf32> to vector<10x128xbf16>
    %c0_i32_19 = arith.constant 0 : i32
    %39 = arith.cmpi slt, %arg1, %c0_i32_19 : i32
    %40 = vector.broadcast %39 : i1 to vector<10x1xi1>
    %41 = arith.andi %7, %40 : vector<10x1xi1>
    %c0_20 = arith.constant 0 : index
    %c1 = arith.constant 1 : index
    %c0_21 = arith.constant 0 : index
    %c0_22 = arith.constant 0 : index
    %42 = vector.load %arg3[%c0_20, %c1, %c0_21, %c0_22] : memref<1x2x10x128xbf16, #tpu.memory_space<vmem>>, vector<1x1x10x128xbf16>
    %43 = vector.shape_cast %42 : vector<1x1x10x128xbf16> to vector<10x128xbf16>
    %44 = arith.extf %43 : vector<10x128xbf16> to vector<10x128xf32>
    %45 = vector.broadcast %0 : vector<1x128xf32> to vector<10x128xf32>
    %46 = arith.mulf %44, %45 : vector<10x128xf32>
    %47 = vector.broadcast %1 : vector<1x128xf32> to vector<10x128xf32>
    %48 = arith.addf %46, %47 : vector<10x128xf32>
    %cst_23 = arith.constant 0.000000e+00 : f32
    %49 = vector.broadcast %cst_23 : f32 to vector<10x128xf32>
    %50 = arith.maximumf %48, %49 : vector<10x128xf32>
    %cst_24 = arith.constant 0.000000e+00 : f32
    %51 = vector.shape_cast %41 : vector<10x1xi1> to vector<10x1xi1>
    %52 = vector.broadcast %51 : vector<10x1xi1> to vector<10x128xi1>
    %53 = vector.broadcast %cst_24 : f32 to vector<10x128xf32>
    %54 = arith.select %52, %50, %53 : vector<10x128xi1>, vector<10x128xf32>
    %55 = arith.truncf %54 : vector<10x128xf32> to vector<10x128xbf16>
    %c1_25 = arith.constant 1 : index
    %c0_26 = arith.constant 0 : index
    %56 = vector.load %arg11[%c1_25, %c0_26] : memref<108x128xbf16, #tpu.memory_space<vmem>>, vector<10x128xbf16>
    tpu.vector_store %arg11[%c1_25, %c0_26], %38 {strides = array<i32>} : memref<108x128xbf16, #tpu.memory_space<vmem>>, vector<10x128xbf16>,
    %c11 = arith.constant 11 : index
    %c0_27 = arith.constant 0 : index
    %57 = vector.load %arg11[%c11, %c0_27] : memref<108x128xbf16, #tpu.memory_space<vmem>>, vector<80x128xbf16>
    tpu.vector_store %arg11[%c11, %c0_27], %21 {strides = array<i32>} : memref<108x128xbf16, #tpu.memory_space<vmem>>, vector<80x128xbf16>,
    %c91 = arith.constant 91 : index
    %c0_28 = arith.constant 0 : index
    %58 = vector.load %arg11[%c91, %c0_28] : memref<108x128xbf16, #tpu.memory_space<vmem>>, vector<10x128xbf16>
    tpu.vector_store %arg11[%c91, %c0_28], %55 {strides = array<i32>} : memref<108x128xbf16, #tpu.memory_space<vmem>>, vector<10x128xbf16>,
    %cst_29 = arith.constant 0.000000e+00 : f32
    %59 = vector.broadcast %cst_29 : f32 to vector<80x128xf32>
    %c0_30 = arith.constant 0 : index
    %c0_31 = arith.constant 0 : index
    %60 = vector.load %arg11[%c0_30, %c0_31] : memref<108x128xbf16, #tpu.memory_space<vmem>>, vector<80x128xbf16>
    %c0_32 = arith.constant 0 : index
    %c0_33 = arith.constant 0 : index
    %c0_34 = arith.constant 0 : index
    %61 = vector.load %arg6[%c0_32, %c0_33, %c0_34] : memref<9x128x128xbf16, #tpu.memory_space<vmem>>, vector<1x128x128xbf16>
    %62 = vector.shape_cast %61 : vector<1x128x128xbf16> to vector<128x128xbf16>
    %cst_35 = arith.constant dense<0.000000e+00> : vector<80x128xf32>
    %63 = tpu.matmul %60, %62, %cst_35 {dimension_numbers = #tpu.dot_dimension_numbers<[1], [0], [0], [1], [0, 0, 1, 1], [], []>} : vector<80x128xbf16>, vector<128x128xbf16>, vector<80x128xf32> -> vector<80x128xf32>
    %64 = arith.addf %59, %63 : vector<80x128xf32>
    %c1_36 = arith.constant 1 : index
    %c0_37 = arith.constant 0 : index
    %65 = vector.load %arg11[%c1_36, %c0_37] : memref<108x128xbf16, #tpu.memory_space<vmem>>, vector<80x128xbf16>
    %c1_38 = arith.constant 1 : index
    %c0_39 = arith.constant 0 : index
    %c0_40 = arith.constant 0 : index
    %66 = vector.load %arg6[%c1_38, %c0_39, %c0_40] : memref<9x128x128xbf16, #tpu.memory_space<vmem>>, vector<1x128x128xbf16>
    %67 = vector.shape_cast %66 : vector<1x128x128xbf16> to vector<128x128xbf16>
    %cst_41 = arith.constant dense<0.000000e+00> : vector<80x128xf32>
    %68 = tpu.matmul %65, %67, %cst_41 {dimension_numbers = #tpu.dot_dimension_numbers<[1], [0], [0], [1], [0, 0, 1, 1], [], []>} : vector<80x128xbf16>, vector<128x128xbf16>, vector<80x128xf32> -> vector<80x128xf32>
    %69 = arith.addf %64, %68 : vector<80x128xf32>
    %c2 = arith.constant 2 : index
    %c0_42 = arith.constant 0 : index
    %70 = vector.load %arg11[%c2, %c0_42] : memref<108x128xbf16, #tpu.memory_space<vmem>>, vector<80x128xbf16>
    %c2_43 = arith.constant 2 : index
    %c0_44 = arith.constant 0 : index
    %c0_45 = arith.constant 0 : index
    %71 = vector.load %arg6[%c2_43, %c0_44, %c0_45] : memref<9x128x128xbf16, #tpu.memory_space<vmem>>, vector<1x128x128xbf16>
    %72 = vector.shape_cast %71 : vector<1x128x128xbf16> to vector<128x128xbf16>
    %cst_46 = arith.constant dense<0.000000e+00> : vector<80x128xf32>
    %73 = tpu.matmul %70, %72, %cst_46 {dimension_numbers = #tpu.dot_dimension_numbers<[1], [0], [0], [1], [0, 0, 1, 1], [], []>} : vector<80x128xbf16>, vector<128x128xbf16>, vector<80x128xf32> -> vector<80x128xf32>
    %74 = arith.addf %69, %73 : vector<80x128xf32>
    %c10 = arith.constant 10 : index
    %c0_47 = arith.constant 0 : index
    %75 = vector.load %arg11[%c10, %c0_47] : memref<108x128xbf16, #tpu.memory_space<vmem>>, vector<80x128xbf16>
    %c3 = arith.constant 3 : index
    %c0_48 = arith.constant 0 : index
    %c0_49 = arith.constant 0 : index
    %76 = vector.load %arg6[%c3, %c0_48, %c0_49] : memref<9x128x128xbf16, #tpu.memory_space<vmem>>, vector<1x128x128xbf16>
    %77 = vector.shape_cast %76 : vector<1x128x128xbf16> to vector<128x128xbf16>
    %cst_50 = arith.constant dense<0.000000e+00> : vector<80x128xf32>
    %78 = tpu.matmul %75, %77, %cst_50 {dimension_numbers = #tpu.dot_dimension_numbers<[1], [0], [0], [1], [0, 0, 1, 1], [], []>} : vector<80x128xbf16>, vector<128x128xbf16>, vector<80x128xf32> -> vector<80x128xf32>
    %79 = arith.addf %74, %78 : vector<80x128xf32>
    %c11_51 = arith.constant 11 : index
    %c0_52 = arith.constant 0 : index
    %80 = vector.load %arg11[%c11_51, %c0_52] : memref<108x128xbf16, #tpu.memory_space<vmem>>, vector<80x128xbf16>
    %c4 = arith.constant 4 : index
    %c0_53 = arith.constant 0 : index
    %c0_54 = arith.constant 0 : index
    %81 = vector.load %arg6[%c4, %c0_53, %c0_54] : memref<9x128x128xbf16, #tpu.memory_space<vmem>>, vector<1x128x128xbf16>
    %82 = vector.shape_cast %81 : vector<1x128x128xbf16> to vector<128x128xbf16>
    %cst_55 = arith.constant dense<0.000000e+00> : vector<80x128xf32>
    %83 = tpu.matmul %80, %82, %cst_55 {dimension_numbers = #tpu.dot_dimension_numbers<[1], [0], [0], [1], [0, 0, 1, 1], [], []>} : vector<80x128xbf16>, vector<128x128xbf16>, vector<80x128xf32> -> vector<80x128xf32>
    %84 = arith.addf %79, %83 : vector<80x128xf32>
    %c12 = arith.constant 12 : index
    %c0_56 = arith.constant 0 : index
    %85 = vector.load %arg11[%c12, %c0_56] : memref<108x128xbf16, #tpu.memory_space<vmem>>, vector<80x128xbf16>
    %c5 = arith.constant 5 : index
    %c0_57 = arith.constant 0 : index
    %c0_58 = arith.constant 0 : index
    %86 = vector.load %arg6[%c5, %c0_57, %c0_58] : memref<9x128x128xbf16, #tpu.memory_space<vmem>>, vector<1x128x128xbf16>
    %87 = vector.shape_cast %86 : vector<1x128x128xbf16> to vector<128x128xbf16>
    %cst_59 = arith.constant dense<0.000000e+00> : vector<80x128xf32>
    %88 = tpu.matmul %85, %87, %cst_59 {dimension_numbers = #tpu.dot_dimension_numbers<[1], [0], [0], [1], [0, 0, 1, 1], [], []>} : vector<80x128xbf16>, vector<128x128xbf16>, vector<80x128xf32> -> vector<80x128xf32>
    %89 = arith.addf %84, %88 : vector<80x128xf32>
    %c20 = arith.constant 20 : index
    %c0_60 = arith.constant 0 : index
    %90 = vector.load %arg11[%c20, %c0_60] : memref<108x128xbf16, #tpu.memory_space<vmem>>, vector<80x128xbf16>
    %c6 = arith.constant 6 : index
    %c0_61 = arith.constant 0 : index
    %c0_62 = arith.constant 0 : index
    %91 = vector.load %arg6[%c6, %c0_61, %c0_62] : memref<9x128x128xbf16, #tpu.memory_space<vmem>>, vector<1x128x128xbf16>
    %92 = vector.shape_cast %91 : vector<1x128x128xbf16> to vector<128x128xbf16>
    %cst_63 = arith.constant dense<0.000000e+00> : vector<80x128xf32>
    %93 = tpu.matmul %90, %92, %cst_63 {dimension_numbers = #tpu.dot_dimension_numbers<[1], [0], [0], [1], [0, 0, 1, 1], [], []>} : vector<80x128xbf16>, vector<128x128xbf16>, vector<80x128xf32> -> vector<80x128xf32>
    %94 = arith.addf %89, %93 : vector<80x128xf32>
    %c21 = arith.constant 21 : index
    %c0_64 = arith.constant 0 : index
    %95 = vector.load %arg11[%c21, %c0_64] : memref<108x128xbf16, #tpu.memory_space<vmem>>, vector<80x128xbf16>
    %c7 = arith.constant 7 : index
    %c0_65 = arith.constant 0 : index
    %c0_66 = arith.constant 0 : index
    %96 = vector.load %arg6[%c7, %c0_65, %c0_66] : memref<9x128x128xbf16, #tpu.memory_space<vmem>>, vector<1x128x128xbf16>
    %97 = vector.shape_cast %96 : vector<1x128x128xbf16> to vector<128x128xbf16>
    %cst_67 = arith.constant dense<0.000000e+00> : vector<80x128xf32>
    %98 = tpu.matmul %95, %97, %cst_67 {dimension_numbers = #tpu.dot_dimension_numbers<[1], [0], [0], [1], [0, 0, 1, 1], [], []>} : vector<80x128xbf16>, vector<128x128xbf16>, vector<80x128xf32> -> vector<80x128xf32>
    %99 = arith.addf %94, %98 : vector<80x128xf32>
    %c22 = arith.constant 22 : index
    %c0_68 = arith.constant 0 : index
    %100 = vector.load %arg11[%c22, %c0_68] : memref<108x128xbf16, #tpu.memory_space<vmem>>, vector<80x128xbf16>
    %c8 = arith.constant 8 : index
    %c0_69 = arith.constant 0 : index
    %c0_70 = arith.constant 0 : index
    %101 = vector.load %arg6[%c8, %c0_69, %c0_70] : memref<9x128x128xbf16, #tpu.memory_space<vmem>>, vector<1x128x128xbf16>
    %102 = vector.shape_cast %101 : vector<1x128x128xbf16> to vector<128x128xbf16>
    %cst_71 = arith.constant dense<0.000000e+00> : vector<80x128xf32>
    %103 = tpu.matmul %100, %102, %cst_71 {dimension_numbers = #tpu.dot_dimension_numbers<[1], [0], [0], [1], [0, 0, 1, 1], [], []>} : vector<80x128xbf16>, vector<128x128xbf16>, vector<80x128xf32> -> vector<80x128xf32>
    %104 = arith.addf %99, %103 : vector<80x128xf32>
    %cst_72 = arith.constant 0.000000e+00 : f32
    %105 = vector.shape_cast %4 : vector<80x1xi1> to vector<80x1xi1>
    %106 = vector.broadcast %105 : vector<80x1xi1> to vector<80x128xi1>
    %107 = vector.broadcast %cst_72 : f32 to vector<80x128xf32>
    %108 = arith.select %106, %104, %107 : vector<80x128xi1>, vector<80x128xf32>
    %109 = arith.truncf %108 : vector<80x128xf32> to vector<80x128xbf16>
    %c0_73 = arith.constant 0 : index
    %c0_74 = arith.constant 0 : index
    %c0_75 = arith.constant 0 : index
    %110 = vector.load %arg8[%c0_73, %c0_74, %c0_75] : memref<1x80x128xbf16, #tpu.memory_space<vmem>>, vector<1x80x128xbf16>
    %111 = vector.shape_cast %110 : vector<1x80x128xbf16> to vector<80x128xbf16>
    %112 = vector.shape_cast %109 : vector<80x128xbf16> to vector<1x80x128xbf16>
    tpu.vector_store %arg8[%c0_73, %c0_74, %c0_75], %112 {strides = array<i32>} : memref<1x80x128xbf16, #tpu.memory_space<vmem>>, vector<1x80x128xbf16>,
    %cst_76 = arith.constant dense<0.000000e+00> : vector<128xf32>
    %113 = vector.multi_reduction <add>, %108, %cst_76 [0] : vector<80x128xf32> to vector<128xf32>
    %114 = vector.shape_cast %113 : vector<128xf32> to vector<1x128xf32>
    %c0_77 = arith.constant 0 : index
    %c0_78 = arith.constant 0 : index
    %c0_79 = arith.constant 0 : index
    %c0_80 = arith.constant 0 : index
    %115 = vector.load %arg9[%c0_77, %c0_78, %c0_79, %c0_80] : memref<1x1x1x128xf32, #tpu.memory_space<vmem>>, vector<1x1x1x128xf32>
    %116 = vector.shape_cast %115 : vector<1x1x1x128xf32> to vector<1x128xf32>
    %117 = vector.shape_cast %114 : vector<1x128xf32> to vector<1x1x1x128xf32>
    tpu.vector_store %arg9[%c0_77, %c0_78, %c0_79, %c0_80], %117 {strides = array<i32>} : memref<1x1x1x128xf32, #tpu.memory_space<vmem>>, vector<1x1x1x128xf32>,
    %118 = arith.mulf %108, %108 : vector<80x128xf32>
    %cst_81 = arith.constant dense<0.000000e+00> : vector<128xf32>
    %119 = vector.multi_reduction <add>, %118, %cst_81 [0] : vector<80x128xf32> to vector<128xf32>
    %120 = vector.shape_cast %119 : vector<128xf32> to vector<1x128xf32>
    %c0_82 = arith.constant 0 : index
    %c0_83 = arith.constant 0 : index
    %c0_84 = arith.constant 0 : index
    %c0_85 = arith.constant 0 : index
    %121 = vector.load %arg10[%c0_82, %c0_83, %c0_84, %c0_85] : memref<1x1x1x128xf32, #tpu.memory_space<vmem>>, vector<1x1x1x128xf32>
    %122 = vector.shape_cast %121 : vector<1x1x1x128xf32> to vector<1x128xf32>
    %123 = vector.shape_cast %120 : vector<1x128xf32> to vector<1x1x1x128xf32>
    tpu.vector_store %arg10[%c0_82, %c0_83, %c0_84, %c0_85], %123 {strides = array<i32>} : memref<1x1x1x128xf32, #tpu.memory_space<vmem>>, vector<1x1x1x128xf32>,
    return
  }
  func.func @transform_0(%arg0: i32, %arg1: i32) -> (i32, i32, i32) {
    %c0_i32 = arith.constant 0 : i32
    %c0_i32_0 = arith.constant 0 : i32
    return %arg0, %arg1, %c0_i32 : i32, i32, i32
  }
  func.func @transform_1(%arg0: i32, %arg1: i32) -> (i32, i32, i32, i32) {
    %c0_i32 = arith.constant 0 : i32
    %c0_i32_0 = arith.constant 0 : i32
    %c0_i32_1 = arith.constant 0 : i32
    return %arg0, %arg1, %c0_i32, %c0_i32_0 : i32, i32, i32, i32
  }
  func.func @transform_2(%arg0: i32, %arg1: i32) -> (i32, i32) {
    %c0_i32 = arith.constant 0 : i32
    %c0_i32_0 = arith.constant 0 : i32
    %c0_i32_1 = arith.constant 0 : i32
    return %c0_i32, %c0_i32_0 : i32, i32
  }
  func.func @transform_3(%arg0: i32, %arg1: i32) -> (i32, i32) {
    %c0_i32 = arith.constant 0 : i32
    %c0_i32_0 = arith.constant 0 : i32
    %c0_i32_1 = arith.constant 0 : i32
    return %c0_i32, %c0_i32_0 : i32, i32
  }
  func.func @transform_4(%arg0: i32, %arg1: i32) -> (i32, i32, i32) {
    %c0_i32 = arith.constant 0 : i32
    %c0_i32_0 = arith.constant 0 : i32
    %c0_i32_1 = arith.constant 0 : i32
    %c0_i32_2 = arith.constant 0 : i32
    return %c0_i32, %c0_i32_0, %c0_i32_1 : i32, i32, i32
  }
  func.func @transform_5(%arg0: i32, %arg1: i32) -> (i32, i32) {
    %c0_i32 = arith.constant 0 : i32
    %c0_i32_0 = arith.constant 0 : i32
    return %arg1, %c0_i32 : i32, i32
  }
  func.func @transform_6(%arg0: i32, %arg1: i32) -> (i32, i32, i32) {
    %c0_i32 = arith.constant 0 : i32
    %c0_i32_0 = arith.constant 0 : i32
    return %arg0, %arg1, %c0_i32 : i32, i32, i32
  }
  func.func @transform_7(%arg0: i32, %arg1: i32) -> (i32, i32, i32, i32) {
    %c0_i32 = arith.constant 0 : i32
    %c0_i32_0 = arith.constant 0 : i32
    %c0_i32_1 = arith.constant 0 : i32
    return %arg0, %arg1, %c0_i32, %c0_i32_0 : i32, i32, i32, i32
  }
  func.func @transform_8(%arg0: i32, %arg1: i32) -> (i32, i32, i32, i32) {
    %c0_i32 = arith.constant 0 : i32
    %c0_i32_0 = arith.constant 0 : i32
    %c0_i32_1 = arith.constant 0 : i32
    return %arg0, %arg1, %c0_i32, %c0_i32_0 : i32, i32, i32, i32
  }
}

</mosaic_0001>

<bundles_post_ra>
// kernel: tile.8
= control target key start
LH: loop header
LB: loop body
LE: loop exit
PB: predicated region body
PF: predicated region fallthrough
CT: control target
= control target key end

     0   :  { %s22_s0 = inlined_call_operand.vmem [shape: f32[10], index: 0, kind: input, shape index: {}]   ;;  %s23_s1 = inlined_call_operand.vmem [shape: f32[8,10], index: 1, kind: output, shape index: {}]  }
   0x1   :  { %v4_v0 = vld [vmem:[%s22_s0] ss:$0 sm:$0xff] }
   0x2   :  { %5 = vst [vmem:[%s23_s1] sm:$0xff] %v4_v0 }

// kernel: tile.0
= control target key start
LH: loop header
LB: loop body
LE: loop exit
PB: predicated region body
PF: predicated region fallthrough
CT: control target
= control target key end

     0   :  { %s140_s10 = smov 127   ;;  %vm3_vm0 = vcmask 7168   ;;  %s141_s11 = smov 125   ;;  %s295_s0 = inlined_call_operand.vmem [shape: f32[8,10], index: 0, kind: input, shape index: {}]   ;;  %s296_s1 = inlined_call_operand.vmem [shape: f32[80,1], index: 1, kind: output, shape index: {}]  }
   0x1   :  { %v5_v0 = vld.sshfl [vmem:[%s295_s0] sm:$0xff pattern:$0x36251470]   ;;  %s143_s18 = smov 124   ;;  %s144_s19 = smov 123  }
   0x2   :  { %v29_v1 = vld.sshfl [vmem:[%s295_s0] sm:$0xff pattern:$0x62514703]   ;;  %6 = vrot.lane.b32.xlu0 %v5_v0, %s140_s10  ;;  %s145_s20 = smov 122   ;;  %s146_s21 = smov 121  }
   0x3   :  { %30 = vrot.lane.b32.xlu1 %v29_v1, %s141_s11  ;;  %v2_v2 = vld [vmem:[%s295_s0] sm:$0xff]   ;;  %s147_s22 = smov 120   ;;  %s148_s23 = smov 119  }
   0x4   :  { %4 = vst.msk [vmem:[%s296_s1] ss:$10 sm:$0xff] %vm3_vm0, %v2_v2   ;;  %v41_v3 = vld.sshfl [vmem:[%s295_s0] sm:$0xff pattern:$0x25147036]   ;;  %s142_s0 = smov 126  }
   0x6   :  { %18 = vrot.lane.b32.xlu0 %v29_v1, %s142_s0 }
   0x7   :  { %42 = vrot.lane.b32.xlu1 %v41_v3, %s143_s18 }
   0xa   :  { %52 = vrot.lane.b32.xlu0 %v41_v3, %s144_s19 }
   0xb   :  { %62 = vrot.lane.b32.xlu1 %v41_v3, %s145_s20 }
   0xe   :  { %72 = vrot.lane.b32.xlu0 %v41_v3, %s146_s21 }
   0xf   :  { %82 = vrot.lane.b32.xlu1 %v41_v3, %s147_s22 }
  0x12   :  { %92 = vrot.lane.b32.xlu0 %v41_v3, %s148_s23 }
  0x74   :  { %v7_v4 = vpop.permute.xlu0 %6  }
  0x75   :  { %v31_v5 = vpop.permute.xlu1 %30   ;;  %101 = vst.msk [vmem:[%s296_s1 + $0x1] ss:$70 sm:$0x3] %vm3_vm0, %v7_v4   ;;  %102 = vst.msk [vmem:[%s296_s1 + $0x65] ss:$-30 sm:$0xc] %vm3_vm0, %v7_v4  }
  0x76   :  { %103 = vst.msk [vmem:[%s296_s1 + $0xab] ss:$-30 sm:$0x30] %vm3_vm0, %v7_v4   ;;  %104 = vst.msk [vmem:[%s296_s1 + $0xf1] ss:$-30 sm:$0xc0] %vm3_vm0, %v7_v4  }
  0x77   :  { %109 = vst.msk [vmem:[%s296_s1 + $0x21] ss:$-30 sm:$0x3] %vm3_vm0, %v31_v5   ;;  %110 = vst.msk [vmem:[%s296_s1 + $0x85] ss:$-30 sm:$0x1c] %vm3_vm0, %v31_v5  }
  0x78   :  { %111 = vst.msk [vmem:[%s296_s1 + $0xcb] ss:$-30 sm:$0x60] %vm3_vm0, %v31_v5   ;;  %112 = vst.msk [vmem:[%s296_s1 + $0x38] sm:$0x80] %vm3_vm0, %v31_v5   ;;  %v19_v6 = vpop.permute.xlu0 %18  }
  0x79   :  { %v43_v7 = vpop.permute.xlu1 %42   ;;  %105 = vst.msk [vmem:[%s296_s1 + $0x20] ss:$-30 sm:$0x3] %vm3_vm0, %v19_v6   ;;  %106 = vst.msk [vmem:[%s296_s1 + $0x84] ss:$-30 sm:$0x1c] %vm3_vm0, %v19_v6  }
  0x7a   :  { %107 = vst.msk [vmem:[%s296_s1 + $0xca] ss:$-30 sm:$0x60] %vm3_vm0, %v19_v6   ;;  %108 = vst.msk [vmem:[%s296_s1 + $0x37] sm:$0x80] %vm3_vm0, %v19_v6  }
  0x7b   :  { %113 = vst.msk [vmem:[%s296_s1 + $0x40] ss:$-30 sm:$0x7] %vm3_vm0, %v43_v7   ;;  %114 = vst.msk [vmem:[%s296_s1 + $0xa4] ss:$-30 sm:$0x38] %vm3_vm0, %v43_v7  }
  0x7c   :  { %115 = vst.msk [vmem:[%s296_s1 + $0xea] ss:$-30 sm:$0xc0] %vm3_vm0, %v43_v7   ;;  %v53_v8 = vpop.permute.xlu0 %52  }
  0x7d   :  { %v63_v9 = vpop.permute.xlu1 %62   ;;  %116 = vst.msk [vmem:[%s296_s1 + $0x41] ss:$-30 sm:$0x7] %vm3_vm0, %v53_v8   ;;  %117 = vst.msk [vmem:[%s296_s1 + $0xa5] ss:$-30 sm:$0x38] %vm3_vm0, %v53_v8  }
  0x7e   :  { %118 = vst.msk [vmem:[%s296_s1 + $0xeb] ss:$-30 sm:$0xc0] %vm3_vm0, %v53_v8   ;;  %119 = vst.msk [vmem:[%s296_s1 + $0x42] ss:$-30 sm:$0x7] %vm3_vm0, %v63_v9  }
  0x7f   :  { %120 = vst.msk [vmem:[%s296_s1 + $0xa6] ss:$-30 sm:$0x38] %vm3_vm0, %v63_v9   ;;  %121 = vst.msk [vmem:[%s296_s1 + $0xec] ss:$-30 sm:$0xc0] %vm3_vm0, %v63_v9  }
  0x80   :  { %v73_v10 = vpop.permute.xlu0 %72  }
  0x81   :  { %v83_v11 = vpop.permute.xlu1 %82   ;;  %122 = vst.msk [vmem:[%s296_s1 + $0x43] ss:$-30 sm:$0x7] %vm3_vm0, %v73_v10   ;;  %123 = vst.msk [vmem:[%s296_s1 + $0xa7] ss:$-30 sm:$0x38] %vm3_vm0, %v73_v10  }
  0x82   :  { %124 = vst.msk [vmem:[%s296_s1 + $0xed] ss:$-30 sm:$0xc0] %vm3_vm0, %v73_v10   ;;  %125 = vst.msk [vmem:[%s296_s1 + $0x44] ss:$-30 sm:$0x7] %vm3_vm0, %v83_v11  }
  0x83   :  { %126 = vst.msk [vmem:[%s296_s1 + $0xa8] ss:$-30 sm:$0x38] %vm3_vm0, %v83_v11   ;;  %127 = vst.msk [vmem:[%s296_s1 + $0xee] ss:$-30 sm:$0xc0] %vm3_vm0, %v83_v11  }
  0x84   :  { %v93_v12 = vpop.permute.xlu0 %92  }
  0x85   :  { %128 = vst.msk [vmem:[%s296_s1 + $0x45] ss:$-30 sm:$0x7] %vm3_vm0, %v93_v12   ;;  %129 = vst.msk [vmem:[%s296_s1 + $0xa9] ss:$-30 sm:$0x38] %vm3_vm0, %v93_v12  }
  0x86   :  { %130 = vst.msk [vmem:[%s296_s1 + $0xef] ss:$-30 sm:$0xc0] %vm3_vm0, %v93_v12  }

// kernel: _lambda_.5
= control target key start
LH: loop header
LB: loop body
LE: loop exit
PB: predicated region body
PF: predicated region fallthrough
CT: control target
= control target key end

     0   :  { %s476_s12 = smov 0   ;;  %s478_s13 = smov 0   ;;  %s538_s0 = inlined_call_operand.vmem [shape: bf16[2,80,128], index: 0, kind: input, shape index: {}]   ;;  %s539_s1 = inlined_call_operand.vmem [shape: f32[1,128], index: 1, kind: input, shape index: {}]   ;;  %s540_s2 = inlined_call_operand.vmem [shape: f32[1,128], index: 2, kind: input, shape index: {}]   ;;  %s541_s3 = inlined_call_operand.vmem [shape: f32[2,80,128], index: 3, kind: output, shape index: {}]  }
   0x1   :  { %s480_s14 = smov 0  }
   0x2 LB: > { %s25_s15 = sadd.s32 1, %s450_s13  ;;  %p375_p0 = scmp.ge.s32.totalorder %s454_s14, 1  ;;  %s454_s14 = sphi %s480_s14, %s13_s14   ;;  %s450_s13 = sphi %s478_s13, %s543_s13   ;;  %s446_s12 = sphi %s476_s12, %s542_s12  }
   0x3   : > { %p27_p1 = scmp.ge.s32.totalorder %s25_s15, 2  ;;  %p158_p2 = scmp.lt.s32.totalorder %s454_s14, 3 }
   0x5   : > { %s545_s15 = smov (%p27_p1, %s25_s15), 0  ;;  %p159_p3 = pnand %p375_p0, %p158_p2 }
   0x6   : > { %p191_p4 = scmp.lt.s32.totalorder (!%p159_p3), %s446_s12, 1  ;;  %v378_v0 = vld [vmem:[%s539_s1] ss:$0 sm:$0xff] (!%p159_p3) }
   0x7   : > { %162 = sbr.rel (%p159_p3) target bundleno = 36 (0x24), region = 32  ;;  %v379_v9 = vld [vmem:[%s540_s2] ss:$0 sm:$0xff] (!%p159_p3) }
   0xe   : > { %s547_s12 = smov (!%p191_p4, %s446_s12), 1 }
   0xf   : > { %s406_s16 = smul.u32 40, %s547_s12 }
  0x10   : > { %s407_s22 = smul.u32 80, %s547_s12 }
  0x11   : > { %s500_s19 = scalar_lea.vmem %s538_s0, %s406_s16 }
  0x12   : > { %v383_v1 = vld [vmem:[%s500_s19] sm:$0xff]   ;;  %v402_v2 = vld [vmem:[%s500_s19 + $0x8] sm:$0xff]   ;;  %v403_v3 = vld [vmem:[%s500_s19 + $0x10] sm:$0xff]   ;;  %s516_s27 = scalar_lea.vmem %s541_s3, %s407_s22 }
  0x13   : > { %v384_v4 = vunpack.c.l.bf16 %v383_v1  ;;  %v385_v5 = vunpack.c.h.bf16 %v383_v1  ;;  %v388_v6 = vunpack.c.l.bf16 %v402_v2  ;;  %v389_v7 = vunpack.c.h.bf16 %v402_v2  ;;  %v404_v8 = vld [vmem:[%s500_s19 + $0x18] sm:$0xff]   ;;  %v405_v30 = vld [vmem:[%s500_s19 + $0x20] sm:$0xff]  }
  0x14   : > { %v392_v10 = vunpack.c.l.bf16 %v403_v3  ;;  %v393_v11 = vunpack.c.h.bf16 %v403_v3  ;;  %v396_v12 = vunpack.c.l.bf16 %v404_v8  ;;  %v397_v13 = vunpack.c.h.bf16 %v404_v8 }
  0x15   : > { %v237_v14 = vmul.f32 %v384_v4, %v378_v0  ;;  %v238_v15 = vmul.f32 %v385_v5, %v378_v0  ;;  %v239_v16 = vmul.f32 %v388_v6, %v378_v0  ;;  %v240_v17 = vmul.f32 %v389_v7, %v378_v0 }
  0x16   : > { %v241_v18 = vmul.f32 %v392_v10, %v378_v0  ;;  %v242_v19 = vmul.f32 %v393_v11, %v378_v0  ;;  %v243_v20 = vmul.f32 %v396_v12, %v378_v0  ;;  %v244_v21 = vmul.f32 %v397_v13, %v378_v0 }
  0x17   : > { %v254_v22 = vadd.f32 %v379_v9, %v237_v14  ;;  %v255_v23 = vadd.f32 %v379_v9, %v238_v15  ;;  %v256_v24 = vadd.f32 %v379_v9, %v239_v16  ;;  %v257_v25 = vadd.f32 %v379_v9, %v240_v17 }
  0x18   : > { %v258_v26 = vadd.f32 %v379_v9, %v241_v18  ;;  %v259_v27 = vadd.f32 %v379_v9, %v242_v19  ;;  %v260_v28 = vadd.f32 %v379_v9, %v243_v20  ;;  %v261_v29 = vadd.f32 %v379_v9, %v244_v21 }
  0x19   : > { %v264_v31 = vmax.f32 %v254_v22, 0.0  ;;  %v265_v32 = vmax.f32 %v255_v23, 0.0  ;;  %v266_v33 = vmax.f32 %v256_v24, 0.0  ;;  %v267_v34 = vmax.f32 %v257_v25, 0.0 }
  0x1a   : > { %v268_v35 = vmax.f32 %v258_v26, 0.0  ;;  %v269_v36 = vmax.f32 %v259_v27, 0.0  ;;  %v270_v37 = vmax.f32 %v260_v28, 0.0  ;;  %v271_v38 = vmax.f32 %v261_v29, 0.0 }
  0x1b   : > { %274 = vst [vmem:[%s516_s27] sm:$0xff] %v264_v31  ;;  %275 = vst [vmem:[%s516_s27 + $0x8] sm:$0xff] %v265_v32  ;;  %v400_v39 = vunpack.c.l.bf16 %v405_v30  ;;  %v401_v40 = vunpack.c.h.bf16 %v405_v30 }
  0x1c   : > { %276 = vst [vmem:[%s516_s27 + $0x10] sm:$0xff] %v266_v33  ;;  %277 = vst [vmem:[%s516_s27 + $0x18] sm:$0xff] %v267_v34 }
  0x1d   : > { %278 = vst [vmem:[%s516_s27 + $0x20] sm:$0xff] %v268_v35  ;;  %279 = vst [vmem:[%s516_s27 + $0x28] sm:$0xff] %v269_v36  ;;  %v245_v41 = vmul.f32 %v400_v39, %v378_v0  ;;  %v246_v42 = vmul.f32 %v401_v40, %v378_v0 }
  0x1e   : > { %280 = vst [vmem:[%s516_s27 + $0x30] sm:$0xff] %v270_v37  ;;  %281 = vst [vmem:[%s516_s27 + $0x38] sm:$0xff] %v271_v38 }
  0x1f   : > { %v262_v43 = vadd.f32 %v379_v9, %v245_v41  ;;  %v263_v44 = vadd.f32 %v379_v9, %v246_v42 }
  0x21   : > { %v272_v45 = vmax.f32 %v262_v43, 0.0  ;;  %v273_v46 = vmax.f32 %v263_v44, 0.0 }
  0x23   : > { %282 = vst [vmem:[%s516_s27 + $0x40] sm:$0xff] %v272_v45  ;;  %283 = vst [vmem:[%s516_s27 + $0x48] sm:$0xff] %v273_v46 }
  0x24 PF: > { %s13_s14 = sadd.s32 1, %s454_s14   ;;  %s542_s12 = smov %s450_s13 }
  0x25   : > { %p10_p5 = scmp.ge.s32.totalorder %s13_s14, 4   ;;  %s543_s13 = smov %s545_s15 }
  0x27   :  { %12 = sbr.rel (!%p10_p5) target bundleno = 2 (0x2), region = 62 }

// kernel: _lambda_.3
= control target key start
LH: loop header
LB: loop body
LE: loop exit
PB: predicated region body
PF: predicated region fallthrough
CT: control target
= control target key end

     0   :  { %s3048_s21 = smov 0   ;;  %s3050_s22 = smov 0   ;;  %s3747_s0 = inlined_call_operand.vmem [shape: bf16[2,2,80,8], index: 0, kind: input, shape index: {}]   ;;  %s3748_s1 = inlined_call_operand.vmem [shape: bf16[2,4,10,8], index: 1, kind: input, shape index: {}]   ;;  %s3749_s2 = inlined_call_operand.vmem [shape: bf16[9,4,128], index: 2, kind: input, shape index: {}]   ;;  %s3750_s3 = inlined_call_operand.vmem [shape: f32[80,1], index: 3, kind: input, shape index: {}]   ;;  %s3751_s4 = inlined_call_operand.vmem [shape: bf16[2,80,128], index: 4, kind: output, shape index: {0}]   ;;  %s3752_s5 = inlined_call_operand.vmem [shape: f32[2,1,1,128], index: 5, kind: output, shape index: {1}]   ;;  %s3753_s6 = inlined_call_operand.vmem [shape: f32[2,1,1,128], index: 6, kind: output, shape index: {2}]  }
   0x1   :  { %s3052_s23 = smov 0  }
   0x2 LB: > { %s29_s24 = sadd.s32 1, %s3003_s22  ;;  %p2383_p0 = scmp.ge.s32.totalorder %s3007_s23, 1  ;;  %s3007_s23 = sphi %s3052_s23, %s17_s23   ;;  %s3003_s22 = sphi %s3050_s22, %s3761_s22   ;;  %s2999_s21 = sphi %s3048_s21, %s3760_s21  }
   0x3   : > { %p31_p1 = scmp.ge.s32.totalorder %s29_s24, 2  ;;  %p271_p2 = scmp.lt.s32.totalorder %s3007_s23, 3 }
   0x5   : > { %s3763_s24 = smov (%p31_p1, %s29_s24), 0  ;;  %p272_p3 = pnand %p2383_p0, %p271_p2 }
   0x6   : > { %p337_p4 = scmp.lt.s32.totalorder (!%p272_p3), %s2999_s21, 1  ;;  %s3009_s30 = smov (!%p272_p3), 124   ;;  %v2398_v16 = vld [vmem:[%s3749_s2 + $0x2] sm:$0x3] (!%p272_p3)  ;;  %vm865_vm0 = vcmask (!%p272_p3), 1041408   ;;  %v3010_v17 = vmov (!%p272_p3), 0.0  }
   0x7   : > { %275 = sbr.rel (%p272_p3) target bundleno = 595 (0x253), region = 36  ;;  %2580 = vmatprep.subr.bf16.mxu1 (!%p272_p3), %v3010_v17  ;;  %v867_v18 = vsel (!%p272_p3), %vm865_vm0, %v2398_v16, 0  ;;  %2668 = vmatprep.subr.bf16.mxu0 (!%p272_p3), %v3010_v17  ;;  %vm3011_vm1 = vmmov (!%p272_p3), 0   ;;  %v2434_v21 = vld [vmem:[%s3749_s2 + $0x8] sm:$0x3] (!%p272_p3)  ;;  %vm590_vm2 = vcmask (!%p272_p3), 27648  }
   0x8   : > { %2581 = vmatpush3.bf16.msra.mxu1 (!%p272_p3), %v867_v18  ;;  %2582 = vmatprep.mubr.msk.bf16.mxu1 (!%p272_p3), %vm3011_vm1, %v3010_v17  ;;  %v3180_v22 = vsel (!%p272_p3), %vm865_vm0, %v2434_v21, 0  ;;  %vm591_vm3 = vsmask.f32 (!%p272_p3), 7938  ;;  %v593_v46 = vld [vmem:[#allocation2] sm:$0xf] (!%p272_p3)  ;;  %vm596_vm7 = vcmask (!%p272_p3), 25600  }
   0x9   : > { %2670 = vmatprep.mubr.msk.bf16.mxu0 (!%p272_p3), %vm3011_vm1, %v3010_v17  ;;  %2602 = vmatprep.subr.bf16.mxu1 (!%p272_p3), %v3010_v17  ;;  %vm592_vm4 = vmand (!%p272_p3), %vm590_vm2, %vm591_vm3  ;;  %vm569_vm5 = vsmask.f32 (!%p272_p3), 256  ;;  %vm570_vm6 = vsmask.f32 (!%p272_p3), 4368  ;;  %vm597_vm8 = vsmask.f32 (!%p272_p3), 1280 }
   0xa   : > { %2669 = vmatpush3.bf16.msra.mxu0 (!%p272_p3), %v3180_v22  ;;  %vm571_vm9 = vmor (!%p272_p3), %vm569_vm5, %vm570_vm6  ;;  %v599_v58 = vld [vmem:[#allocation2 + $0x4] sm:$0x3] (!%p272_p3)  ;;  %vm714_vm11 = vcmask (!%p272_p3), 27649   ;;  %vm715_vm12 = vsmask.f32 (!%p272_p3), 7942 }
   0xb   : > { %2690 = vmatprep.subr.bf16.mxu0 (!%p272_p3), %v3010_v17  ;;  %vm3245_vm10 = vmand (!%p272_p3), %vm596_vm7, %vm597_vm8  ;;  %vm602_vm13 = vsmask.f32 (!%p272_p3), 5392  ;;  %vm804_vm3 = vsmask.f32 (!%p272_p3), 7424  ;;  %vm1306_vm5 = vsmask.f32 (!%p272_p3), 6400 }
   0xc   : > { %vm3257_vm14 = vmand (!%p272_p3), %vm714_vm11, %vm715_vm12  ;;  %vm757_vm6 = vsmask.f32 (!%p272_p3), 2304  ;;  %vm756_vm7 = vcmask (!%p272_p3), 26624  }
   0xd   : > { %vm3264_vm15 = vmor (!%p272_p3), %vm597_vm8, %vm602_vm13  ;;  %vm1034_vm8 = vcmask (!%p272_p3), 1046528  }
   0xe   : > { %s3765_s21 = smov (!%p337_p4, %s2999_s21), 1 }
   0xf   : > { %s2486_s25 = sshll.u32 %s3765_s21, 5  ;;  %s2930_s29 = smul.u32 80, %s3765_s21 }
  0x10   : > { %s3072_s28 = scalar_lea.vmem %s3748_s1, %s2486_s25  ;;  %s2931_s8 = smul.u32 40, %s3765_s21 }
  0x11   : > { %v3076_v0 = vld [vmem:[%s3072_s28 + $0x8] sm:$0xf]  ;;  %v3079_v1 = vld [vmem:[%s3072_s28] sm:$0xf]  ;;  %v3086_v2 = vld [vmem:[%s3072_s28 + $0xc] sm:$0x1]  ;;  %s3094_s9 = scalar_lea.vmem %s3747_s0, %s2930_s29  ;;  %s378_s14 = scalar_lea.vmem %s3752_s5, %s3765_s21 }
  0x12   : > { %537 = vrot.lane.b32.xlu1 %v3076_v0, %s3009_s30  ;;  %533 = vrot.lane.b32.xlu0 %v3079_v1, %s3009_s30  ;;  %v3089_v3 = vld [vmem:[%s3072_s28 + $0x4] sm:$0x1]  ;;  %v3104_v5 = vld [vmem:[%s3094_s9] sm:$0xf]  ;;  %s3723_s11 = scalar_lea.vmem %s3751_s4, %s2931_s8  ;;  %s384_s17 = scalar_lea.vmem %s3753_s6, %s3765_s21 }
  0x13   : > { %v3101_v4 = vld [vmem:[%s3094_s9 + $0x4] sm:$0xf]  ;;  %v3111_v6 = vld [vmem:[%s3094_s9 + $0x28] sm:$0xf]  ;;  %v3121_v8 = vld [vmem:[%s3094_s9 + $0x30] sm:$0xf] }
  0x14   : > { %v3114_v7 = vld [vmem:[%s3094_s9 + $0x8] sm:$0xf]  ;;  %v3124_v9 = vld [vmem:[%s3094_s9 + $0x2c] sm:$0xf]  ;;  %v3131_v10 = vld [vmem:[%s3094_s9 + $0x34] sm:$0xf] }
  0x15   : > { %v3134_v11 = vld [vmem:[%s3094_s9 + $0xc] sm:$0xf]  ;;  %v3141_v12 = vld [vmem:[%s3094_s9 + $0x38] sm:$0xf]  ;;  %v3144_v13 = vld [vmem:[%s3094_s9 + $0x10] sm:$0xf] }
  0x16   : > { %539 = vrot.lane.b32.xlu1 %v3086_v2, %s3009_s30  ;;  %535 = vrot.lane.b32.xlu0 %v3089_v3, %s3009_s30  ;;  %v3151_v14 = vld [vmem:[%s3094_s9 + $0x3c] sm:$0xf]  ;;  %v3154_v15 = vld [vmem:[%s3094_s9 + $0x14] sm:$0xf] }
  0x17   : > { %v3167_v19 = vld [vmem:[%s3094_s9 + $0x40] sm:$0xf]  ;;  %v3170_v20 = vld [vmem:[%s3094_s9 + $0x18] sm:$0xf]  ;;  %v3188_v23 = vld [vmem:[%s3094_s9 + $0x44] sm:$0xf] }
  0x18   : > { %v3191_v24 = vld [vmem:[%s3094_s9 + $0x1c] sm:$0xf]  ;;  %v3200_v25 = vld [vmem:[%s3094_s9 + $0x48] sm:$0xf]  ;;  %v3203_v26 = vld [vmem:[%s3094_s9 + $0x20] sm:$0xf] }
  0x19   : > { %v3210_v27 = vld [vmem:[%s3094_s9 + $0x4c] sm:$0xf]  ;;  %v3213_v28 = vld [vmem:[%s3094_s9 + $0x24] sm:$0xf]  ;;  %v3220_v29 = vld [vmem:[%s3072_s28 + $0x18] sm:$0xf] }
  0x1a   : > { %419 = vrot.lane.b32.xlu1 %v3101_v4, %s3009_s30  ;;  %417 = vrot.lane.b32.xlu0 %v3104_v5, %s3009_s30  ;;  %v3223_v30 = vld [vmem:[%s3072_s28 + $0x10] sm:$0xf]  ;;  %v3230_v31 = vld [vmem:[%s3072_s28 + $0x1c] sm:$0x1] }
  0x1b   : > { %v3233_v32 = vld [vmem:[%s3072_s28 + $0x14] sm:$0x1] }
  0x1e   : > { %467 = vrot.lane.b32.xlu1 %v3111_v6, %s3009_s30  ;;  %421 = vrot.lane.b32.xlu0 %v3114_v7, %s3009_s30 }
  0x22   : > { %471 = vrot.lane.b32.xlu1 %v3121_v8, %s3009_s30  ;;  %469 = vrot.lane.b32.xlu0 %v3124_v9, %s3009_s30 }
  0x26   : > { %473 = vrot.lane.b32.xlu1 %v3131_v10, %s3009_s30  ;;  %423 = vrot.lane.b32.xlu0 %v3134_v11, %s3009_s30 }
  0x2a   : > { %475 = vrot.lane.b32.xlu1 %v3141_v12, %s3009_s30  ;;  %425 = vrot.lane.b32.xlu0 %v3144_v13, %s3009_s30 }
  0x2e   : > { %477 = vrot.lane.b32.xlu1 %v3151_v14, %s3009_s30  ;;  %427 = vrot.lane.b32.xlu0 %v3154_v15, %s3009_s30 }
  0x32   : > { %479 = vrot.lane.b32.xlu1 %v3167_v19, %s3009_s30  ;;  %429 = vrot.lane.b32.xlu0 %v3170_v20, %s3009_s30 }
  0x36   : > { %481 = vrot.lane.b32.xlu1 %v3188_v23, %s3009_s30  ;;  %431 = vrot.lane.b32.xlu0 %v3191_v24, %s3009_s30 }
  0x3a   : > { %483 = vrot.lane.b32.xlu1 %v3200_v25, %s3009_s30  ;;  %433 = vrot.lane.b32.xlu0 %v3203_v26, %s3009_s30 }
  0x3e   : > { %485 = vrot.lane.b32.xlu1 %v3210_v27, %s3009_s30  ;;  %435 = vrot.lane.b32.xlu0 %v3213_v28, %s3009_s30 }
  0x42   : > { %545 = vrot.lane.b32.xlu1 %v3220_v29, %s3009_s30  ;;  %541 = vrot.lane.b32.xlu0 %v3223_v30, %s3009_s30 }
  0x46   : > { %547 = vrot.lane.b32.xlu1 %v3230_v31, %s3009_s30  ;;  %543 = vrot.lane.b32.xlu0 %v3233_v32, %s3009_s30 }
  0x84   : > { %v538_v33 = vpop.permute.xlu1 %537  ;;  %v534_v34 = vpop.permute.xlu0 %533 }
  0x85   : > { %v559_v35 = vmax.bf16 %v538_v33, %v3076_v0  ;;  %v557_v36 = vmax.bf16 %v534_v34, %v3079_v1 }
  0x87   : > { %v565_v37 = vmax.bf16 %v559_v35, %v557_v36 }
  0x88   : > { %v540_v38 = vpop.permute.xlu1 %539  ;;  %v536_v39 = vpop.permute.xlu0 %535 }
  0x89   : > { %v573_v40 = vshrl.u32 %v565_v37, 16  ;;  %v560_v41 = vmax.bf16 %v540_v38, %v3086_v2  ;;  %v558_v42 = vmax.bf16 %v536_v39, %v3089_v3  ;;  %v576_v44 = vshll.u32 %v565_v37, 16 }
  0x8b   : > { %v575_v43 = vrot.slane %v573_v40, 7  ;;  %v566_v45 = vmax.bf16 %v560_v41, %v558_v42 }
  0x8c   : > { %v420_v47 = vpop.permute.xlu1 %419  ;;  %v418_v48 = vpop.permute.xlu0 %417 }
  0x8d   : > { %v578_v49 = vor.u32 %v576_v44, %v575_v43  ;;  %v581_v50 = vshrl.u32 %v566_v45, 16  ;;  %v584_v53 = vshll.u32 %v566_v45, 16  ;;  %v579_v56 = vrot.slane %v575_v43, 4 }
  0x8e   : > { %v447_v60 = vmax.bf16 %v418_v48, %v3104_v5  ;;  %v448_v1 = vmax.bf16 %v420_v47, %v3101_v4 }
  0x8f   : > { %v594_v51 = vsel %vm592_vm4, %v578_v49, %v593_v46  ;;  %v583_v52 = vrot.slane %v581_v50, 7  ;;  %vm849_vm4 = vcmask 31744  }
  0x90   : > { %595 = vst [vmem:[#allocation2] sm:$0xf] %v594_v51  ;;  %v468_v54 = vpop.permute.xlu1 %467  ;;  %v422_v55 = vpop.permute.xlu0 %421 }
  0x91   : > { %v586_v59 = vor.u32 %v584_v53, %v583_v52  ;;  %v497_v61 = vmax.bf16 %v3111_v6, %v468_v54  ;;  %v449_v2 = vmax.bf16 %v422_v55, %v3114_v7 }
  0x93   : > { %v587_v62 = vsel %vm571_vm9, %v579_v56, %v586_v59  ;;  %v507_v63 = vmax.bf16 %v497_v61, %v447_v60  ;;  %vm1467_vm9 = vcmask 1045504  }
  0x94   : > { %v600_v0 = vsel %vm3245_vm10, %v587_v62, %v599_v58  ;;  %v472_v3 = vpop.permute.xlu1 %471  ;;  %v470_v16 = vpop.permute.xlu0 %469 }
  0x95   : > { %601 = vst [vmem:[#allocation2 + $0x4] sm:$0x3] %v600_v0  ;;  %v605_v18 = vshrl.u32 %v507_v63, 16  ;;  %v608_v21 = vshll.u32 %v507_v63, 16  ;;  %v499_v33 = vmax.bf16 %v3121_v8, %v472_v3  ;;  %v498_v5 = vmax.bf16 %v3124_v9, %v470_v16 }
  0x97   : > { %v607_v6 = vrot.slane %v605_v18, 6  ;;  %v610_v34 = vrot.slane %v608_v21, 7  ;;  %v509_v35 = vmax.bf16 %v499_v33, %v449_v2  ;;  %v508_v36 = vmax.bf16 %v498_v5, %v448_v1 }
  0x98   : > { %v474_v37 = vpop.permute.xlu1 %473  ;;  %v424_v38 = vpop.permute.xlu0 %423 }
  0x99   : > { %v611_v4 = vor.u32 %v610_v34, %v607_v6  ;;  %v624_v39 = vshrl.u32 %v509_v35, 16  ;;  %v627_v7 = vshll.u32 %v509_v35, 16  ;;  %v614_v40 = vshrl.u32 %v508_v36, 16  ;;  %v772_v34 = vld [vmem:[%s3749_s2] sm:$0x3] }
  0x9a   : > { %v617_v8 = vshll.u32 %v508_v36, 16  ;;  %v500_v9 = vmax.bf16 %v3131_v10, %v474_v37  ;;  %v450_v42 = vmax.bf16 %v424_v38, %v3134_v11 }
  0x9b   : > { %v626_v43 = vrot.slane %v624_v39, 6  ;;  %v629_v44 = vrot.slane %v627_v7, 7  ;;  %v616_v45 = vrot.slane %v614_v40, 6  ;;  %v612_v52 = vrot.slane %v611_v4, 4  ;;  %v762_v7 = vld [vmem:[#allocation2] sm:$0xf] }
  0x9c   : > { %v717_v46 = vld [vmem:[#allocation2 + $0x4] sm:$0xe]  ;;  %v619_v47 = vrot.slane %v617_v8, 7  ;;  %v510_v48 = vmax.bf16 %v500_v9, %v450_v42  ;;  %v476_v49 = vpop.permute.xlu1 %475  ;;  %v426_v50 = vpop.permute.xlu0 %425  ;;  %v3294_v42 = vsel %vm865_vm0, %v772_v34, 0 }
  0x9d   : > { %v718_v53 = vsel %vm3257_vm14, %v611_v4, %v717_v46  ;;  %v501_v10 = vmax.bf16 %v3141_v12, %v476_v49  ;;  %v451_v11 = vmax.bf16 %v426_v50, %v3144_v13  ;;  %v630_v54 = vor.u32 %v629_v44, %v626_v43 }
  0x9e   : > { %719 = vst [vmem:[#allocation2 + $0x4] sm:$0xe] %v718_v53  ;;  %v620_v55 = vor.u32 %v619_v47, %v616_v45  ;;  %v634_v56 = vshrl.u32 %v510_v48, 16  ;;  %v637_v58 = vshll.u32 %v510_v48, 16 }
  0x9f   : > { %v511_v59 = vmax.bf16 %v501_v10, %v451_v11  ;;  %v632_v16 = vrot.slane %v630_v54, 4 }
  0xa0   : > { %v621_v60 = vsel %vm3264_vm15, %v612_v52, %v620_v55  ;;  %v622_v61 = vrot.slane %v620_v55, 4  ;;  %v636_v62 = vrot.slane %v634_v56, 6  ;;  %v639_v63 = vrot.slane %v637_v58, 7  ;;  %v478_v0 = vpop.permute.xlu1 %477  ;;  %v428_v1 = vpop.permute.xlu0 %427 }
  0xa1   : > { %721 = vst.msk [vmem:[#allocation2 + $0x8] sm:$0xf] %vm590_vm2, %v621_v60  ;;  %v644_v2 = vshrl.u32 %v511_v59, 16  ;;  %v647_v12 = vshll.u32 %v511_v59, 16  ;;  %v502_v13 = vmax.bf16 %v3151_v14, %v478_v0  ;;  %v452_v3 = vmax.bf16 %v428_v1, %v3154_v15 }
  0xa2   : > { %v631_v18 = vsel %vm3264_vm15, %v622_v61, %v630_v54  ;;  %v640_v21 = vor.u32 %v639_v63, %v636_v62 }
  0xa3   : > { %722 = vst.msk [vmem:[#allocation2 + $0xc] sm:$0xf] %vm590_vm2, %v631_v18  ;;  %v646_v33 = vrot.slane %v644_v2, 6  ;;  %v649_v5 = vrot.slane %v647_v12, 7  ;;  %v512_v6 = vmax.bf16 %v502_v13, %v452_v3 }
  0xa4   : > { %v641_v35 = vsel %vm3264_vm15, %v632_v16, %v640_v21  ;;  %v642_v14 = vrot.slane %v640_v21, 4  ;;  %v480_v36 = vpop.permute.xlu1 %479  ;;  %v430_v15 = vpop.permute.xlu0 %429 }
  0xa5   : > { %723 = vst.msk [vmem:[#allocation2 + $0x10] sm:$0xf] %vm590_vm2, %v641_v35  ;;  %v650_v37 = vor.u32 %v649_v5, %v646_v33  ;;  %v654_v38 = vshrl.u32 %v512_v6, 16  ;;  %v657_v4 = vshll.u32 %v512_v6, 16  ;;  %v503_v39 = vmax.bf16 %v3167_v19, %v480_v36  ;;  %v3287_v40 = vld [vmem:[#allocation2 + $0x4] sm:$0xf] }
  0xa6   : > { %v453_v8 = vmax.bf16 %v430_v15, %v3170_v20  ;;  %v3291_v9 = vcombine.low %v762_v7, %v3287_v40  ;;  %v1147_v19 = vld [vmem:[#allocation2 + $0x4] sm:$0xe]  ;;  %v2441_v35 = vld [vmem:[%s3749_s2 + $0xa] sm:$0x3] }
  0xa7   : > { %v651_v43 = vsel %vm3264_vm15, %v642_v14, %v650_v37  ;;  %v652_v44 = vrot.slane %v650_v37, 4  ;;  %v656_v45 = vrot.slane %v654_v38, 6  ;;  %v659_v46 = vrot.slane %v657_v4, 7 }
  0xa8   : > { %724 = vst.msk [vmem:[#allocation2 + $0x14] sm:$0xf] %vm590_vm2, %v651_v43  ;;  %v513_v47 = vmax.bf16 %v503_v39, %v453_v8  ;;  %v482_v48 = vpop.permute.xlu1 %481  ;;  %v432_v49 = vpop.permute.xlu0 %431  ;;  %v806_v20 = vshrl.u32 %v3291_v9, 16  ;;  %v808_v50 = vshll.u32 %v3291_v9, 16  ;;  %v3301_v52 = vld [vmem:[#allocation2 + $0x8] sm:$0xf] }
  0xa9   : > { %v660_v53 = vor.u32 %v659_v46, %v656_v45  ;;  %v504_v10 = vmax.bf16 %v3188_v23, %v482_v48  ;;  %v454_v11 = vmax.bf16 %v432_v49, %v3191_v24  ;;  %v3306_v54 = vcombine.low %v1147_v19, %v3301_v52 }
  0xaa   : > { %v664_v55 = vshrl.u32 %v513_v47, 16  ;;  %v667_v56 = vshll.u32 %v513_v47, 16  ;;  %v3308_v58 = vld [vmem:[#allocation2 + $0x8] sm:$0xff]   ;;  %v810_v59 = vrot.slane %v808_v50, 1  ;;  %v1495_v49 = vsel %vm865_vm0, %v2441_v35, 0 }
  0xab   : > { %v661_v60 = vsel %vm3264_vm15, %v652_v44, %v660_v53  ;;  %v662_v61 = vrot.slane %v660_v53, 4  ;;  %v514_v62 = vmax.bf16 %v504_v10, %v454_v11  ;;  %v1308_v63 = vshrl.u32 %v3306_v54, 16 }
  0xac   : > { %725 = vst.msk [vmem:[#allocation2 + $0x18] sm:$0xf] %vm590_vm2, %v661_v60  ;;  %v666_v23 = vrot.slane %v664_v55, 6  ;;  %v669_v0 = vrot.slane %v667_v56, 7  ;;  %v484_v24 = vpop.permute.xlu1 %483  ;;  %v434_v1 = vpop.permute.xlu0 %433  ;;  %v811_v2 = vor.u32 %v810_v59, %v806_v20  ;;  %v813_v12 = vshll.u32 %v3308_v58, 16  ;;  %v3315_v13 = vld [vmem:[#allocation2 + $0xc] sm:$0xff]  }
  0xad   : > { %v674_v3 = vshrl.u32 %v514_v62, 16  ;;  %v677_v16 = vshll.u32 %v514_v62, 16  ;;  %v505_v18 = vmax.bf16 %v3200_v25, %v484_v24  ;;  %v455_v21 = vmax.bf16 %v434_v1, %v3203_v26 }
  0xae   : > { %v670_v33 = vor.u32 %v669_v0, %v666_v23  ;;  %v815_v5 = vrot.slane %v813_v12, 1  ;;  %v1310_v6 = vrot.slane %v1308_v63, 1  ;;  %v1311_v34 = vshll.u32 %v3306_v54, 16 }
  0xaf   : > { %v676_v14 = vrot.slane %v674_v3, 6  ;;  %v679_v36 = vrot.slane %v677_v16, 7  ;;  %v515_v15 = vmax.bf16 %v505_v18, %v455_v21  ;;  %v1316_v37 = vshrl.u32 %v3315_v13, 16  ;;  %v3324_v38 = vld [vmem:[#allocation2 + $0x10] sm:$0xff]  }
  0xb0   : > { %v671_v25 = vsel %vm3264_vm15, %v662_v61, %v670_v33  ;;  %v672_v26 = vrot.slane %v670_v33, 4  ;;  %v486_v4 = vpop.permute.xlu1 %485  ;;  %v436_v39 = vpop.permute.xlu0 %435  ;;  %v816_v7 = vsel %vm804_vm3, %v811_v2, %v815_v5  ;;  %v1313_v8 = vrot.slane %v1311_v34, 2 }
  0xb1   : > { %726 = vst.msk [vmem:[#allocation2 + $0x1c] sm:$0xf] %vm590_vm2, %v671_v25  ;;  %v680_v43 = vor.u32 %v679_v36, %v676_v14  ;;  %v684_v44 = vshrl.u32 %v515_v15, 16  ;;  %v687_v45 = vshll.u32 %v515_v15, 16  ;;  %v506_v46 = vmax.bf16 %v3210_v27, %v486_v4  ;;  %2583 = vmatmul.mubr.msk.bf16.vlgmr.msra.gmra.mrb[0].mxu1 %vm849_vm4, %v816_v7  ;;  %v730_v15 = vld [vmem:[#allocation2 + $0x2c] sm:$0x3] }
  0xb2   : > { %v456_v19 = vmax.bf16 %v436_v39, %v3213_v28  ;;  %v1318_v47 = vrot.slane %v1316_v37, 1  ;;  %v1319_v48 = vshll.u32 %v3315_v13, 16  ;;  %2586 = vmatprep.mubr.msk.bf16.mxu1 %vm3011_vm1, %v3010_v17  ;;  %2603 = vmatpush3.bf16.msra.mxu1 %v3294_v42  ;;  %v1314_v27 = vor.u32 %v1313_v8, %v1310_v6 }
  0xb3   : > { %v681_v20 = vsel %vm3264_vm15, %v672_v26, %v680_v43  ;;  %v686_v50 = vrot.slane %v684_v44, 6  ;;  %v689_v53 = vrot.slane %v687_v45, 7  ;;  %v3340_v10 = vld [vmem:[#allocation2 + $0x14] sm:$0xff]   ;;  %2624 = vmatprep.subr.bf16.mxu1 %v3010_v17  ;;  %v682_v28 = vrot.slane %v680_v43, 4 }
  0xb4   : > { %727 = vst.msk [vmem:[#allocation2 + $0x20] sm:$0xf] %vm590_vm2, %v681_v20  ;;  %v516_v11 = vmax.bf16 %v506_v46, %v456_v19  ;;  %v1321_v55 = vrot.slane %v1319_v48, 2  ;;  %v546_v56 = vpop.permute.xlu1 %545  ;;  %v542_v59 = vpop.permute.xlu0 %541  ;;  %v821_v60 = vshll.u32 %v3324_v38, 16  ;;  %v817_v63 = vshrl.u32 %v3308_v58, 16 }
  0xb5   : > { %v690_v42 = vor.u32 %v689_v53, %v686_v50  ;;  %v563_v61 = vmax.bf16 %v546_v56, %v3220_v29  ;;  %v561_v62 = vmax.bf16 %v542_v59, %v3223_v30  ;;  %v1325_v1 = vshrl.u32 %v3340_v10, 16 }
  0xb6   : > { %v694_v23 = vshrl.u32 %v516_v11, 16  ;;  %v697_v0 = vshll.u32 %v516_v11, 16  ;;  %v1322_v24 = vor.u32 %v1321_v55, %v1318_v47  ;;  %v819_v3 = vor.u32 %v817_v63, %v815_v5  ;;  %v759_v63 = vld [vmem:[#allocation2 + $0x30] sm:$0x7] }
  0xb7   : > { %v691_v2 = vsel %vm3264_vm15, %v682_v28, %v690_v42  ;;  %v567_v12 = vmax.bf16 %v563_v61, %v561_v62  ;;  %v823_v16 = vrot.slane %v821_v60, 1  ;;  %v692_v18 = vrot.slane %v690_v42, 4 }
  0xb8   : > { %728 = vst.msk [vmem:[#allocation2 + $0x24] sm:$0xf] %vm590_vm2, %v691_v2  ;;  %v696_v29 = vrot.slane %v694_v23, 6  ;;  %v699_v21 = vrot.slane %v697_v0, 7  ;;  %v1323_v30 = vsel %vm1306_vm5, %v1314_v27, %v1322_v24  ;;  %v548_v33 = vpop.permute.xlu1 %547  ;;  %v544_v6 = vpop.permute.xlu0 %543  ;;  %v3353_v34 = vld [vmem:[#allocation2 + $0x18] sm:$0xff]   ;;  %v1327_v26 = vrot.slane %v1325_v1, 1 }
  0xb9   : > { %2671 = vmatmul.mubr.msk.bf16.vlgmr.msra.gmra.mrb[0].mxu0 %vm849_vm4, %v1323_v30  ;;  %v734_v35 = vshrl.u32 %v567_v12, 16  ;;  %v737_v14 = vshll.u32 %v567_v12, 16  ;;  %v824_v36 = vsel %vm804_vm3, %v819_v3, %v823_v16  ;;  %v564_v5 = vmax.bf16 %v548_v33, %v3230_v31 }
  0xba   : > { %v700_v37 = vor.u32 %v699_v21, %v696_v29  ;;  %2691 = vmatpush3.bf16.msra.mxu0 %v1495_v49  ;;  %2587 = vmatmul.mubr.msk.bf16.gmra.mrb[4].mxu1 %vm849_vm4, %v824_v36  ;;  %v562_v25 = vmax.bf16 %v544_v6, %v3233_v32  ;;  %v1328_v4 = vshll.u32 %v3340_v10, 16  ;;  %v829_v31 = vshll.u32 %v3353_v34, 16 }
  0xbb   : > { %v736_v39 = vrot.slane %v734_v35, 6  ;;  %v739_v7 = vrot.slane %v737_v14, 7  ;;  %2674 = vmatprep.mubr.msk.bf16.mxu0 %vm3011_vm1, %v3010_v17  ;;  %2590 = vmatprep.mubr.msk.bf16.mxu1 %vm3011_vm1, %v3010_v17  ;;  %v3366_v8 = vld [vmem:[#allocation2 + $0x1c] sm:$0xff]   ;;  %v825_v19 = vshrl.u32 %v3324_v38, 16  ;;  %v1036_v6 = vrot.slane %v3308_v58, 1 }
  0xbc   : > { %v701_v43 = vsel %vm3264_vm15, %v692_v18, %v700_v37  ;;  %v702_v44 = vrot.slane %v700_v37, 4  ;;  %v568_v32 = vmax.bf16 %v564_v5, %v562_v25  ;;  %v1330_v45 = vrot.slane %v1328_v4, 2  ;;  %2712 = vmatprep.subr.bf16.mxu0 %v3010_v17  ;;  %v1461_v35 = vld [vmem:[#allocation2 + $0x4] sm:$0xc] }
  0xbd   : > { %729 = vst.msk [vmem:[#allocation2 + $0x28] sm:$0xf] %vm590_vm2, %v701_v43  ;;  %v740_v46 = vor.u32 %v739_v7, %v736_v39  ;;  %v831_v47 = vrot.slane %v829_v31, 1  ;;  %v1334_v48 = vshrl.u32 %v3366_v8, 16  ;;  %v827_v27 = vor.u32 %v825_v19, %v823_v16  ;;  %vm758_vm2 = vmand %vm756_vm7, %vm757_vm6 }
  0xbe   : > { %v731_v49 = vsel %vm3245_vm10, %v702_v44, %v730_v15  ;;  %v743_v20 = vshrl.u32 %v568_v32, 16  ;;  %v746_v50 = vshll.u32 %v568_v32, 16  ;;  %v1331_v53 = vor.u32 %v1330_v45, %v1327_v26 }
  0xbf   : > { %732 = vst [vmem:[#allocation2 + $0x2c] sm:$0x3] %v731_v49  ;;  %v1336_v28 = vrot.slane %v1334_v48, 1  ;;  %v1337_v11 = vshll.u32 %v3366_v8, 16  ;;  %v3377_v55 = vld [vmem:[#allocation2 + $0x20] sm:$0xff]   ;;  %v741_v56 = vrot.slane %v740_v46, 4  ;;  %v832_v57 = vsel %vm804_vm3, %v827_v27, %v831_v47 }
  0xc0   : > { %v745_v59 = vrot.slane %v743_v20, 6  ;;  %v748_v60 = vrot.slane %v746_v50, 7  ;;  %v1332_v42 = vsel %vm1306_vm5, %v1322_v24, %v1331_v53  ;;  %v837_v62 = vshll.u32 %v3377_v55, 16  ;;  %v1028_v24 = vld [vmem:[#allocation2] sm:$0xe] }
  0xc1   : > { %2675 = vmatmul.mubr.msk.bf16.gmra.mrb[4].mxu0 %vm849_vm4, %v1332_v42  ;;  %v1339_v61 = vrot.slane %v1337_v11, 2  ;;  %v2416_v12 = vcombine.low %v1028_v24, %v3287_v40  ;;  %v833_v16 = vshrl.u32 %v3353_v34, 16  ;;  %v1038_v36 = vrot.slane %v3324_v38, 1  ;;  %v3436_v48 = vld [vmem:[#allocation2 + $0xc] sm:$0xf]  ;;  %v3455_v11 = vld [vmem:[#allocation2 + $0x10] sm:$0xff]  }
  0xc2   : > { %v749_v23 = vor.u32 %v748_v60, %v745_v59  ;;  %2591 = vmatmul.mubr.msk.bf16.gmra.mrb[8].mxu1 %vm849_vm4, %v832_v57  ;;  %2678 = vmatprep.mubr.msk.bf16.mxu0 %vm3011_vm1, %v3010_v17  ;;  %v839_v18 = vrot.slane %v837_v62, 1  ;;  %v1040_v5 = vrot.slane %v3353_v34, 1  ;;  %v2442_v41 = vcombine.low %v1461_v35, %v3301_v52  ;;  %v2448_v52 = vld [vmem:[%s3749_s2 + $0xc] sm:$0x3]  ;;  %v2415_v50 = vld [vmem:[%s3749_s2 + $0x4] sm:$0x3] }
  0xc3   : > { %v3387_v0 = vor.u32 %v1339_v61, %v1336_v28  ;;  %2594 = vmatprep.mubr.msk.bf16.mxu1 %vm3011_vm1, %v3010_v17  ;;  %v835_v33 = vor.u32 %v833_v16, %v831_v47  ;;  %v1035_v51 = vrot.slane %v2416_v12, 1  ;;  %v1042_v37 = vrot.slane %v3377_v55, 1  ;;  %v1894_v28 = vld [vmem:[#allocation2 + $0x8] sm:$0x8]  ;;  %v3459_v42 = vld [vmem:[#allocation2 + $0x18] sm:$0xff]  }
  0xc4   : > { %v750_v1 = vsel %vm3264_vm15, %v741_v56, %v749_v23  ;;  %v2972_v2 = vld [vmem:[#allocation2 + $0x28] ss:$0 sps:$4 sm:$0x11]   ;;  %v3415_v25 = vsel %vm1034_vm8, %v1036_v6, %v1038_v36  ;;  %v3418_v26 = vsel %vm1034_vm8, %v1038_v36, %v1040_v5  ;;  %v1469_v4 = vrot.slane %v3315_v13, 2  ;;  %v3471_v23 = vld [vmem:[#allocation2 + $0x20] sm:$0xff]  }
  0xc5   : > { %v760_v3 = vsel %vm758_vm2, %v750_v1, %v759_v63  ;;  %v1341_v21 = vsel %vm1306_vm5, %v1331_v53, %v3387_v0  ;;  %v840_v40 = vsel %vm804_vm3, %v835_v33, %v839_v18  ;;  %v845_v14 = vshll.u32 %v2972_v2, 16  ;;  %v3448_v27 = vld [vmem:[#allocation2 + $0x24] sm:$0xff]  }
  0xc6   : > { %v753_v29 = vld [vmem:[#allocation2 + $0x2c] sm:$0xe]  ;;  %761 = vst [vmem:[#allocation2 + $0x30] sm:$0x7] %v760_v3  ;;  %v3409_v15 = vsel %vm1034_vm8, %v1035_v51, %v1036_v6  ;;  %v3425_v39 = vsel %vm1034_vm8, %v1040_v5, %v1042_v37  ;;  %v1044_v7 = vrot.slane %v2972_v2, 1  ;;  %v841_v31 = vshrl.u32 %v3377_v55, 16 }
  0xc7   : > { %v754_v30 = vsel %vm3257_vm14, %v740_v46, %v753_v29  ;;  %v847_v43 = vrot.slane %v845_v14, 1  ;;  %v1468_v44 = vrot.slane %v2442_v41, 2  ;;  %v1648_v45 = vsel %vm865_vm0, %v2448_v52, 0  ;;  %v2984_v60 = vld [vmem:[#allocation2 + $0x2c] ss:$0 sps:$4 sm:$0x11]  }
  0xc8   : > { %755 = vst [vmem:[#allocation2 + $0x2c] sm:$0xe] %v754_v30  ;;  %v3429_v32 = vsel %vm1034_vm8, %v1042_v37, %v1044_v7  ;;  %v843_v46 = vor.u32 %v841_v31, %v839_v18  ;;  %v1188_v49 = vrot.slane %v3306_v54, 1  ;;  %v1189_v20 = vrot.slane %v3315_v13, 1 }
  0xc9   : > { %2679 = vmatmul.mubr.msk.bf16.gmra.mrb[8].mxu0 %vm849_vm4, %v1341_v21  ;;  %v1470_v19 = vsel %vm1467_vm9, %v1468_v44, %v1469_v4  ;;  %v1471_v53 = vrot.slane %v3340_v10, 2  ;;  %v1191_v13 = vrot.slane %v3340_v10, 1  ;;  %v1193_v56 = vrot.slane %v3366_v8, 1  ;;  %v3469_v63 = vld [vmem:[#allocation2 + $0x2c] ss:$0 sps:$4 sm:$0x33]  }
  0xca   : > { %2595 = vmatmul.mubr.msk.bf16.gmra.mrb[12].mxu1 %vm849_vm4, %v840_v40  ;;  %2692 = vmatprep.mubr.msk.bf16.mxu0 %vm3011_vm1, %v3010_v17  ;;  %v848_v47 = vsel %vm804_vm3, %v843_v46, %v847_v43  ;;  %v3452_v54 = vsel %vm1034_vm8, %v1188_v49, %v1189_v20  ;;  %v2468_v59 = vcombine.low %v1894_v28, %v3436_v48  ;;  %vm1900_vm10 = vcmask 1044480  }
  0xcb   : > { %2598 = vmatprep.mubr.msk.bf16.mxu1 %vm3011_vm1, %v3010_v17  ;;  %v3462_v57 = vsel %vm1034_vm8, %v1189_v20, %v1191_v13  ;;  %v3465_v61 = vsel %vm1034_vm8, %v1191_v13, %v1193_v56  ;;  %v1472_v62 = vsel %vm1467_vm9, %v1469_v4, %v1471_v53  ;;  %v1062_v10 = vsel %vm865_vm0, %v2415_v50, 0 }
  0xcc   : > { %v1195_v24 = vrot.slane %v3448_v27, 1  ;;  %v1901_v2 = vrot.slane %v2468_v59, 3  ;;  %v1902_v12 = vrot.slane %v3455_v11, 3  ;;  %v1197_v3 = vrot.slane %v2984_v60, 1  ;;  %v2020_v60 = vld [vmem:[%s3750_s3 + $0x38] sm:$0xff] }
  0xcd   : > { %v1904_v18 = vrot.slane %v3459_v42, 3  ;;  %v1473_v30 = vrot.slane %v3366_v8, 2  ;;  %v1346_v51 = vshll.u32 %v3448_v27, 16  ;;  %v1906_v6 = vrot.slane %v3471_v23, 3 }
  0xce   : > { %v3483_v16 = vsel %vm1034_vm8, %v1193_v56, %v1195_v24  ;;  %v3489_v29 = vsel %vm1900_vm10, %v1901_v2, %v1902_v12  ;;  %v3492_v21 = vsel %vm1034_vm8, %v1195_v24, %v1197_v3  ;;  %v1352_v35 = vshrl.u32 %v3469_v63, 16  ;;  %v2019_v56 = vld [vmem:[%s3750_s3 + $0x30] sm:$0xff]  ;;  %v2021_v2 = vld [vmem:[%s3750_s3 + $0x40] sm:$0xff] }
  0xcf   : > { %v3475_v1 = vld [vmem:[#allocation2 + $0x28] sm:$0xff]   ;;  %v3498_v33 = vsel %vm1900_vm10, %v1902_v12, %v1904_v18  ;;  %v1355_v14 = vshll.u32 %v3469_v63, 16  ;;  %v1348_v5 = vrot.slane %v1346_v51, 2  ;;  %v3506_v41 = vsel %vm1900_vm10, %v1904_v18, %v1906_v6 }
  0xd0   : > { %v1908_v36 = vrot.slane %v3475_v1, 3  ;;  %v1354_v8 = vrot.slane %v1352_v35, 1  ;;  %v1474_v52 = vsel %vm1467_vm9, %v1471_v53, %v1473_v30  ;;  %v3012_v49 = vmov 0  }
  0xd1   : > { %2693 = vmatmul.mubr.msk.bf16.vlgmr.msra.gmra.mrb[0].mxu0 %vm849_vm4, %v1470_v19  ;;  %v1357_v37 = vrot.slane %v1355_v14, 2  ;;  %v2015_v19 = vld [vmem:[%s3750_s3 + $0x10] sm:$0xff]  ;;  %2961 = vset.pattern.permute.xlu1 %v3012_v49  ;;  %v1477_v53 = vrot.slane %v3469_v63, 2  ;;  %vm2030_vm6 = vcmp.gt.f32.partialorder %v2020_v60, 0.5  ;;  %v1622_v12 = vrot.slane %v3455_v11, 2 }
  0xd2   : > { %2713 = vmatpush3.bf16.msra.mxu0 %v1648_v45  ;;  %2599 = vmatmul.mubr.msk.bf16.gmra.mrb[16].mxu1 %vm849_vm4, %v848_v47  ;;  %v3511_v4 = vsel %vm1900_vm10, %v1906_v6, %v1908_v36  ;;  %v1475_v45 = vrot.slane %v3448_v27, 2  ;;  %vm2025_vm13 = vcmp.gt.f32.partialorder %v2015_v19, 0.5  ;;  %v2016_v47 = vld [vmem:[%s3750_s3 + $0x18] sm:$0xff]  ;;  %vm2031_vm7 = vcmp.gt.f32.partialorder %v2021_v2, 0.5  ;;  %v2422_v14 = vld [vmem:[%s3749_s2 + $0x6] sm:$0x3] }
  0xd3   : > { %2696 = vmatprep.mubr.msk.bf16.mxu0 %vm3011_vm1, %v3010_v17  ;;  %2604 = vmatprep.mubr.msk.bf16.mxu1 %vm3011_vm1, %v3010_v17  ;;  %v1358_v31 = vor.u32 %v1357_v37, %v1354_v8  ;;  %vm2026_vm14 = vcmp.gt.f32.partialorder %v2016_v47, 0.5  ;;  %v2035_v13 = vsel %vm2025_vm13, 1, %v3012_v49  ;;  %v2041_v6 = vsel %vm2031_vm7, 1, %v3012_v49 }
  0xd4   : > { %2734 = vmatprep.subr.bf16.mxu0 %v3010_v17  ;;  %v1476_v46 = vsel %vm1467_vm9, %v1473_v30, %v1475_v45  ;;  %2960 = vset.pattern.permute.xlu0 %v3012_v49  ;;  %v2036_v28 = vsel %vm2026_vm14, 1, %v3012_v49  ;;  %v1478_v59 = vsel %vm1467_vm9, %v1475_v45, %v1477_v53  ;;  %v1624_v35 = vrot.slane %v3459_v42, 2 }
  0xd5   : > { %v1626_v8 = vrot.slane %v3471_v23, 2  ;;  %v1752_v45 = vshll.u32 %v3455_v11, 16  ;;  %vm1739_vm8 = vsmask.f32 5376 }
  0xd7   : > { %v1627_v37 = vsel %vm1467_vm9, %v1624_v35, %v1626_v8  ;;  %v1754_v47 = vrot.slane %v1752_v45, 3 }
  0xd9   : > { %2697 = vmatmul.mubr.msk.bf16.gmra.mrb[4].mxu0 %vm849_vm4, %v1472_v62  ;;  %v1580_v62 = vld [vmem:[#allocation2 + $0x8] sm:$0xc] }
  0xda   : > { %2605 = vmatmul.mubr.msk.bf16.vlgmr.msra.gmra.mrb[0].mxu1 %vm849_vm4, %v3291_v9  ;;  %2700 = vmatprep.mubr.msk.bf16.mxu0 %vm3011_vm1, %v3010_v17  ;;  %v1343_v9 = vshrl.u32 %v3448_v27, 16  ;;  %v2018_v27 = vld [vmem:[%s3750_s3 + $0x28] sm:$0xff]  ;;  %v3569_v63 = vcombine.low %v1580_v62, %v3436_v48 }
  0xdb   : > { %2608 = vmatprep.mubr.msk.bf16.mxu1 %vm3011_vm1, %v3010_v17  ;;  %2625 = vmatpush3.bf16.msra.mxu1 %v1062_v10  ;;  %vm2028_vm3 = vcmp.gt.f32.partialorder %v2018_v27, 0.5  ;;  %v2022_v48 = vld [vmem:[%s3750_s3 + $0x48] sm:$0xff] }
  0xdc   : > { %2646 = vmatprep.subr.bf16.mxu1 %v3010_v17  ;;  %v1345_v40 = vrot.slane %v1343_v9, 1  ;;  %v2038_v24 = vsel %vm2028_vm3, 1, %v3012_v49  ;;  %v1621_v18 = vrot.slane %v3569_v63, 2  ;;  %v2040_v9 = vsel %vm2030_vm6, 1, %v3012_v49 }
  0xdd   : > { %vm2032_vm2 = vcmp.gt.f32.partialorder %v2022_v48, 0.5 }
  0xde   : > { %v1349_v7 = vor.u32 %v1348_v5, %v1345_v40  ;;  %v1623_v51 = vsel %vm1467_vm9, %v1621_v18, %v1622_v12  ;;  %v2042_v40 = vsel %vm2032_vm2, 1, %v3012_v49  ;;  %v1625_v5 = vsel %vm1467_vm9, %v1622_v12, %v1624_v35 }
  0xe0   : > { %v3521_v43 = vsel %vm1306_vm5, %v3387_v0, %v1349_v7  ;;  %v3526_v44 = vsel %vm1306_vm5, %v1349_v7, %v1358_v31  ;;  %v2013_v0 = vld [vmem:[%s3750_s3] sm:$0xff]  ;;  %vm2029_vm5 = vcmp.gt.f32.partialorder %v2019_v56, 0.5  ;;  %v2981_v7 = vld [vmem:[#allocation2 + $0x30] ss:$0 sps:$4 sm:$0x33]   ;;  %v1749_v31 = vshrl.u32 %v3455_v11, 16 }
  0xe1   : > { %2701 = vmatmul.mubr.msk.bf16.gmra.mrb[8].mxu0 %vm849_vm4, %v1474_v52  ;;  %vm2023_vm12 = vcmp.gt.f32.partialorder %v2013_v0, 0.5  ;;  %v2039_v3 = vsel %vm2029_vm5, 1, %v3012_v49  ;;  %v1767_v56 = vshrl.u32 %v3471_v23, 16 }
  0xe2   : > { %2609 = vmatmul.mubr.msk.bf16.gmra.mrb[4].mxu1 %vm849_vm4, %v3308_v58  ;;  %2704 = vmatprep.mubr.msk.bf16.mxu0 %vm3011_vm1, %v3010_v17  ;;  %v2014_v58 = vld [vmem:[%s3750_s3 + $0x8] sm:$0xff]  ;;  %v2033_v50 = vsel %vm2023_vm12, 1, %v3012_v49  ;;  %v1751_v19 = vrot.slane %v1749_v31, 2 }
  0xe3   : > { %2612 = vmatprep.mubr.msk.bf16.mxu1 %vm3011_vm1, %v3010_v17  ;;  %vm2024_vm11 = vcmp.gt.f32.partialorder %v2014_v58, 0.5  ;;  %2044 = vperm.xlu0 %2960, %v2033_v50   ;;  %v1744_v58 = vshll.u32 %v3569_v63, 16  ;;  %v1758_v50 = vshrl.u32 %v3459_v42, 16  ;;  %v1769_v62 = vrot.slane %v1767_v56, 2 }
  0xe4   : > { %v2034_v20 = vsel %vm2024_vm11, 1, %v3012_v49  ;;  %v1755_v11 = vor.u32 %v1754_v47, %v1751_v19 }
  0xe5   : > { %2047 = vperm.xlu1 %2961, %v2034_v20   ;;  %v2467_v20 = vld [vmem:[%s3749_s2 + $0x10] sm:$0x3] }
  0xe7   : > { %2053 = vperm.xlu0 %2960, %v2036_v28  }
  0xe9   : > { %2705 = vmatmul.mubr.msk.bf16.gmra.mrb[12].mxu0 %vm849_vm4, %v1476_v46  ;;  %2050 = vperm.xlu1 %2961, %v2035_v13   ;;  %v1741_v46 = vshrl.u32 %v3569_v63, 16  ;;  %v1760_v13 = vrot.slane %v1758_v50, 2  ;;  %v1779_v63 = vshll.u32 %v3475_v1, 16 }
  0xea   : > { %2613 = vmatmul.mubr.msk.bf16.gmra.mrb[8].mxu1 %vm849_vm4, %v3324_v38  ;;  %2708 = vmatprep.mubr.msk.bf16.mxu0 %vm3011_vm1, %v3010_v17  ;;  %v2017_v38 = vld [vmem:[%s3750_s3 + $0x20] sm:$0xff] }
  0xeb   : > { %2616 = vmatprep.mubr.msk.bf16.mxu1 %vm3011_vm1, %v3010_v17  ;;  %vm2027_vm15 = vcmp.gt.f32.partialorder %v2017_v38, 0.5  ;;  %2059 = vperm.xlu0 %2960, %v2038_v24   ;;  %v1761_v38 = vshll.u32 %v3459_v42, 16  ;;  %v1781_v12 = vrot.slane %v1779_v63, 3 }
  0xec   : > { %v2037_v10 = vsel %vm2027_vm15, 1, %v3012_v49  ;;  %v1746_v49 = vrot.slane %v1744_v58, 3 }
  0xed   : > { %2056 = vperm.xlu1 %2961, %v2037_v10   ;;  %v1763_v28 = vrot.slane %v1761_v38, 3 }
  0xef   : > { %2065 = vperm.xlu0 %2960, %v2040_v9   ;;  %v1764_v42 = vor.u32 %v1763_v28, %v1760_v13 }
  0xf1   : > { %2709 = vmatmul.mubr.msk.bf16.gmra.mrb[16].mxu0 %vm849_vm4, %v1478_v59  ;;  %2062 = vperm.xlu1 %2961, %v2039_v3   ;;  %v1770_v59 = vshll.u32 %v3471_v23, 16  ;;  %v1765_v60 = vsel %vm1739_vm8, %v1755_v11, %v1764_v42  ;;  %v1776_v23 = vshrl.u32 %v3475_v1, 16 }
  0xf2   : > { %2617 = vmatmul.mubr.msk.bf16.gmra.mrb[12].mxu1 %vm849_vm4, %v3353_v34  ;;  %2714 = vmatprep.mubr.msk.bf16.mxu0 %vm3011_vm1, %v3010_v17  ;;  %v2460_v34 = vld [vmem:[%s3749_s2 + $0xe] sm:$0x3] }
  0xf3   : > { %2620 = vmatprep.mubr.msk.bf16.mxu1 %vm3011_vm1, %v3010_v17  ;;  %v1809_v30 = vsel %vm865_vm0, %v2460_v34, 0  ;;  %2071 = vperm.xlu0 %2960, %v2042_v40   ;;  %v1772_v10 = vrot.slane %v1770_v59, 3  ;;  %v1778_v2 = vrot.slane %v1776_v23, 2  ;;  %v2982_v34 = vld [vmem:[#allocation2 + $0x30] ss:$0 sps:$4 sm:$0x77]  }
  0xf4   : > { %v1788_v48 = vshll.u32 %v2982_v34, 16 }
  0xf5   : > { %2068 = vperm.xlu1 %2961, %v2041_v6  }
  0xf6   : > { %v1790_v9 = vrot.slane %v1788_v48, 3 }
  0xf9   : > { %2715 = vmatmul.mubr.msk.bf16.vlgmr.msra.gmra.mrb[0].mxu0 %vm849_vm4, %v1623_v51 }
  0xfa   : > { %2735 = vmatpush3.bf16.msra.mxu0 %v1809_v30  ;;  %2621 = vmatmul.mubr.msk.bf16.gmra.mrb[16].mxu1 %vm849_vm4, %v3377_v55  ;;  %v1215_v55 = vsel %vm865_vm0, %v2422_v14, 0 }
  0xfb   : > { %2718 = vmatprep.mubr.msk.bf16.mxu0 %vm3011_vm1, %v3010_v17  ;;  %2626 = vmatprep.mubr.msk.bf16.mxu1 %vm3011_vm1, %v3010_v17 }
  0xfc   : > { %2756 = vmatprep.subr.bf16.mxu0 %v3010_v17 }
 0x101   : > { %2719 = vmatmul.mubr.msk.bf16.gmra.mrb[4].mxu0 %vm849_vm4, %v1625_v5 }
 0x102   : > { %2627 = vmatmul.mubr.msk.bf16.vlgmr.msra.gmra.mrb[0].mxu1 %vm849_vm4, %v3409_v15  ;;  %2722 = vmatprep.mubr.msk.bf16.mxu0 %vm3011_vm1, %v3010_v17  ;;  %v1628_v15 = vrot.slane %v3475_v1, 2 }
 0x103   : > { %2630 = vmatprep.mubr.msk.bf16.mxu1 %vm3011_vm1, %v3010_v17  ;;  %2647 = vmatpush3.bf16.msra.mxu1 %v1215_v55 }
 0x104   : > { %2778 = vmatprep.subr.bf16.mxu1 %v3010_v17  ;;  %v1629_v52 = vsel %vm1467_vm9, %v1626_v8, %v1628_v15 }
 0x109   : > { %2723 = vmatmul.mubr.msk.bf16.gmra.mrb[8].mxu0 %vm849_vm4, %v1627_v37 }
 0x10a   : > { %2631 = vmatmul.mubr.msk.bf16.gmra.mrb[4].mxu1 %vm849_vm4, %v3415_v25  ;;  %2726 = vmatprep.mubr.msk.bf16.mxu0 %vm3011_vm1, %v3010_v17  ;;  %v1630_v25 = vrot.slane %v2981_v7, 2 }
 0x10b   : > { %2634 = vmatprep.mubr.msk.bf16.mxu1 %vm3011_vm1, %v3010_v17 }
 0x10c   : > { %v1631_v0 = vsel %vm1467_vm9, %v1628_v15, %v1630_v25 }
 0x111   : > { %2727 = vmatmul.mubr.msk.bf16.gmra.mrb[12].mxu0 %vm849_vm4, %v1629_v52 }
 0x112   : > { %2635 = vmatmul.mubr.msk.bf16.gmra.mrb[8].mxu1 %vm849_vm4, %v3418_v26  ;;  %2730 = vmatprep.mubr.msk.bf16.mxu0 %vm3011_vm1, %v3010_v17  ;;  %v1743_v26 = vrot.slane %v1741_v46, 2 }
 0x113   : > { %2638 = vmatprep.mubr.msk.bf16.mxu1 %vm3011_vm1, %v3010_v17 }
 0x114   : > { %v1747_v53 = vor.u32 %v1746_v49, %v1743_v26 }
 0x116   : > { %v1756_v27 = vsel %vm1739_vm8, %v1747_v53, %v1755_v11 }
 0x119   : > { %2731 = vmatmul.mubr.msk.bf16.gmra.mrb[16].mxu0 %vm849_vm4, %v1631_v0 }
 0x11a   : > { %2639 = vmatmul.mubr.msk.bf16.gmra.mrb[12].mxu1 %vm849_vm4, %v3425_v39  ;;  %2736 = vmatprep.mubr.msk.bf16.mxu0 %vm3011_vm1, %v3010_v17  ;;  %v1928_v39 = vsel %vm865_vm0, %v2467_v20, 0 }
 0x11b   : > { %2642 = vmatprep.mubr.msk.bf16.mxu1 %vm3011_vm1, %v3010_v17 }
 0x121   : > { %2737 = vmatmul.mubr.msk.bf16.vlgmr.msra.gmra.mrb[0].mxu0 %vm849_vm4, %v1756_v27 }
 0x122   : > { %2757 = vmatpush3.bf16.msra.mxu0 %v1928_v39  ;;  %2643 = vmatmul.mubr.msk.bf16.gmra.mrb[16].mxu1 %vm849_vm4, %v3429_v32  ;;  %v1773_v32 = vor.u32 %v1772_v10, %v1769_v62 }
 0x123   : > { %2740 = vmatprep.mubr.msk.bf16.mxu0 %vm3011_vm1, %v3010_v17  ;;  %2648 = vmatprep.mubr.msk.bf16.mxu1 %vm3011_vm1, %v3010_v17 }
 0x124   : > { %v1774_v24 = vsel %vm1739_vm8, %v1764_v42, %v1773_v32 }
 0x129   : > { %2741 = vmatmul.mubr.msk.bf16.gmra.mrb[4].mxu0 %vm849_vm4, %v1765_v60 }
 0x12a   : > { %2649 = vmatmul.mubr.msk.bf16.vlgmr.msra.gmra.mrb[0].mxu1 %vm849_vm4, %v3452_v54  ;;  %2744 = vmatprep.mubr.msk.bf16.mxu0 %vm3011_vm1, %v3010_v17  ;;  %v1785_v54 = vshrl.u32 %v2982_v34, 16 }
 0x12b   : > { %2652 = vmatprep.mubr.msk.bf16.mxu1 %vm3011_vm1, %v3010_v17  ;;  %2779 = vmatpush3.bf16.msra.mxu1 %v3180_v22  ;;  %v1782_v22 = vor.u32 %v1781_v12, %v1778_v2 }
 0x12c   : > { %v1787_v18 = vrot.slane %v1785_v54, 2 }
 0x12d   : > { %v1783_v3 = vsel %vm1739_vm8, %v1773_v32, %v1782_v22 }
 0x131   : > { %2745 = vmatmul.mubr.msk.bf16.gmra.mrb[8].mxu0 %vm849_vm4, %v1774_v24 }
 0x132   : > { %2653 = vmatmul.mubr.msk.bf16.gmra.mrb[4].mxu1 %vm849_vm4, %v3462_v57  ;;  %2748 = vmatprep.mubr.msk.bf16.mxu0 %vm3011_vm1, %v3010_v17  ;;  %v1791_v57 = vor.u32 %v1790_v9, %v1787_v18 }
 0x133   : > { %2656 = vmatprep.mubr.msk.bf16.mxu1 %vm3011_vm1, %v3010_v17 }
 0x134   : > { %v1792_v30 = vsel %vm1739_vm8, %v1782_v22, %v1791_v57 }
 0x139   : > { %2749 = vmatmul.mubr.msk.bf16.gmra.mrb[12].mxu0 %vm849_vm4, %v1783_v3 }
 0x13a   : > { %2657 = vmatmul.mubr.msk.bf16.gmra.mrb[8].mxu1 %vm849_vm4, %v3465_v61  ;;  %2752 = vmatprep.mubr.msk.bf16.mxu0 %vm3011_vm1, %v3010_v17  ;;  %v1910_v61 = vrot.slane %v2982_v34, 3 }
 0x13b   : > { %2660 = vmatprep.mubr.msk.bf16.mxu1 %vm3011_vm1, %v3010_v17 }
 0x141   : > { %2753 = vmatmul.mubr.msk.bf16.gmra.mrb[16].mxu0 %vm849_vm4, %v1792_v30 }
 0x142   : > { %2661 = vmatmul.mubr.msk.bf16.gmra.mrb[12].mxu1 %vm849_vm4, %v3483_v16  ;;  %2758 = vmatprep.mubr.msk.bf16.mxu0 %vm3011_vm1, %v3010_v17  ;;  %v1911_v16 = vsel %vm1900_vm10, %v1908_v36, %v1910_v61 }
 0x143   : > { %2664 = vmatprep.mubr.msk.bf16.mxu1 %vm3011_vm1, %v3010_v17 }
 0x149   : > { %2759 = vmatmul.mubr.msk.bf16.vlgmr.msra.gmra.mrb[0].mxu0 %vm849_vm4, %v3489_v29 }
 0x14a   : > { %2665 = vmatmul.mubr.msk.bf16.gmra.mrb[16].mxu1 %vm849_vm4, %v3492_v21  ;;  %2762 = vmatprep.mubr.msk.bf16.mxu0 %vm3011_vm1, %v3010_v17 }
 0x14b   : > { %2682 = vmatprep.mubr.msk.bf16.mxu1 %vm3011_vm1, %v3010_v17 }
 0x151   : > { %2763 = vmatmul.mubr.msk.bf16.gmra.mrb[4].mxu0 %vm849_vm4, %v3498_v33 }
 0x152   : > { %2683 = vmatmul.mubr.msk.bf16.vlgmr.msra.gmra.mrb[12].mxu1 %vm849_vm4, %v3521_v43  ;;  %2766 = vmatprep.mubr.msk.bf16.mxu0 %vm3011_vm1, %v3010_v17 }
 0x153   : > { %2686 = vmatprep.mubr.msk.bf16.mxu1 %vm3011_vm1, %v3010_v17 }
 0x159   : > { %2767 = vmatmul.mubr.msk.bf16.gmra.mrb[8].mxu0 %vm849_vm4, %v3506_v41 }
 0x15a   : > { %2687 = vmatmul.mubr.msk.bf16.gmra.mrb[16].mxu1 %vm849_vm4, %v3526_v44  ;;  %2770 = vmatprep.mubr.msk.bf16.mxu0 %vm3011_vm1, %v3010_v17 }
 0x161   : > { %2771 = vmatmul.mubr.msk.bf16.gmra.mrb[12].mxu0 %vm849_vm4, %v3511_v4 }
 0x162   : > { %2774 = vmatprep.mubr.msk.bf16.mxu0 %vm3011_vm1, %v3010_v17  ;;  %v2045_v14 = vpop.permute.xlu0 %2044 }
 0x163   : > { %vm2073_vm0 = vcmp.eq.s32.totalorder %v2045_v14, 1 }
 0x164   : > { %v2048_v36 = vpop.permute.xlu1 %2047 }
 0x165   : > { %vm2074_vm1 = vcmp.eq.s32.totalorder %v2048_v36, 1 }
 0x166   : > { %v2054_v19 = vpop.permute.xlu0 %2053 }
 0x167   : > { %vm2076_vm9 = vcmp.eq.s32.totalorder %v2054_v19, 1 }
 0x168   : > { %v2051_v58 = vpop.permute.xlu1 %2050 }
 0x169   : > { %2775 = vmatmul.mubr.msk.bf16.gmra.mrb[16].mxu0 %vm849_vm4, %v1911_v16  ;;  %vm2075_vm4 = vcmp.eq.s32.totalorder %v2051_v58, 1 }
 0x16a   : > { %v2060_v63 = vpop.permute.xlu0 %2059 }
 0x16b   : > { %vm2078_vm11 = vcmp.eq.s32.totalorder %v2060_v63, 1 }
 0x16c   : > { %v2057_v32 = vpop.permute.xlu1 %2056 }
 0x16d   : > { %vm2077_vm10 = vcmp.eq.s32.totalorder %v2057_v32, 1 }
 0x1fd   : > { %v1251_v29 = vpop.f32.mrb[0].mxu1 }
 0x1fe   : > { %v2650_v21 = vpop.f32.mrb[1].mxu1 }
 0x1ff   : > { %v1254_v33 = vpop.f32.mrb[2].mxu1 }
 0x200   : > { %v2651_v41 = vpop.f32.mrb[3].mxu1 }
 0x205   : > { %v1259_v43 = vpop.f32.mrb[4].mxu1 }
 0x206   : > { %v2654_v44 = vpop.f32.mrb[5].mxu1 }
 0x207   : > { %v1262_v51 = vpop.f32.mrb[6].mxu1 }
 0x208   : > { %v2655_v6 = vpop.f32.mrb[7].mxu1 }
 0x20d   : > { %v1267_v4 = vpop.f32.mrb[8].mxu1 }
 0x20e   : > { %v2658_v40 = vpop.f32.mrb[9].mxu1 }
 0x20f   : > { %v1270_v35 = vpop.f32.mrb[10].mxu1 }
 0x210   : > { %v2659_v17 = vpop.f32.mrb[11].mxu1 }
 0x21c   : > { %v1964_v5 = vpop.f32.mrb[0].mxu0 }
 0x21d   : > { %v2780_v1 = vadd.f32 %v1964_v5, %v1251_v29  ;;  %v2760_v55 = vpop.f32.mrb[1].mxu0 }
 0x21e   : > { %v1967_v8 = vpop.f32.mrb[2].mxu0 }
 0x21f   : > { %v2083_v37 = vsel %vm2073_vm0, %v2780_v1, 0.0  ;;  %v2781_v15 = vadd.f32 %v1967_v8, %v1254_v33  ;;  %v2761_v52 = vpop.f32.mrb[3].mxu0 }
 0x220   : > { %v2159_v25 = vmul.f32 %v2083_v37, %v2083_v37 }
 0x221   : > { %v2084_v7 = vsel %vm2074_vm1, %v2781_v15, 0.0 }
 0x222   : > { %v2500_v31 = vpack.c.bf16 %v2084_v7, %v2083_v37  ;;  %v2143_v45 = vadd.f32 %v2084_v7, %v2083_v37  ;;  %v2160_v46 = vmul.f32 %v2084_v7, %v2084_v7 }
 0x224   : > { %2501 = vst [vmem:[%s3723_s11] sm:$0xff] %v2500_v31   ;;  %v2169_v0 = vadd.f32 %v2160_v46, %v2159_v25  ;;  %v1972_v47 = vpop.f32.mrb[4].mxu0 }
 0x225   : > { %v2782_v26 = vadd.f32 %v1972_v47, %v1259_v43  ;;  %v2764_v49 = vpop.f32.mrb[5].mxu0  ;;  %v1436_v11 = vpop.f32.mrb[12].mxu1 }
 0x226   : > { %v1975_v20 = vpop.f32.mrb[6].mxu0  ;;  %v2684_v50 = vpop.f32.mrb[13].mxu1 }
 0x227   : > { %v2085_v38 = vsel %vm2075_vm4, %v2782_v26, 0.0  ;;  %v2783_v53 = vadd.f32 %v1975_v20, %v1262_v51  ;;  %v2765_v39 = vpop.f32.mrb[7].mxu0  ;;  %v1439_v27 = vpop.f32.mrb[14].mxu1 }
 0x228   : > { %v2144_v13 = vadd.f32 %v2143_v45, %v2085_v38  ;;  %v2161_v28 = vmul.f32 %v2085_v38, %v2085_v38  ;;  %v2685_v42 = vpop.f32.mrb[15].mxu1  ;;  %v2063_v51 = vpop.permute.xlu1 %2062 }
 0x229   : > { %v2086_v56 = vsel %vm2076_vm9, %v2783_v53, 0.0  ;;  %vm2079_vm12 = vcmp.eq.s32.totalorder %v2063_v51, 1 }
 0x22a   : > { %v2170_v59 = vadd.f32 %v2169_v0, %v2161_v28  ;;  %v2505_v60 = vpack.c.bf16 %v2086_v56, %v2085_v38  ;;  %v2145_v62 = vadd.f32 %v2144_v13, %v2086_v56  ;;  %v2162_v10 = vmul.f32 %v2086_v56, %v2086_v56 }
 0x22c   : > { %2522 = vst [vmem:[%s3723_s11 + $0x8] sm:$0xff] %v2505_v60   ;;  %v2171_v23 = vadd.f32 %v2170_v59, %v2162_v10  ;;  %v1980_v24 = vpop.f32.mrb[8].mxu0  ;;  %v2069_v7 = vpop.permute.xlu1 %2068 }
 0x22d   : > { %v2784_v2 = vadd.f32 %v1980_v24, %v1267_v4  ;;  %v2768_v12 = vpop.f32.mrb[9].mxu0  ;;  %v1444_v34 = vpop.f32.mrb[16].mxu1  ;;  %vm2081_vm14 = vcmp.eq.s32.totalorder %v2069_v7, 1 }
 0x22e   : > { %v1983_v22 = vpop.f32.mrb[10].mxu0  ;;  %v2688_v54 = vpop.f32.mrb[17].mxu1 }
 0x22f   : > { %v2087_v48 = vsel %vm2077_vm10, %v2784_v2, 0.0  ;;  %v2785_v3 = vadd.f32 %v1983_v22, %v1270_v35  ;;  %v2769_v18 = vpop.f32.mrb[11].mxu0  ;;  %v1447_v9 = vpop.f32.mrb[18].mxu1 }
 0x230   : > { %v2146_v57 = vadd.f32 %v2145_v62, %v2087_v48  ;;  %v2163_v30 = vmul.f32 %v2087_v48, %v2087_v48  ;;  %v2689_v61 = vpop.f32.mrb[19].mxu1  ;;  %v2066_v35 = vpop.permute.xlu0 %2065 }
 0x231   : > { %v2088_v16 = vsel %vm2078_vm11, %v2785_v3, 0.0  ;;  %vm2080_vm13 = vcmp.eq.s32.totalorder %v2066_v35, 1 }
 0x232   : > { %v2172_v29 = vadd.f32 %v2171_v23, %v2163_v30  ;;  %v2510_v21 = vpack.c.bf16 %v2088_v16, %v2087_v48  ;;  %v2147_v33 = vadd.f32 %v2146_v57, %v2088_v16  ;;  %v2164_v41 = vmul.f32 %v2088_v16, %v2088_v16 }
 0x234   : > { %2523 = vst [vmem:[%s3723_s11 + $0x10] sm:$0xff] %v2510_v21   ;;  %v2173_v43 = vadd.f32 %v2172_v29, %v2164_v41  ;;  %v1988_v44 = vpop.f32.mrb[12].mxu0  ;;  %v2072_v45 = vpop.permute.xlu0 %2071 }
 0x235   : > { %v2786_v6 = vadd.f32 %v1988_v44, %v1436_v11  ;;  %v2772_v4 = vpop.f32.mrb[13].mxu0  ;;  %vm2082_vm15 = vcmp.eq.s32.totalorder %v2072_v45, 1 }
 0x236   : > { %v1991_v40 = vpop.f32.mrb[14].mxu0 }
 0x237   : > { %v2089_v17 = vsel %vm2079_vm12, %v2786_v6, 0.0  ;;  %v2787_v14 = vadd.f32 %v1991_v40, %v1439_v27  ;;  %v2773_v5 = vpop.f32.mrb[15].mxu0 }
 0x238   : > { %v2148_v1 = vadd.f32 %v2147_v33, %v2089_v17  ;;  %v2165_v36 = vmul.f32 %v2089_v17, %v2089_v17 }
 0x239   : > { %v2090_v55 = vsel %vm2080_vm13, %v2787_v14, 0.0 }
 0x23a   : > { %v2174_v8 = vadd.f32 %v2173_v43, %v2165_v36  ;;  %v2515_v37 = vpack.c.bf16 %v2090_v55, %v2089_v17  ;;  %v2149_v15 = vadd.f32 %v2148_v1, %v2090_v55  ;;  %v2166_v52 = vmul.f32 %v2090_v55, %v2090_v55 }
 0x23c   : > { %2524 = vst [vmem:[%s3723_s11 + $0x18] sm:$0xff] %v2515_v37   ;;  %v2175_v25 = vadd.f32 %v2174_v8, %v2166_v52  ;;  %v1996_v31 = vpop.f32.mrb[16].mxu0 }
 0x23d   : > { %v2788_v46 = vadd.f32 %v1996_v31, %v1444_v34  ;;  %v2776_v58 = vpop.f32.mrb[17].mxu0 }
 0x23e   : > { %v1999_v0 = vpop.f32.mrb[18].mxu0 }
 0x23f   : > { %v2091_v19 = vsel %vm2081_vm14, %v2788_v46, 0.0  ;;  %v2789_v47 = vadd.f32 %v1999_v0, %v1447_v9  ;;  %v2777_v26 = vpop.f32.mrb[19].mxu0 }
 0x240   : > { %v2150_v49 = vadd.f32 %v2149_v15, %v2091_v19  ;;  %v2167_v11 = vmul.f32 %v2091_v19, %v2091_v19 }
 0x241   : > { %v2092_v20 = vsel %vm2082_vm15, %v2789_v47, 0.0 }
 0x242   : > { %v2176_v50 = vadd.f32 %v2175_v25, %v2167_v11  ;;  %v2520_v38 = vpack.c.bf16 %v2092_v20, %v2091_v19  ;;  %v2151_v53 = vadd.f32 %v2150_v49, %v2092_v20  ;;  %v2168_v39 = vmul.f32 %v2092_v20, %v2092_v20 }
 0x244   : > { %2525 = vst [vmem:[%s3723_s11 + $0x20] sm:$0xff] %v2520_v38   ;;  %v2152_v27 = vrot.slane %v2151_v53, 4  ;;  %v2177_v13 = vadd.f32 %v2176_v50, %v2168_v39 }
 0x246   : > { %v2153_v28 = vadd.f32 %v2152_v27, %v2151_v53  ;;  %v2178_v42 = vrot.slane %v2177_v13, 4 }
 0x248   : > { %v2154_v56 = vrot.slane %v2153_v28, 2  ;;  %v2179_v59 = vadd.f32 %v2178_v42, %v2177_v13 }
 0x24a   : > { %v2155_v60 = vadd.f32 %v2154_v56, %v2153_v28  ;;  %v2180_v62 = vrot.slane %v2179_v59, 2 }
 0x24c   : > { %v2156_v10 = vrot.slane %v2155_v60, 1  ;;  %v2181_v32 = vadd.f32 %v2180_v62, %v2179_v59 }
 0x24e   : > { %v2157_v23 = vadd.f32 %v2156_v10, %v2155_v60  ;;  %v2182_v63 = vrot.slane %v2181_v32, 1 }
 0x250   : > { %2158 = vst [vmem:[%s378_s14] sm:$0x1] %v2157_v23  ;;  %v2183_v24 = vadd.f32 %v2182_v63, %v2181_v32 }
 0x252   : > { %2184 = vst [vmem:[%s384_s17] sm:$0x1] %v2183_v24 }
 0x253 PF: > { %s17_s23 = sadd.s32 1, %s3007_s23   ;;  %s3760_s21 = smov %s3003_s22 }
 0x254   : > { %p14_p5 = scmp.ge.s32.totalorder %s17_s23, 4   ;;  %s3761_s22 = smov %s3763_s24 }
 0x256   :  { %16 = sbr.rel (!%p14_p5) target bundleno = 2 (0x2), region = 105 }

// kernel: _lambda_.4
= control target key start
LH: loop header
LB: loop body
LE: loop exit
PB: predicated region body
PF: predicated region fallthrough
CT: control target
= control target key end

     0   :  { %s4022_s27 = smov 0   ;;  %s4024_s28 = smov 0   ;;  %s4938_s0 = inlined_call_operand.vmem [shape: bf16[2,80,128], index: 0, kind: input, shape index: {}]   ;;  %s4939_s1 = inlined_call_operand.vmem [shape: bf16[2,2,10,128], index: 1, kind: input, shape index: {}]   ;;  %s4940_s2 = inlined_call_operand.vmem [shape: f32[1,128], index: 2, kind: input, shape index: {}]   ;;  %s4941_s3 = inlined_call_operand.vmem [shape: f32[1,128], index: 3, kind: input, shape index: {}]   ;;  %s4942_s4 = inlined_call_operand.vmem [shape: bf16[9,128,128], index: 4, kind: input, shape index: {}]   ;;  %s4943_s5 = inlined_call_operand.vmem [shape: f32[80,1], index: 5, kind: input, shape index: {}]   ;;  %s4944_s6 = inlined_call_operand.vmem [shape: bf16[2,80,128], index: 6, kind: output, shape index: {0}]   ;;  %s4945_s7 = inlined_call_operand.vmem [shape: f32[2,1,1,128], index: 7, kind: output, shape index: {1}]   ;;  %s4946_s8 = inlined_call_operand.vmem [shape: f32[2,1,1,128], index: 8, kind: output, shape index: {2}]  }
   0x1   :  { %s4026_s29 = smov 0  }
   0x2 LB: > { %s31_s30 = sadd.s32 1, %s3968_s28  ;;  %p2881_p0 = scmp.ge.s32.totalorder %s3972_s29, 1  ;;  %s3972_s29 = sphi %s4026_s29, %s19_s29   ;;  %s3968_s28 = sphi %s4024_s28, %s4964_s28   ;;  %s3964_s27 = sphi %s4022_s27, %s4963_s27  }
   0x3   : > { %p33_p1 = scmp.ge.s32.totalorder %s31_s30, 2  ;;  %p321_p2 = scmp.lt.s32.totalorder %s3972_s29, 3 }
   0x5   : > { %s4966_s30 = smov (%p33_p1, %s31_s30), 0  ;;  %p322_p3 = pnand %p2881_p0, %p321_p2 }
   0x6   : > { %v443_v0 = vld [vmem:[%s4943_s5 + $0x8] sm:$0xff] (!%p322_p3)  ;;  %v444_v1 = vld [vmem:[%s4943_s5 + $0x10] sm:$0xff] (!%p322_p3)  ;;  %v442_v2 = vld [vmem:[%s4943_s5] sm:$0xff] (!%p322_p3)  ;;  %v3974_v3 = vmov (!%p322_p3), 0   ;;  %v3975_v18 = vmov (!%p322_p3), 0.0   ;;  %vm3976_vm10 = vmmov (!%p322_p3), 0  }
   0x7   : > { %325 = sbr.rel (%p322_p3) target bundleno = 600 (0x258), region = 44  ;;  %3854 = vset.pattern.permute.xlu1 (!%p322_p3), %v3974_v3  ;;  %3848 = vset.pattern.permute.xlu0 (!%p322_p3), %v3974_v3  ;;  %vm453_vm0 = vcmp.gt.f32.partialorder (!%p322_p3), %v443_v0, 0.5  ;;  %vm454_vm1 = vcmp.gt.f32.partialorder (!%p322_p3), %v444_v1, 0.5  ;;  %vm452_vm2 = vcmp.gt.f32.partialorder (!%p322_p3), %v442_v2, 0.5  ;;  %v446_v5 = vld [vmem:[%s4943_s5 + $0x20] sm:$0xff] (!%p322_p3)  ;;  %v445_v6 = vld [vmem:[%s4943_s5 + $0x18] sm:$0xff] (!%p322_p3) }
   0x8   : > { %v527_v4 = vsel (!%p322_p3), %vm453_vm0, 1, %v3974_v3  ;;  %3850 = vperm.xlu0 (!%p322_p3), %3848, %v3974_v3   ;;  %v528_v7 = vsel (!%p322_p3), %vm454_vm1, 1, %v3974_v3  ;;  %v526_v8 = vsel (!%p322_p3), %vm452_vm2, 1, %v3974_v3  ;;  %vm456_vm3 = vcmp.gt.f32.partialorder (!%p322_p3), %v446_v5, 0.5  ;;  %v448_v9 = vld [vmem:[%s4943_s5 + $0x30] sm:$0xff] (!%p322_p3)  ;;  %v447_v10 = vld [vmem:[%s4943_s5 + $0x28] sm:$0xff] (!%p322_p3)  ;;  %3478 = vmatprep.subr.bf16.mxu0 (!%p322_p3), %v3975_v18 }
   0x9   : > { %540 = vperm.xlu1 (!%p322_p3), %3854, %v527_v4   ;;  %vm455_vm4 = vcmp.gt.f32.partialorder (!%p322_p3), %v445_v6, 0.5  ;;  %v530_v11 = vsel (!%p322_p3), %vm456_vm3, 1, %v3974_v3  ;;  %vm458_vm5 = vcmp.gt.f32.partialorder (!%p322_p3), %v448_v9, 0.5  ;;  %v451_v13 = vld [vmem:[%s4943_s5 + $0x48] sm:$0xff] (!%p322_p3)  ;;  %vm457_vm6 = vcmp.gt.f32.partialorder (!%p322_p3), %v447_v10, 0.5  ;;  %v449_v14 = vld [vmem:[%s4943_s5 + $0x38] sm:$0xff] (!%p322_p3)  ;;  %3334 = vmatprep.subr.bf16.mxu1 (!%p322_p3), %v3975_v18 }
   0xa   : > { %v529_v12 = vsel (!%p322_p3), %vm455_vm4, 1, %v3974_v3  ;;  %v532_v15 = vsel (!%p322_p3), %vm458_vm5, 1, %v3974_v3  ;;  %v531_v16 = vsel (!%p322_p3), %vm457_vm6, 1, %v3974_v3  ;;  %vm461_vm7 = vcmp.gt.f32.partialorder (!%p322_p3), %v451_v13, 0.5  ;;  %v450_v17 = vld [vmem:[%s4943_s5 + $0x40] sm:$0xff] (!%p322_p3)  ;;  %v3857_v24 = vld [vmem:[%s4942_s4 + $0x108] sm:$0xff] (!%p322_p3)   ;;  %3350 = vmatprep.mubr.msk.bf16.mxu1 (!%p322_p3), %vm3976_vm10, %v3975_v18  ;;  %3494 = vmatprep.mubr.msk.bf16.mxu0 (!%p322_p3), %vm3976_vm10, %v3975_v18 }
   0xb   : > { %vm459_vm8 = vcmp.gt.f32.partialorder (!%p322_p3), %v449_v14, 0.5  ;;  %v535_v19 = vsel (!%p322_p3), %vm461_vm7, 1, %v3974_v3  ;;  %v3855_v21 = vld [vmem:[%s4942_s4 + $0x100] sm:$0xff] (!%p322_p3)   ;;  %vm460_vm9 = vcmp.gt.f32.partialorder (!%p322_p3), %v450_v17, 0.5  ;;  %v3858_v25 = vld [vmem:[%s4942_s4 + $0x48] sm:$0xff] (!%p322_p3)   ;;  %v3859_v26 = vld [vmem:[%s4942_s4 + $0x110] sm:$0xff] (!%p322_p3)  }
   0xc   : > { %537 = vperm.xlu0 (!%p322_p3), %3848, %v526_v8   ;;  %v533_v20 = vsel (!%p322_p3), %vm459_vm8, 1, %v3974_v3  ;;  %v3856_v22 = vld [vmem:[%s4942_s4 + $0x40] sm:$0xff] (!%p322_p3)   ;;  %3479 = vmatpush3.bf16.msra.mxu0 (!%p322_p3), %v3855_v21  ;;  %v534_v23 = vsel (!%p322_p3), %vm460_vm9, 1, %v3974_v3  ;;  %v3860_v27 = vld [vmem:[%s4942_s4 + $0x50] sm:$0xff] (!%p322_p3)   ;;  %v3861_v28 = vld [vmem:[%s4942_s4 + $0x118] sm:$0xff] (!%p322_p3)   ;;  %p391_p4 = scmp.lt.s32.totalorder (!%p322_p3), %s3964_s27, 1 }
   0xd   : > { %543 = vperm.xlu1 (!%p322_p3), %3854, %v528_v7   ;;  %3335 = vmatpush3.bf16.msra.mxu1 (!%p322_p3), %v3856_v22  ;;  %v3862_v29 = vld [vmem:[%s4942_s4 + $0x58] sm:$0xff] (!%p322_p3)   ;;  %v3863_v30 = vld [vmem:[%s4942_s4 + $0x120] sm:$0xff] (!%p322_p3)   ;;  %v3865_v32 = vld [vmem:[%s4942_s4 + $0x128] sm:$0xff] (!%p322_p3)   ;;  %vm655_vm11 = vsmask.f32 (!%p322_p3), 256  ;;  %vm676_vm13 = vcmask (!%p322_p3), 1043456  }
   0xe   : > { %3480 = vmatprep.subr.bf16.mxu0 %v3975_v18  ;;  %3336 = vmatprep.subr.bf16.mxu1 %v3975_v18  ;;  %v3864_v31 = vld [vmem:[%s4942_s4 + $0x60] sm:$0xff]   ;;  %v3866_v33 = vld [vmem:[%s4942_s4 + $0x68] sm:$0xff]   ;;  %v3867_v34 = vld [vmem:[%s4942_s4 + $0x130] sm:$0xff]   ;;  %s4968_s27 = smov (!%p391_p4, %s3964_s27), 1  ;;  %vm656_vm12 = vsmask.f32 4368 }
   0xf   : > { %v3868_v35 = vld [vmem:[%s4942_s4 + $0x70] sm:$0xff]   ;;  %v3869_v36 = vld [vmem:[%s4942_s4 + $0x138] sm:$0xff]   ;;  %s3139_s25 = sshll.u32 %s4968_s27, 4  ;;  %s3820_s26 = smul.u32 40, %s4968_s27  ;;  %v4163_v44 = vld [vmem:[%s4940_s2] ss:$0 sm:$0xff] }
  0x10   : > { %546 = vperm.xlu0 %3848, %v529_v12   ;;  %3481 = vmatpush3.bf16.msra.mxu0 %v3857_v24  ;;  %v3870_v37 = vld [vmem:[%s4942_s4 + $0x78] sm:$0xff]   ;;  %s4151_s11 = scalar_lea.vmem %s4939_s1, %s3139_s25  ;;  %v4169_v55 = vld [vmem:[%s4941_s3] ss:$0 sm:$0xff]  ;;  %vm677_vm14 = vsmask.f32 7938  ;;  %vm682_vm15 = vcmask 1041408   ;;  %vm4252_vm7 = vmor %vm655_vm11, %vm656_vm12  ;;  %s432_s16 = scalar_lea.vmem %s4945_s7, %s4968_s27 }
  0x11   : > { %549 = vperm.xlu1 %3854, %v530_v11   ;;  %3337 = vmatpush3.bf16.msra.mxu1 %v3858_v25  ;;  %s398_s14 = scalar_lea.vmem %s4938_s0, %s3820_s26  ;;  %v597_v38 = vld [vmem:[%s4151_s11] ss:$8 sps:$4 sm:$0xff]   ;;  %v598_v40 = vld [vmem:[%s4151_s11 + $0x4] sm:$0x1]  ;;  %v2889_v11 = vld [vmem:[%s4151_s11 + $0xc] sm:$0x1]  ;;  %s438_s19 = scalar_lea.vmem %s4946_s8, %s4968_s27 }
  0x12   : > { %3482 = vmatprep.subr.bf16.mxu0 %v3975_v18  ;;  %3338 = vmatprep.subr.bf16.mxu1 %v3975_v18  ;;  %v3165_v39 = vld [vmem:[%s398_s14] sm:$0xff]   ;;  %v3209_v41 = vld [vmem:[%s398_s14 + $0x8] sm:$0xff]   ;;  %v599_v42 = vunpack.c.l.bf16 %v597_v38  ;;  %v3210_v43 = vld [vmem:[%s398_s14 + $0x10] sm:$0xff]   ;;  %v600_v47 = vunpack.c.l.bf16 %v598_v40  ;;  %v629_v1 = vunpack.c.h.bf16 %v597_v38  ;;  %v630_v22 = vunpack.c.l.bf16 %v2889_v11 }
  0x13   : > { %v3167_v45 = vunpack.c.h.bf16 %v3165_v39  ;;  %v3211_v46 = vld [vmem:[%s398_s14 + $0x18] sm:$0xff]   ;;  %v3170_v48 = vunpack.c.l.bf16 %v3209_v41  ;;  %v3166_v49 = vunpack.c.l.bf16 %v3165_v39  ;;  %v3174_v50 = vunpack.c.l.bf16 %v3210_v43  ;;  %v3212_v52 = vld [vmem:[%s398_s14 + $0x20] sm:$0xff]   ;;  %s4893_s14 = scalar_lea.vmem %s4944_s6, %s3820_s26 }
  0x14   : > { %552 = vperm.xlu0 %3848, %v531_v16   ;;  %3483 = vmatpush3.bf16.msra.mxu0 %v3859_v26  ;;  %v3171_v51 = vunpack.c.h.bf16 %v3209_v41  ;;  %v601_v53 = vmul.f32 %v4163_v44, %v599_v42  ;;  %v3178_v54 = vunpack.c.l.bf16 %v3211_v46  ;;  %v3175_v57 = vunpack.c.h.bf16 %v3210_v43 }
  0x15   : > { %555 = vperm.xlu1 %3854, %v532_v15   ;;  %3339 = vmatpush3.bf16.msra.mxu1 %v3860_v27  ;;  %v491_v56 = vmul.f32 %v3167_v45, %v4163_v44  ;;  %v602_v58 = vmul.f32 %v4163_v44, %v600_v47  ;;  %v492_v59 = vmul.f32 %v3170_v48, %v4163_v44  ;;  %v3183_v61 = vunpack.c.h.bf16 %v3212_v52 }
  0x16   : > { %3484 = vmatprep.subr.bf16.mxu0 %v3975_v18  ;;  %3340 = vmatprep.subr.bf16.mxu1 %v3975_v18  ;;  %v490_v60 = vmul.f32 %v3166_v49, %v4163_v44  ;;  %v494_v62 = vmul.f32 %v3174_v50, %v4163_v44  ;;  %v493_v63 = vmul.f32 %v3171_v51, %v4163_v44  ;;  %v3179_v0 = vunpack.c.h.bf16 %v3211_v46 }
  0x17   : > { %v603_v2 = vadd.f32 %v4169_v55, %v601_v53  ;;  %v507_v4 = vadd.f32 %v4169_v55, %v491_v56  ;;  %v495_v5 = vmul.f32 %v3175_v57, %v4163_v44  ;;  %v3182_v6 = vunpack.c.l.bf16 %v3212_v52 }
  0x18   : > { %558 = vperm.xlu0 %3848, %v533_v20   ;;  %3485 = vmatpush3.bf16.msra.mxu0 %v3861_v28  ;;  %v604_v7 = vadd.f32 %v4169_v55, %v602_v58  ;;  %v4183_v8 = vadd.f32 %v4169_v55, %v492_v59  ;;  %v4186_v9 = vadd.f32 %v4169_v55, %v490_v60  ;;  %vm683_vm0 = vsmask.f32 1280 }
  0x19   : > { %564 = vperm.xlu1 %3854, %v535_v19   ;;  %3341 = vmatpush3.bf16.msra.mxu1 %v3862_v29  ;;  %v499_v10 = vmul.f32 %v3183_v61, %v4163_v44  ;;  %v4191_v12 = vadd.f32 %v4169_v55, %v494_v62  ;;  %v4194_v13 = vadd.f32 %v4169_v55, %v493_v63  ;;  %v605_v16 = vmax.f32 %v603_v2, 0.0  ;;  %vm4267_vm12 = vmand %vm682_vm15, %vm683_vm0 }
  0x1a   : > { %3486 = vmatprep.subr.bf16.mxu0 %v3975_v18  ;;  %3342 = vmatprep.subr.bf16.mxu1 %v3975_v18  ;;  %v497_v14 = vmul.f32 %v3179_v0, %v4163_v44  ;;  %v631_v15 = vmul.f32 %v4163_v44, %v629_v1  ;;  %v517_v19 = vmax.f32 %v507_v4, 0.0  ;;  %v4202_v20 = vadd.f32 %v4169_v55, %v495_v5 }
  0x1b   : > { %v498_v21 = vmul.f32 %v3182_v6, %v4163_v44  ;;  %v518_v24 = vmax.f32 %v4183_v8, 0.0  ;;  %v516_v25 = vmax.f32 %v4186_v9, 0.0  ;;  %v4208_v26 = vadd.f32 %v4169_v55, %v499_v10  ;;  %v679_v6 = vld [vmem:[#allocation2] sm:$0xf]  ;;  %v685_v10 = vld [vmem:[#allocation2 + $0x4] sm:$0x3] }
  0x1c   : > { %561 = vperm.xlu0 %3848, %v534_v23   ;;  %3487 = vmatpush3.bf16.msra.mxu0 %v3863_v30  ;;  %v606_v23 = vmax.f32 %v604_v7, 0.0  ;;  %v520_v29 = vmax.f32 %v4191_v12, 0.0  ;;  %v519_v30 = vmax.f32 %v4194_v13, 0.0  ;;  %v632_v39 = vmul.f32 %v4163_v44, %v630_v22 }
  0x1d   : > { %640 = vperm.xlu1 %3854, %v3974_v3   ;;  %3343 = vmatpush3.bf16.msra.mxu1 %v3864_v31  ;;  %v4215_v31 = vadd.f32 %v4169_v55, %v497_v14  ;;  %v4226_v38 = vadd.f32 %v4169_v55, %v498_v21  ;;  %v525_v41 = vmax.f32 %v4208_v26, 0.0  ;;  %vm713_vm4 = vsmask.f32 5392 }
  0x1e   : > { %3488 = vmatprep.subr.bf16.mxu0 %v3975_v18  ;;  %3344 = vmatprep.subr.bf16.mxu1 %v3975_v18  ;;  %v4240_v53 = vadd.f32 %v4169_v55, %v632_v39  ;;  %vm825_vm8 = vcmask 1043457   ;;  %vm826_vm9 = vsmask.f32 7942 }
  0x1f   : > { %v523_v47 = vmax.f32 %v4215_v31, 0.0  ;;  %v524_v52 = vmax.f32 %v4226_v38, 0.0 }
  0x20   : > { %643 = vperm.xlu0 %3848, %v3974_v3   ;;  %3489 = vmatpush3.bf16.msra.mxu0 %v3865_v32  ;;  %v496_v3 = vmul.f32 %v3178_v54, %v4163_v44  ;;  %v4218_v32 = vadd.f32 %v4169_v55, %v631_v15  ;;  %v636_v8 = vmax.f32 %v4240_v53, 0.0 }
  0x21   : > { %3345 = vmatpush3.bf16.msra.mxu1 %v3866_v33  ;;  %3490 = vmatprep.subr.bf16.mxu0 %v3975_v18 }
  0x22   : > { %3346 = vmatprep.subr.bf16.mxu1 %v3975_v18  ;;  %v4199_v17 = vadd.f32 %v4169_v55, %v496_v3  ;;  %v635_v48 = vmax.f32 %v4218_v32, 0.0 }
  0x24   : > { %3491 = vmatpush3.bf16.msra.mxu0 %v3867_v34 }
  0x25   : > { %3347 = vmatpush3.bf16.msra.mxu1 %v3868_v35  ;;  %3492 = vmatprep.subr.bf16.mxu0 %v3975_v18  ;;  %v522_v35 = vmax.f32 %v4199_v17, 0.0 }
  0x26   : > { %3348 = vmatprep.subr.bf16.mxu1 %v3975_v18 }
  0x28   : > { %3493 = vmatpush3.bf16.msra.mxu0 %v3869_v36 }
  0x29   : > { %3349 = vmatpush3.bf16.msra.mxu1 %v3870_v37  ;;  %3514 = vmatprep.subr.bf16.mxu0 %v3975_v18  ;;  %v521_v37 = vmax.f32 %v4202_v20, 0.0  ;;  %v3875_v20 = vld [vmem:[%s4942_s4 + $0x140] sm:$0xff]  }
  0x2a   : > { %3370 = vmatprep.subr.bf16.mxu1 %v3975_v18 }
  0x87   : > { %v3851_v27 = vpop.permute.xlu0 %3850 }
  0x88   : > { %v4210_v28 = vpop.permute.xlu1 %540  ;;  %v3853_v33 = vunpack.i.h.bf16 %v3851_v27  ;;  %v3852_v34 = vunpack.i.l.bf16 %v3851_v27 }
  0x89   : > { %vm567_vm1 = vcmp.eq.s32.totalorder %v4210_v28, 1 }
  0x8a   : > { %v577_v36 = vsel %vm567_vm1, %v517_v19, 0.0  ;;  %vm616_vm2 = vcmp.eq.s32.totalorder %v3853_v33, 1  ;;  %vm615_vm3 = vcmp.eq.s32.totalorder %v3852_v34, 1 }
  0x8b   : > { %v3143_v40 = vpack.c.bf16 %v577_v36, %v577_v36  ;;  %v617_v42 = vsel %vm615_vm3, %v605_v16, 0.0  ;;  %v618_v43 = vsel %vm616_vm2, %v606_v23, 0.0  ;;  %v4232_v46 = vpop.permute.xlu0 %537  ;;  %vm4258_vm2 = vmand %vm676_vm13, %vm677_vm14 }
  0x8c   : > { %v4230_v45 = vpop.permute.xlu1 %543  ;;  %v3140_v49 = vpack.c.bf16 %v617_v42, %v617_v42  ;;  %v3141_v50 = vpack.c.bf16 %v618_v43, %v618_v43  ;;  %vm566_vm6 = vcmp.eq.s32.totalorder %v4232_v46, 1  ;;  %vm4287_vm13 = vmor %vm683_vm0, %vm713_vm4 }
  0x8d   : > { %v725_v51 = vshrl.u32 %v3143_v40, 16  ;;  %v728_v44 = vshll.u32 %v3143_v40, 16  ;;  %vm568_vm5 = vcmp.eq.s32.totalorder %v4230_v45, 1  ;;  %v576_v62 = vsel %vm566_vm6, %v516_v25, 0.0  ;;  %vm4313_vm0 = vmand %vm825_vm8, %vm826_vm9 }
  0x8e   : > { %v659_v54 = vshrl.u32 %v3140_v49, 16  ;;  %v662_v56 = vshll.u32 %v3140_v49, 16  ;;  %v667_v57 = vshrl.u32 %v3141_v50, 16  ;;  %v670_v58 = vshll.u32 %v3141_v50, 16 }
  0x8f   : > { %v727_v59 = vrot.slane %v725_v51, 6  ;;  %v730_v60 = vrot.slane %v728_v44, 7  ;;  %v578_v61 = vsel %vm568_vm5, %v518_v24, 0.0  ;;  %v4248_v0 = vpop.permute.xlu0 %546  ;;  %v3142_v4 = vpack.c.bf16 %v576_v62, %v576_v62 }
  0x90   : > { %v4246_v63 = vpop.permute.xlu1 %549  ;;  %v661_v1 = vrot.slane %v659_v54, 7  ;;  %v669_v2 = vrot.slane %v667_v57, 7  ;;  %v3144_v3 = vpack.c.bf16 %v578_v61, %v578_v61  ;;  %vm569_vm11 = vcmp.eq.s32.totalorder %v4248_v0, 1 }
  0x91   : > { %v731_v7 = vor.u32 %v730_v60, %v727_v59  ;;  %vm4948_vm3 = vcmp.eq.s32.totalorder %v4246_v63, 1  ;;  %v716_v22 = vshrl.u32 %v3142_v4, 16  ;;  %v719_v23 = vshll.u32 %v3142_v4, 16 }
  0x92   : > { %v664_v11 = vor.u32 %v662_v56, %v661_v1  ;;  %v665_v14 = vrot.slane %v661_v1, 4  ;;  %v672_v15 = vor.u32 %v670_v58, %v669_v2  ;;  %v735_v16 = vshrl.u32 %v3144_v3, 16 }
  0x93   : > { %v733_v19 = vrot.slane %v731_v7, 4  ;;  %v738_v21 = vshll.u32 %v3144_v3, 16  ;;  %v4273_v25 = vpop.permute.xlu0 %552  ;;  %v580_v36 = vsel %vm4948_vm3, %v520_v29, 0.0  ;;  %v718_v42 = vrot.slane %v716_v22, 6 }
  0x94   : > { %v4271_v24 = vpop.permute.xlu1 %555  ;;  %v673_v27 = vsel %vm4252_vm7, %v665_v14, %v672_v15  ;;  %v680_v33 = vsel %vm4258_vm2, %v664_v11, %v679_v6  ;;  %v737_v34 = vrot.slane %v735_v16, 6  ;;  %v721_v43 = vrot.slane %v719_v23, 7 }
  0x95   : > { %681 = vst [vmem:[#allocation2] sm:$0xf] %v680_v33  ;;  %v686_v39 = vsel %vm4267_vm12, %v673_v27, %v685_v10  ;;  %v740_v40 = vrot.slane %v738_v21, 7  ;;  %v3146_v50 = vpack.c.bf16 %v580_v36, %v580_v36  ;;  %v579_v12 = vsel %vm569_vm11, %v519_v30, 0.0 }
  0x96   : > { %687 = vst [vmem:[#allocation2 + $0x4] sm:$0x3] %v686_v39  ;;  %vm572_vm14 = vcmp.eq.s32.totalorder %v4271_v24, 1  ;;  %vm4947_vm15 = vcmp.eq.s32.totalorder %v4273_v25, 1  ;;  %v722_v51 = vor.u32 %v721_v43, %v718_v42  ;;  %v3145_v44 = vpack.c.bf16 %v579_v12, %v579_v12 }
  0x97   : > { %v741_v29 = vor.u32 %v740_v40, %v737_v34  ;;  %v582_v54 = vsel %vm572_vm14, %v522_v35, 0.0  ;;  %v4301_v56 = vpop.permute.xlu0 %558  ;;  %v755_v57 = vshrl.u32 %v3146_v50, 16  ;;  %v758_v58 = vshll.u32 %v3146_v50, 16 }
  0x98   : > { %v3148_v13 = vpack.c.bf16 %v582_v54, %v582_v54  ;;  %v581_v30 = vsel %vm4947_vm15, %v521_v37, 0.0  ;;  %v4307_v59 = vpop.permute.xlu1 %564  ;;  %v723_v17 = vrot.slane %v722_v51, 4  ;;  %v745_v62 = vshrl.u32 %v3145_v44, 16 }
  0x99   : > { %v742_v60 = vsel %vm4287_vm13, %v733_v19, %v741_v29  ;;  %v743_v61 = vrot.slane %v741_v29, 4  ;;  %v757_v35 = vrot.slane %v755_v57, 6  ;;  %v760_v55 = vrot.slane %v758_v58, 7 }
  0x9a   : > { %832 = vst [vmem:[#allocation2 + $0xc] sm:$0xf] %v742_v60  ;;  %v748_v1 = vshll.u32 %v3145_v44, 16  ;;  %v775_v2 = vshrl.u32 %v3148_v13, 16  ;;  %v732_v37 = vsel %vm4287_vm13, %v723_v17, %v731_v7  ;;  %v747_v3 = vrot.slane %v745_v62, 6 }
  0x9b   : > { %v778_v4 = vshll.u32 %v3148_v13, 16  ;;  %v3147_v5 = vpack.c.bf16 %v581_v30, %v581_v30  ;;  %831 = vst [vmem:[#allocation2 + $0x8] sm:$0xf] %v732_v37  ;;  %v761_v6 = vor.u32 %v760_v55, %v757_v35  ;;  %vm575_vm4 = vcmp.eq.s32.totalorder %v4307_v59, 1  ;;  %v4320_v14 = vpop.permute.xlu0 %561 }
  0x9c   : > { %v750_v10 = vrot.slane %v748_v1, 7  ;;  %v777_v11 = vrot.slane %v775_v2, 6  ;;  %v585_v7 = vsel %vm575_vm4, %v525_v41, 0.0  ;;  %v641_v34 = vpop.permute.xlu1 %640  ;;  %vm573_vm7 = vcmp.eq.s32.totalorder %v4301_v56, 1 }
  0x9d   : > { %v828_v15 = vld [vmem:[#allocation2 + $0x4] sm:$0xe]  ;;  %v780_v16 = vrot.slane %v778_v4, 7  ;;  %v765_v19 = vshrl.u32 %v3147_v5, 16  ;;  %v768_v21 = vshll.u32 %v3147_v5, 16  ;;  %v763_v23 = vrot.slane %v761_v6, 4 }
  0x9e   : > { %v829_v22 = vsel %vm4313_vm0, %v722_v51, %v828_v15  ;;  %v751_v27 = vor.u32 %v750_v10, %v747_v3  ;;  %v3151_v33 = vpack.c.bf16 %v585_v7, %v585_v7  ;;  %v583_v29 = vsel %vm573_vm7, %v523_v47, 0.0  ;;  %v840_v47 = vld [vmem:[#allocation2 + $0x2c] sm:$0x3] }
  0x9f   : > { %830 = vst [vmem:[#allocation2 + $0x4] sm:$0xe] %v829_v22  ;;  %v4328_v36 = vor.u32 %v780_v16, %v777_v11  ;;  %v767_v39 = vrot.slane %v765_v19, 6  ;;  %v770_v40 = vrot.slane %v768_v21, 7  ;;  %vm645_vm8 = vcmp.eq.s32.totalorder %v641_v34, 1  ;;  %v644_v58 = vpop.permute.xlu0 %643 }
  0xa0   : > { %v752_v26 = vsel %vm4287_vm13, %v743_v61, %v751_v27  ;;  %v753_v42 = vrot.slane %v751_v27, 4  ;;  %v805_v43 = vshrl.u32 %v3151_v33, 16  ;;  %v808_v41 = vshll.u32 %v3151_v33, 16 }
  0xa1   : > { %833 = vst [vmem:[#allocation2 + $0x10] sm:$0xf] %v752_v26  ;;  %v783_v50 = vrot.slane %v4328_v36, 4  ;;  %v771_v12 = vor.u32 %v770_v40, %v767_v39  ;;  %v3149_v57 = vpack.c.bf16 %v583_v29, %v583_v29  ;;  %v647_v60 = vsel %vm645_vm8, %v635_v48, 0.0  ;;  %v877_v48 = vld [vmem:[#allocation2] sm:$0xf] }
  0xa2   : > { %v762_v51 = vsel %vm4287_vm13, %v753_v42, %v761_v6  ;;  %v807_v44 = vrot.slane %v805_v43, 6  ;;  %v810_v54 = vrot.slane %v808_v41, 7  ;;  %vm574_vm9 = vcmp.eq.s32.totalorder %v4320_v14, 1  ;;  %v4345_v31 = vld [vmem:[#allocation2 + $0x8] sm:$0xff]   ;;  %v874_v43 = vld [vmem:[#allocation2 + $0x30] sm:$0x7] }
  0xa3   : > { %834 = vst [vmem:[#allocation2 + $0x14] sm:$0xf] %v762_v51  ;;  %v772_v13 = vsel %vm4287_vm13, %v763_v23, %v771_v12  ;;  %v773_v30 = vrot.slane %v771_v12, 4  ;;  %vm871_vm2 = vcmask 1042432   ;;  %vm872_vm15 = vsmask.f32 2304 }
  0xa4   : > { %835 = vst [vmem:[#allocation2 + $0x18] sm:$0xf] %v772_v13  ;;  %v4347_v61 = vor.u32 %v810_v54, %v807_v44  ;;  %v785_v17 = vshrl.u32 %v3149_v57, 16  ;;  %v788_v62 = vshll.u32 %v3149_v57, 16  ;;  %v3152_v35 = vpack.c.bf16 %v647_v60, %v647_v60  ;;  %v3879_v13 = vld [vmem:[%s4942_s4] sm:$0xff]  }
  0xa5   : > { %v782_v55 = vsel %vm4287_vm13, %v773_v30, %v4328_v36  ;;  %v584_v32 = vsel %vm574_vm9, %v524_v52, 0.0  ;;  %vm646_vm8 = vcmp.eq.s32.totalorder %v644_v58, 1  ;;  %v958_v1 = vshll.u32 %v4345_v31, 16  ;;  %v3887_v30 = vld [vmem:[%s4942_s4 + $0x18] sm:$0xff]  }
  0xa6   : > { %836 = vst [vmem:[#allocation2 + $0x1c] sm:$0xf] %v782_v55  ;;  %v813_v2 = vrot.slane %v4347_v61, 4  ;;  %v787_v37 = vrot.slane %v785_v17, 6  ;;  %v790_v3 = vrot.slane %v788_v62, 7  ;;  %v849_v4 = vshrl.u32 %v3152_v35, 16 }
  0xa7   : > { %v4358_v5 = vld [vmem:[#allocation2 + $0x4] sm:$0xf]  ;;  %v852_v6 = vshll.u32 %v3152_v35, 16  ;;  %v3150_v10 = vpack.c.bf16 %v584_v32, %v584_v32  ;;  %v648_v38 = vsel %vm646_vm8, %v636_v8, 0.0  ;;  %vm949_vm3 = vsmask.f32 7424 }
  0xa8   : > { %v4363_v11 = vcombine.low %v877_v48, %v4358_v5  ;;  %v1415_v52 = vld [vmem:[#allocation2 + $0x4] sm:$0xe]  ;;  %v841_v15 = vsel %vm4267_vm12, %v813_v2, %v840_v47  ;;  %v791_v16 = vor.u32 %v790_v3, %v787_v37  ;;  %v851_v19 = vrot.slane %v849_v4, 6  ;;  %v4367_v7 = vld [vmem:[#allocation2 + $0xc] sm:$0xff]   ;;  %v4370_v8 = vld [vmem:[#allocation2 + $0x8] sm:$0xf] }
  0xa9   : > { %v3153_v21 = vpack.c.bf16 %v648_v38, %v648_v38  ;;  %842 = vst [vmem:[#allocation2 + $0x2c] sm:$0x3] %v841_v15  ;;  %v854_v22 = vrot.slane %v852_v6, 7  ;;  %v795_v23 = vshrl.u32 %v3150_v10, 16  ;;  %v798_v27 = vshll.u32 %v3150_v10, 16  ;;  %vm4386_vm12 = vmand %vm871_vm2, %vm872_vm15 }
  0xaa   : > { %v951_v53 = vshrl.u32 %v4363_v11, 16  ;;  %vm1639_vm8 = vsmask.f32 6400  ;;  %v792_v33 = vsel %vm4287_vm13, %v783_v50, %v791_v16  ;;  %v793_v9 = vrot.slane %v791_v16, 4  ;;  %v4379_v58 = vld [vmem:[#allocation2 + $0x10] sm:$0xff]  }
  0xab   : > { %v858_v34 = vshrl.u32 %v3153_v21, 16  ;;  %v861_v36 = vshll.u32 %v3153_v21, 16  ;;  %837 = vst [vmem:[#allocation2 + $0x20] sm:$0xf] %v792_v33  ;;  %v855_v39 = vor.u32 %v854_v22, %v851_v19  ;;  %v797_v40 = vrot.slane %v795_v23, 6  ;;  %v4393_v35 = vld [vmem:[#allocation2 + $0x14] sm:$0xff]  }
  0xac   : > { %v800_v26 = vrot.slane %v798_v27, 7  ;;  %v953_v42 = vshll.u32 %v4363_v11, 16  ;;  %v960_v29 = vrot.slane %v958_v1, 1  ;;  %v4376_v51 = vcombine.low %v1415_v52, %v4370_v8  ;;  %v3881_v22 = vld [vmem:[%s4942_s4 + $0x8] sm:$0xff]  }
  0xad   : > { %v860_v41 = vrot.slane %v858_v34, 6  ;;  %v863_v12 = vrot.slane %v861_v36, 7  ;;  %v856_v44 = vrot.slane %v855_v39, 4  ;;  %v1649_v50 = vshrl.u32 %v4367_v7, 16  ;;  %v4423_v36 = vld [vmem:[#allocation2 + $0x18] sm:$0xff]  }
  0xae   : > { %v801_v54 = vor.u32 %v800_v26, %v797_v40  ;;  %v955_v57 = vrot.slane %v953_v42, 1  ;;  %v1641_v47 = vshrl.u32 %v4376_v51, 16  ;;  %v1644_v17 = vshll.u32 %v4376_v51, 16 }
  0xaf   : > { %v864_v60 = vor.u32 %v863_v12, %v860_v41  ;;  %v1652_v62 = vshll.u32 %v4367_v7, 16  ;;  %v1651_v1 = vrot.slane %v1649_v50, 1  ;;  %v966_v21 = vshll.u32 %v4379_v58, 16  ;;  %v3885_v41 = vld [vmem:[%s4942_s4 + $0x10] sm:$0xff]  }
  0xb0   : > { %v802_v55 = vsel %vm4287_vm13, %v793_v9, %v801_v54  ;;  %v803_v32 = vrot.slane %v801_v54, 4  ;;  %v956_v48 = vor.u32 %v955_v57, %v951_v53  ;;  %v868_v2 = vld [vmem:[#allocation2 + $0x2c] sm:$0xe]  ;;  %v1643_v3 = vrot.slane %v1641_v47, 1  ;;  %v1246_v54 = vld [vmem:[#allocation2] sm:$0xe] }
  0xb1   : > { %838 = vst [vmem:[#allocation2 + $0x24] sm:$0xf] %v802_v55  ;;  %v865_v37 = vsel %vm4287_vm13, %v856_v44, %v864_v60  ;;  %v1646_v4 = vrot.slane %v1644_v17, 2  ;;  %v1654_v6 = vrot.slane %v1652_v62, 2  ;;  %v869_v10 = vsel %vm4313_vm0, %v855_v39, %v868_v2  ;;  %v3876_v39 = vld [vmem:[%s4942_s4 + $0x148] sm:$0xff]  }
  0xb2   : > { %v812_v38 = vsel %vm4287_vm13, %v803_v32, %v4347_v61  ;;  %v875_v52 = vsel %vm4386_vm12, %v865_v37, %v874_v43  ;;  %v961_v15 = vsel %vm949_vm3, %v956_v48, %v960_v29  ;;  %870 = vst [vmem:[#allocation2 + $0x2c] sm:$0xe] %v869_v10  ;;  %v1658_v49 = vshrl.u32 %v4393_v35, 16  ;;  %v4420_v27 = vld [vmem:[#allocation2 + $0x1c] sm:$0xff]  }
  0xb3   : > { %839 = vst [vmem:[#allocation2 + $0x28] sm:$0xf] %v812_v38  ;;  %876 = vst [vmem:[#allocation2 + $0x30] sm:$0x7] %v875_v52  ;;  %3351 = vmatmul.mubr.bf16.vlgmr.msra.gmra.mrb[0].mxu1 %v961_v15  ;;  %v1647_v16 = vor.u32 %v1646_v4, %v1643_v3  ;;  %v1655_v19 = vor.u32 %v1654_v6, %v1651_v1  ;;  %v1661_v61 = vshll.u32 %v4393_v35, 16  ;;  %v962_v53 = vshrl.u32 %v4345_v31, 16 }
  0xb4   : > { %3354 = vmatprep.mubr.msk.bf16.mxu1 %vm3976_vm10, %v3975_v18  ;;  %3371 = vmatpush3.bf16.msra.mxu1 %v3879_v13  ;;  %v968_v33 = vrot.slane %v966_v21, 1  ;;  %v1660_v9 = vrot.slane %v1658_v49, 1  ;;  %v1667_v42 = vshrl.u32 %v4420_v27, 16  ;;  %v1670_v43 = vshll.u32 %v4420_v27, 16  ;;  %v3882_v32 = vld [vmem:[%s4942_s4 + $0x158] sm:$0xff]   ;;  %v3890_v37 = vld [vmem:[%s4942_s4 + $0x20] sm:$0xff]  }
  0xb5   : > { %v1656_v23 = vsel %vm1639_vm8, %v1647_v16, %v1655_v19  ;;  %3372 = vmatprep.subr.bf16.mxu1 %v3975_v18  ;;  %v1663_v34 = vrot.slane %v1661_v61, 2  ;;  %v964_v40 = vor.u32 %v962_v53, %v960_v29  ;;  %v974_v44 = vshll.u32 %v4423_v36, 16  ;;  %v3880_v29 = vld [vmem:[%s4942_s4 + $0x150] sm:$0xff]   ;;  %v3886_v38 = vld [vmem:[%s4942_s4 + $0x160] sm:$0xff]   ;;  %v3892_v49 = vld [vmem:[%s4942_s4 + $0x28] sm:$0xff]  }
  0xb6   : > { %3495 = vmatmul.mubr.bf16.vlgmr.msra.gmra.mrb[0].mxu0 %v1656_v23  ;;  %v1669_v50 = vrot.slane %v1667_v42, 1  ;;  %v1672_v13 = vrot.slane %v1670_v43, 2  ;;  %v2958_v47 = vcombine.low %v1246_v54, %v4358_v5  ;;  %v970_v17 = vshrl.u32 %v4379_v58, 16  ;;  %v4486_v61 = vld [vmem:[#allocation2 + $0x2c] ss:$0 sps:$4 sm:$0x33]  }
  0xb7   : > { %3515 = vmatpush3.bf16.msra.mxu0 %v3875_v20  ;;  %3498 = vmatprep.mubr.msk.bf16.mxu0 %vm3976_vm10, %v3975_v18  ;;  %v1664_v26 = vor.u32 %v1663_v34, %v1660_v9  ;;  %v969_v12 = vsel %vm949_vm3, %v964_v40, %v968_v33  ;;  %v976_v62 = vrot.slane %v974_v44, 1  ;;  %vm1267_vm13 = vcmask 1046528   ;;  %v3891_v34 = vld [vmem:[%s4942_s4 + $0x168] sm:$0xff]  }
  0xb8   : > { %3516 = vmatprep.subr.bf16.mxu0 %v3975_v18  ;;  %3373 = vmatpush3.bf16.msra.mxu1 %v3881_v22  ;;  %v4454_v55 = vld [vmem:[#allocation2 + $0x20] sm:$0xff]   ;;  %v972_v48 = vor.u32 %v970_v17, %v968_v33  ;;  %v1673_v5 = vor.u32 %v1672_v13, %v1669_v50  ;;  %v1268_v3 = vrot.slane %v2958_v47, 1  ;;  %v1269_v10 = vrot.slane %v4345_v31, 1  ;;  %v3946_v13 = vld [vmem:[#allocation2 + $0x2c] ss:$0 sps:$4 sm:$0x11]  }
  0xb9   : > { %3374 = vmatprep.subr.bf16.mxu1 %v3975_v18  ;;  %v1665_v57 = vsel %vm1639_vm8, %v1655_v19, %v1664_v26  ;;  %v982_v6 = vshll.u32 %v4454_v55, 16  ;;  %v1271_v52 = vrot.slane %v4379_v58, 1  ;;  %v1273_v16 = vrot.slane %v4423_v36, 1 }
  0xba   : > { %v4449_v60 = vld [vmem:[#allocation2 + $0x24] sm:$0xff]   ;;  %v977_v4 = vsel %vm949_vm3, %v972_v48, %v976_v62  ;;  %v4479_v15 = vsel %vm1267_vm13, %v1268_v3, %v1269_v10  ;;  %v1674_v19 = vsel %vm1639_vm8, %v1664_v26, %v1673_v5  ;;  %v978_v23 = vshrl.u32 %v4423_v36, 16  ;;  %v3898_v48 = vld [vmem:[%s4942_s4 + $0x38] sm:$0xff]   ;;  %v4539_v3 = vld [vmem:[#allocation2 + $0x10] sm:$0xff]  }
  0xbb   : > { %3517 = vmatpush3.bf16.msra.mxu0 %v3876_v39  ;;  %3355 = vmatmul.mubr.bf16.gmra.mrb[4].mxu1 %v969_v12  ;;  %v1676_v1 = vshrl.u32 %v4449_v60, 16  ;;  %v1679_v2 = vshll.u32 %v4449_v60, 16  ;;  %v4489_v22 = vsel %vm1267_vm13, %v1269_v10, %v1271_v52  ;;  %v984_v53 = vrot.slane %v982_v6, 1  ;;  %v4493_v33 = vld [vmem:[#allocation2 + $0x28] ss:$0 sps:$4 sm:$0x11]  }
  0xbc   : > { %3518 = vmatprep.subr.bf16.mxu0 %v3975_v18  ;;  %3358 = vmatprep.mubr.msk.bf16.mxu1 %vm3976_vm10, %v3975_v18  ;;  %v4498_v9 = vsel %vm1267_vm13, %v1271_v52, %v1273_v16  ;;  %v1471_v39 = vrot.slane %v4376_v51, 1  ;;  %v1472_v40 = vrot.slane %v4367_v7, 1  ;;  %v980_v26 = vor.u32 %v978_v23, %v976_v62  ;;  %v3896_v12 = vld [vmem:[%s4942_s4 + $0x30] sm:$0xff]   ;;  %v4547_v6 = vld [vmem:[#allocation2 + $0xc] sm:$0xf]  ;;  %v4550_v52 = vld [vmem:[#allocation2 + $0x18] sm:$0xff]  }
  0xbd   : > { %3375 = vmatpush3.bf16.msra.mxu1 %v3885_v41  ;;  %v1678_v20 = vrot.slane %v1676_v1, 1  ;;  %v1681_v21 = vrot.slane %v1679_v2, 2  ;;  %v1685_v43 = vshrl.u32 %v4486_v61, 16  ;;  %v1688_v41 = vshll.u32 %v4486_v61, 16  ;;  %v1829_v23 = vld [vmem:[#allocation2 + $0x4] sm:$0xc] }
  0xbe   : > { %3499 = vmatmul.mubr.bf16.gmra.mrb[4].mxu0 %v1665_v57  ;;  %3376 = vmatprep.subr.bf16.mxu1 %v3975_v18  ;;  %v4514_v44 = vsel %vm1267_vm13, %v1471_v39, %v1472_v40  ;;  %v985_v51 = vsel %vm949_vm3, %v980_v26, %v984_v53  ;;  %v1474_v54 = vrot.slane %v4393_v35, 1  ;;  %v3893_v57 = vld [vmem:[%s4942_s4 + $0x170] sm:$0xff]   ;;  %v1476_v50 = vrot.slane %v4420_v27, 1 }
  0xbf   : > { %3519 = vmatpush3.bf16.msra.mxu0 %v3880_v29  ;;  %3502 = vmatprep.mubr.msk.bf16.mxu0 %vm3976_vm10, %v3975_v18  ;;  %v1682_v42 = vor.u32 %v1681_v21, %v1678_v20  ;;  %v990_v29 = vshll.u32 %v4493_v33, 16  ;;  %v1687_v62 = vrot.slane %v1685_v43, 1  ;;  %v1480_v10 = vrot.slane %v3946_v13, 1  ;;  %v3903_v13 = vld [vmem:[%s4942_s4 + $0x190] sm:$0xff]  }
  0xc0   : > { %3520 = vmatprep.subr.bf16.mxu0 %v3975_v18  ;;  %v4529_v47 = vsel %vm1267_vm13, %v1472_v40, %v1474_v54  ;;  %v4536_v1 = vsel %vm1267_vm13, %v1474_v54, %v1476_v50  ;;  %vm2433_vm15 = vcmask 1044480   ;;  %v2437_v40 = vrot.slane %v4550_v52, 3  ;;  %v3904_v54 = vld [vmem:[%s4942_s4 + $0x88] sm:$0xff]  }
  0xc1   : > { %3377 = vmatpush3.bf16.msra.mxu1 %v3887_v30  ;;  %v986_v30 = vshrl.u32 %v4454_v55, 16  ;;  %v1683_v17 = vsel %vm1639_vm8, %v1673_v5, %v1682_v42  ;;  %v3897_v5 = vld [vmem:[%s4942_s4 + $0x178] sm:$0xff]   ;;  %v3038_v43 = vcombine.low %v1829_v23, %v4370_v8  ;;  %v1852_v8 = vrot.slane %v4367_v7, 2  ;;  %v3922_v23 = vld [vmem:[%s4942_s4 + $0xc0] sm:$0xff]  }
  0xc2   : > { %3378 = vmatprep.subr.bf16.mxu1 %v3975_v18  ;;  %v1854_v7 = vrot.slane %v4393_v35, 2  ;;  %vm2222_vm0 = vsmask.f32 5376 }
  0xc3   : > { %3521 = vmatpush3.bf16.msra.mxu0 %v3882_v32  ;;  %3359 = vmatmul.mubr.bf16.gmra.mrb[8].mxu1 %v977_v4  ;;  %v1690_v32 = vrot.slane %v1688_v41, 2  ;;  %v988_v2 = vor.u32 %v986_v30, %v984_v53  ;;  %v1478_v4 = vrot.slane %v4449_v60, 1  ;;  %v3908_v30 = vld [vmem:[%s4942_s4 + $0x98] sm:$0xff]  }
  0xc4   : > { %3522 = vmatprep.subr.bf16.mxu0 %v3975_v18  ;;  %3362 = vmatprep.mubr.msk.bf16.mxu1 %vm3976_vm10, %v3975_v18 }
  0xc5   : > { %3379 = vmatpush3.bf16.msra.mxu1 %v3890_v37  ;;  %v992_v37 = vrot.slane %v990_v29, 1  ;;  %v1691_v20 = vor.u32 %v1690_v32, %v1687_v62  ;;  %v4556_v21 = vsel %vm1267_vm13, %v1478_v4, %v1480_v10  ;;  %v1851_v29 = vrot.slane %v3038_v43, 2  ;;  %v3909_v62 = vld [vmem:[%s4942_s4 + $0xa0] sm:$0xff]   ;;  %v3914_v10 = vld [vmem:[%s4942_s4 + $0x1b8] sm:$0xff]  }
  0xc6   : > { %3503 = vmatmul.mubr.bf16.gmra.mrb[8].mxu0 %v1674_v19  ;;  %3380 = vmatprep.subr.bf16.mxu1 %v3975_v18  ;;  %v4553_v19 = vsel %vm1267_vm13, %v1476_v50, %v1478_v4  ;;  %v3906_v50 = vld [vmem:[%s4942_s4 + $0x90] sm:$0xff]   ;;  %v3907_v32 = vld [vmem:[%s4942_s4 + $0x1a0] sm:$0xff]   ;;  %v2057_v43 = vrot.slane %v4550_v52, 2 }
  0xc7   : > { %3523 = vmatpush3.bf16.msra.mxu0 %v3886_v38  ;;  %3506 = vmatprep.mubr.msk.bf16.mxu0 %vm3976_vm10, %v3975_v18  ;;  %v2412_v38 = vld [vmem:[#allocation2 + $0x8] sm:$0x8]  ;;  %v1692_v26 = vsel %vm1639_vm8, %v1682_v42, %v1691_v20  ;;  %v3900_v42 = vld [vmem:[%s4942_s4 + $0x180] sm:$0xff]   ;;  %v3912_v4 = vld [vmem:[%s4942_s4 + $0x1b0] sm:$0xff]  }
  0xc8   : > { %3524 = vmatprep.subr.bf16.mxu0 %v3975_v18  ;;  %v3118_v53 = vcombine.low %v2412_v38, %v4547_v6  ;;  %v1860_v38 = vrot.slane %v4486_v61, 2  ;;  %v1998_v20 = vld [vmem:[#allocation2 + $0x8] sm:$0xc] }
  0xc9   : > { %3381 = vmatpush3.bf16.msra.mxu1 %v3892_v49  ;;  %v993_v49 = vsel %vm949_vm3, %v988_v2, %v992_v37  ;;  %vm1850_vm3 = vcmask 1045504   ;;  %v1858_v2 = vrot.slane %v4449_v60, 2  ;;  %v3913_v37 = vld [vmem:[%s4942_s4 + $0xb0] sm:$0xff]   ;;  %v4678_v61 = vcombine.low %v1998_v20, %v4547_v6  ;;  %v3924_v6 = vld [vmem:[%s4942_s4 + $0xc8] sm:$0xff]  }
  0xca   : > { %3382 = vmatprep.subr.bf16.mxu1 %v3975_v18  ;;  %v2434_v39 = vrot.slane %v3118_v53, 3  ;;  %v1855_v35 = vsel %vm1850_vm3, %v1852_v8, %v1854_v7  ;;  %v2055_v53 = vrot.slane %v4539_v3, 2 }
  0xcb   : > { %3363 = vmatmul.mubr.bf16.gmra.mrb[12].mxu1 %v985_v51  ;;  %3525 = vmatpush3.bf16.msra.mxu0 %v3891_v34  ;;  %v2435_v34 = vrot.slane %v4539_v3, 3  ;;  %v3902_v51 = vld [vmem:[%s4942_s4 + $0x80] sm:$0xff]  }
  0xcc   : > { %3526 = vmatprep.subr.bf16.mxu0 %v3975_v18  ;;  %3366 = vmatprep.mubr.msk.bf16.mxu1 %vm3976_vm10, %v3975_v18 }
  0xcd   : > { %3383 = vmatpush3.bf16.msra.mxu1 %v3896_v12  ;;  %v4569_v41 = vsel %vm2433_vm15, %v2434_v39, %v2435_v34  ;;  %v4574_v12 = vsel %vm2433_vm15, %v2435_v34, %v2437_v40  ;;  %v2054_v34 = vrot.slane %v4678_v61, 2  ;;  %v3919_v39 = vld [vmem:[%s4942_s4 + $0x1c0] sm:$0xff]  }
  0xce   : > { %3507 = vmatmul.mubr.bf16.gmra.mrb[12].mxu0 %v1683_v17  ;;  %3384 = vmatprep.subr.bf16.mxu1 %v3975_v18  ;;  %v1856_v17 = vrot.slane %v4420_v27, 2 }
  0xcf   : > { %3527 = vmatpush3.bf16.msra.mxu0 %v3893_v57  ;;  %3510 = vmatprep.mubr.msk.bf16.mxu0 %vm3976_vm10, %v3975_v18  ;;  %v1853_v57 = vsel %vm1850_vm3, %v1851_v29, %v1852_v8  ;;  %v3923_v29 = vld [vmem:[%s4942_s4 + $0x1d0] sm:$0xff]   ;;  %v2058_v8 = vsel %vm1850_vm3, %v2055_v53, %v2057_v43 }
  0xd0   : > { %3528 = vmatprep.subr.bf16.mxu0 %v3975_v18  ;;  %v1857_v27 = vsel %vm1850_vm3, %v1854_v7, %v1856_v17  ;;  %v1859_v60 = vsel %vm1850_vm3, %v1856_v17, %v1858_v2  ;;  %v3928_v7 = vld [vmem:[%s4942_s4 + $0x1e0] sm:$0xff]   ;;  %v3936_v17 = vld [vmem:[%s4942_s4 + $0xf0] sm:$0xff]  }
  0xd1   : > { %3385 = vmatpush3.bf16.msra.mxu1 %v3898_v48  ;;  %v3911_v48 = vld [vmem:[%s4942_s4 + $0xa8] sm:$0xff]  }
  0xd2   : > { %3406 = vmatprep.subr.bf16.mxu1 %v3975_v18 }
  0xd3   : > { %3367 = vmatmul.mubr.bf16.gmra.mrb[16].mxu1 %v993_v49  ;;  %3529 = vmatpush3.bf16.msra.mxu0 %v3897_v5  ;;  %v3915_v5 = vld [vmem:[%s4942_s4 + $0xb8] sm:$0xff]   ;;  %v1861_v49 = vsel %vm1850_vm3, %v1858_v2, %v1860_v38  ;;  %v2235_v2 = vshll.u32 %v4539_v3, 16 }
  0xd4   : > { %3386 = vmatprep.mubr.msk.bf16.mxu1 %vm3976_vm10, %v3975_v18  ;;  %3550 = vmatprep.subr.bf16.mxu0 %v3975_v18 }
  0xd6   : > { %3511 = vmatmul.mubr.bf16.gmra.mrb[16].mxu0 %v1692_v26  ;;  %v2056_v26 = vsel %vm1850_vm3, %v2054_v34, %v2055_v53  ;;  %v2244_v53 = vshll.u32 %v4550_v52, 16 }
  0xd7   : > { %3530 = vmatprep.mubr.msk.bf16.mxu0 %vm3976_vm10, %v3975_v18 }
  0xdb   : > { %3387 = vmatmul.mubr.bf16.vlgmr.msra.gmra.mrb[0].mxu1 %v4363_v11  ;;  %v3901_v11 = vld [vmem:[%s4942_s4 + $0x188] sm:$0xff]  }
  0xdc   : > { %3390 = vmatprep.mubr.msk.bf16.mxu1 %vm3976_vm10, %v3975_v18  ;;  %3407 = vmatpush3.bf16.msra.mxu1 %v3902_v51  ;;  %v3927_v51 = vld [vmem:[%s4942_s4 + $0xd0] sm:$0xff]  }
  0xdd   : > { %3408 = vmatprep.subr.bf16.mxu1 %v3975_v18 }
  0xde   : > { %3531 = vmatmul.mubr.bf16.vlgmr.msra.gmra.mrb[0].mxu0 %v1853_v57 }
  0xdf   : > { %3551 = vmatpush3.bf16.msra.mxu0 %v3900_v42  ;;  %3534 = vmatprep.mubr.msk.bf16.mxu0 %vm3976_vm10, %v3975_v18  ;;  %v4715_v42 = vld [vmem:[#allocation2 + $0x20] sm:$0xff]  }
  0xe0   : > { %3552 = vmatprep.subr.bf16.mxu0 %v3975_v18  ;;  %3409 = vmatpush3.bf16.msra.mxu1 %v3904_v54  ;;  %v3929_v54 = vld [vmem:[%s4942_s4 + $0xd8] sm:$0xff]   ;;  %v2059_v57 = vrot.slane %v4715_v42, 2 }
  0xe1   : > { %3410 = vmatprep.subr.bf16.mxu1 %v3975_v18 }
  0xe3   : > { %3553 = vmatpush3.bf16.msra.mxu0 %v3901_v11  ;;  %3391 = vmatmul.mubr.bf16.gmra.mrb[4].mxu1 %v4345_v31  ;;  %v3905_v31 = vld [vmem:[%s4942_s4 + $0x198] sm:$0xff]   ;;  %v3931_v11 = vld [vmem:[%s4942_s4 + $0xe0] sm:$0xff]  }
  0xe4   : > { %3554 = vmatprep.subr.bf16.mxu0 %v3975_v18  ;;  %3394 = vmatprep.mubr.msk.bf16.mxu1 %vm3976_vm10, %v3975_v18 }
  0xe5   : > { %3411 = vmatpush3.bf16.msra.mxu1 %v3906_v50  ;;  %v2060_v50 = vsel %vm1850_vm3, %v2057_v43, %v2059_v57  ;;  %v3941_v43 = vld [vmem:[%s4942_s4 + $0x210] sm:$0xff]  }
  0xe6   : > { %3535 = vmatmul.mubr.bf16.gmra.mrb[4].mxu0 %v1855_v35  ;;  %3412 = vmatprep.subr.bf16.mxu1 %v3975_v18  ;;  %v3933_v35 = vld [vmem:[%s4942_s4 + $0xe8] sm:$0xff]  }
  0xe7   : > { %3555 = vmatpush3.bf16.msra.mxu0 %v3903_v13  ;;  %3538 = vmatprep.mubr.msk.bf16.mxu0 %vm3976_vm10, %v3975_v18  ;;  %v4740_v13 = vld [vmem:[#allocation2 + $0x28] sm:$0xff]  }
  0xe8   : > { %3556 = vmatprep.subr.bf16.mxu0 %v3975_v18 }
  0xe9   : > { %3413 = vmatpush3.bf16.msra.mxu1 %v3908_v30  ;;  %v3932_v30 = vld [vmem:[%s4942_s4 + $0x1e8] sm:$0xff]  }
  0xea   : > { %3414 = vmatprep.subr.bf16.mxu1 %v3975_v18 }
  0xeb   : > { %3557 = vmatpush3.bf16.msra.mxu0 %v3905_v31  ;;  %3395 = vmatmul.mubr.bf16.gmra.mrb[8].mxu1 %v4379_v58  ;;  %v3910_v58 = vld [vmem:[%s4942_s4 + $0x1a8] sm:$0xff]   ;;  %v2061_v31 = vrot.slane %v4740_v13, 2 }
  0xec   : > { %3558 = vmatprep.subr.bf16.mxu0 %v3975_v18  ;;  %3398 = vmatprep.mubr.msk.bf16.mxu1 %vm3976_vm10, %v3975_v18 }
  0xed   : > { %3415 = vmatpush3.bf16.msra.mxu1 %v3909_v62  ;;  %v3934_v62 = vld [vmem:[%s4942_s4 + $0x1f0] sm:$0xff]  }
  0xee   : > { %3539 = vmatmul.mubr.bf16.gmra.mrb[8].mxu0 %v1857_v27  ;;  %3416 = vmatprep.subr.bf16.mxu1 %v3975_v18  ;;  %v3935_v27 = vld [vmem:[#allocation2 + $0x30] ss:$0 sps:$4 sm:$0x33]  }
  0xef   : > { %3559 = vmatpush3.bf16.msra.mxu0 %v3907_v32  ;;  %3542 = vmatprep.mubr.msk.bf16.mxu0 %vm3976_vm10, %v3975_v18  ;;  %v2062_v32 = vsel %vm1850_vm3, %v2059_v57, %v2061_v31 }
  0xf0   : > { %3560 = vmatprep.subr.bf16.mxu0 %v3975_v18 }
  0xf1   : > { %3417 = vmatpush3.bf16.msra.mxu1 %v3911_v48  ;;  %v3937_v48 = vld [vmem:[%s4942_s4 + $0x1f8] sm:$0xff]  }
  0xf2   : > { %3418 = vmatprep.subr.bf16.mxu1 %v3975_v18 }
  0xf3   : > { %3399 = vmatmul.mubr.bf16.gmra.mrb[12].mxu1 %v4423_v36  ;;  %3561 = vmatpush3.bf16.msra.mxu0 %v3910_v58  ;;  %v3938_v36 = vld [vmem:[%s4942_s4 + $0xf8] sm:$0xff]   ;;  %v2232_v58 = vshrl.u32 %v4539_v3, 16  ;;  %v2237_v3 = vrot.slane %v2235_v2, 3  ;;  %v2441_v2 = vrot.slane %v4740_v13, 3 }
  0xf4   : > { %3562 = vmatprep.subr.bf16.mxu0 %v3975_v18  ;;  %3402 = vmatprep.mubr.msk.bf16.mxu1 %vm3976_vm10, %v3975_v18 }
  0xf5   : > { %3419 = vmatpush3.bf16.msra.mxu1 %v3913_v37  ;;  %v2063_v37 = vrot.slane %v3935_v27, 2 }
  0xf6   : > { %3543 = vmatmul.mubr.bf16.gmra.mrb[12].mxu0 %v1859_v60  ;;  %3420 = vmatprep.subr.bf16.mxu1 %v3975_v18  ;;  %v2227_v60 = vshll.u32 %v4678_v61, 16 }
  0xf7   : > { %3563 = vmatpush3.bf16.msra.mxu0 %v3912_v4  ;;  %3546 = vmatprep.mubr.msk.bf16.mxu0 %vm3976_vm10, %v3975_v18  ;;  %v2224_v4 = vshrl.u32 %v4678_v61, 16 }
  0xf8   : > { %3564 = vmatprep.subr.bf16.mxu0 %v3975_v18  ;;  %v2229_v20 = vrot.slane %v2227_v60, 3 }
  0xf9   : > { %3421 = vmatpush3.bf16.msra.mxu1 %v3915_v5  ;;  %v2064_v5 = vsel %vm1850_vm3, %v2061_v31, %v2063_v37  ;;  %v2226_v38 = vrot.slane %v2224_v4, 2  ;;  %v3944_v31 = vld [vmem:[%s4942_s4 + $0x228] sm:$0xff]  }
  0xfa   : > { %3442 = vmatprep.subr.bf16.mxu1 %v3975_v18 }
  0xfb   : > { %3403 = vmatmul.mubr.bf16.gmra.mrb[16].mxu1 %v4454_v55  ;;  %3565 = vmatpush3.bf16.msra.mxu0 %v3914_v10  ;;  %v2234_v10 = vrot.slane %v2232_v58, 2  ;;  %v2230_v34 = vor.u32 %v2229_v20, %v2226_v38 }
  0xfc   : > { %3422 = vmatprep.mubr.msk.bf16.mxu1 %vm3976_vm10, %v3975_v18  ;;  %3586 = vmatprep.subr.bf16.mxu0 %v3975_v18 }
  0xfd   : > { %v2238_v61 = vor.u32 %v2237_v3, %v2234_v10 }
  0xfe   : > { %3547 = vmatmul.mubr.bf16.gmra.mrb[16].mxu0 %v1861_v49  ;;  %v3939_v49 = vld [vmem:[%s4942_s4 + $0x200] sm:$0xff]  }
  0xff   : > { %3566 = vmatprep.mubr.msk.bf16.mxu0 %vm3976_vm10, %v3975_v18 }
 0x103   : > { %3423 = vmatmul.mubr.bf16.vlgmr.msra.gmra.mrb[0].mxu1 %v4479_v15  ;;  %v3920_v15 = vld [vmem:[%s4942_s4 + $0x1c8] sm:$0xff]  }
 0x104   : > { %3426 = vmatprep.mubr.msk.bf16.mxu1 %vm3976_vm10, %v3975_v18  ;;  %3443 = vmatpush3.bf16.msra.mxu1 %v3922_v23  ;;  %v2241_v23 = vshrl.u32 %v4550_v52, 16 }
 0x105   : > { %3444 = vmatprep.subr.bf16.mxu1 %v3975_v18 }
 0x106   : > { %3567 = vmatmul.mubr.bf16.vlgmr.msra.gmra.mrb[0].mxu0 %v2056_v26  ;;  %v2243_v26 = vrot.slane %v2241_v23, 2 }
 0x107   : > { %3587 = vmatpush3.bf16.msra.mxu0 %v3919_v39  ;;  %3570 = vmatprep.mubr.msk.bf16.mxu0 %vm3976_vm10, %v3975_v18  ;;  %v3940_v39 = vld [vmem:[%s4942_s4 + $0x208] sm:$0xff]  }
 0x108   : > { %3588 = vmatprep.subr.bf16.mxu0 %v3975_v18  ;;  %3445 = vmatpush3.bf16.msra.mxu1 %v3924_v6  ;;  %v2239_v6 = vsel %vm2222_vm0, %v2230_v34, %v2238_v61 }
 0x109   : > { %3446 = vmatprep.subr.bf16.mxu1 %v3975_v18 }
 0x10b   : > { %3589 = vmatpush3.bf16.msra.mxu0 %v3920_v15  ;;  %3427 = vmatmul.mubr.bf16.gmra.mrb[4].mxu1 %v4489_v22  ;;  %v3925_v22 = vld [vmem:[%s4942_s4 + $0x1d8] sm:$0xff]   ;;  %v2246_v15 = vrot.slane %v2244_v53, 3 }
 0x10c   : > { %3590 = vmatprep.subr.bf16.mxu0 %v3975_v18  ;;  %3430 = vmatprep.mubr.msk.bf16.mxu1 %vm3976_vm10, %v3975_v18 }
 0x10d   : > { %3447 = vmatpush3.bf16.msra.mxu1 %v3927_v51  ;;  %v2250_v51 = vshrl.u32 %v4715_v42, 16 }
 0x10e   : > { %3571 = vmatmul.mubr.bf16.gmra.mrb[4].mxu0 %v2058_v8  ;;  %3448 = vmatprep.subr.bf16.mxu1 %v3975_v18 }
 0x10f   : > { %3591 = vmatpush3.bf16.msra.mxu0 %v3923_v29  ;;  %3574 = vmatprep.mubr.msk.bf16.mxu0 %vm3976_vm10, %v3975_v18  ;;  %v2253_v29 = vshll.u32 %v4715_v42, 16 }
 0x110   : > { %3592 = vmatprep.subr.bf16.mxu0 %v3975_v18 }
 0x111   : > { %3449 = vmatpush3.bf16.msra.mxu1 %v3929_v54  ;;  %v3942_v54 = vld [vmem:[%s4942_s4 + $0x218] sm:$0xff]   ;;  %v2255_v57 = vrot.slane %v2253_v29, 3 }
 0x112   : > { %3450 = vmatprep.subr.bf16.mxu1 %v3975_v18 }
 0x113   : > { %3593 = vmatpush3.bf16.msra.mxu0 %v3925_v22  ;;  %3431 = vmatmul.mubr.bf16.gmra.mrb[8].mxu1 %v4498_v9  ;;  %v1275_v9 = vrot.slane %v4454_v55, 1  ;;  %v2252_v22 = vrot.slane %v2250_v51, 2 }
 0x114   : > { %3594 = vmatprep.subr.bf16.mxu0 %v3975_v18  ;;  %3434 = vmatprep.mubr.msk.bf16.mxu1 %vm3976_vm10, %v3975_v18 }
 0x115   : > { %3451 = vmatpush3.bf16.msra.mxu1 %v3931_v11  ;;  %v1276_v55 = vsel %vm1267_vm13, %v1273_v16, %v1275_v9  ;;  %v1277_v16 = vrot.slane %v4493_v33, 1  ;;  %v3943_v11 = vld [vmem:[%s4942_s4 + $0x220] sm:$0xff]  }
 0x116   : > { %3575 = vmatmul.mubr.bf16.gmra.mrb[8].mxu0 %v2060_v50  ;;  %3452 = vmatprep.subr.bf16.mxu1 %v3975_v18  ;;  %v2262_v50 = vshll.u32 %v4740_v13, 16 }
 0x117   : > { %3595 = vmatpush3.bf16.msra.mxu0 %v3928_v7  ;;  %3578 = vmatprep.mubr.msk.bf16.mxu0 %vm3976_vm10, %v3975_v18  ;;  %v1278_v33 = vsel %vm1267_vm13, %v1275_v9, %v1277_v16  ;;  %v2259_v7 = vshrl.u32 %v4740_v13, 16  ;;  %v3948_v16 = vld [vmem:[%s4942_s4 + $0x238] sm:$0xff]  }
 0x118   : > { %3596 = vmatprep.subr.bf16.mxu0 %v3975_v18 }
 0x119   : > { %3453 = vmatpush3.bf16.msra.mxu1 %v3933_v35  ;;  %v2261_v9 = vrot.slane %v2259_v7, 2 }
 0x11a   : > { %3454 = vmatprep.subr.bf16.mxu1 %v3975_v18 }
 0x11b   : > { %3435 = vmatmul.mubr.bf16.gmra.mrb[12].mxu1 %v1276_v55  ;;  %3597 = vmatpush3.bf16.msra.mxu0 %v3932_v30  ;;  %v2264_v30 = vrot.slane %v2262_v50, 3  ;;  %v3945_v55 = vld [vmem:[%s4942_s4 + $0x230] sm:$0xff]  }
 0x11c   : > { %3598 = vmatprep.subr.bf16.mxu0 %v3975_v18  ;;  %3438 = vmatprep.mubr.msk.bf16.mxu1 %vm3976_vm10, %v3975_v18 }
 0x11d   : > { %3455 = vmatpush3.bf16.msra.mxu1 %v3936_v17  ;;  %v2265_v17 = vor.u32 %v2264_v30, %v2261_v9 }
 0x11e   : > { %3579 = vmatmul.mubr.bf16.gmra.mrb[12].mxu0 %v2062_v32  ;;  %3456 = vmatprep.subr.bf16.mxu1 %v3975_v18 }
 0x11f   : > { %3599 = vmatpush3.bf16.msra.mxu0 %v3934_v62  ;;  %3582 = vmatprep.mubr.msk.bf16.mxu0 %vm3976_vm10, %v3975_v18 }
 0x120   : > { %3600 = vmatprep.subr.bf16.mxu0 %v3975_v18 }
 0x121   : > { %3457 = vmatpush3.bf16.msra.mxu1 %v3938_v36 }
 0x122   : > { %3658 = vmatprep.subr.bf16.mxu1 %v3975_v18 }
 0x123   : > { %3439 = vmatmul.mubr.bf16.gmra.mrb[16].mxu1 %v1278_v33  ;;  %3601 = vmatpush3.bf16.msra.mxu0 %v3937_v48  ;;  %v2439_v33 = vrot.slane %v4715_v42, 3 }
 0x124   : > { %3458 = vmatprep.mubr.msk.bf16.mxu1 %vm3976_vm10, %v3975_v18  ;;  %3622 = vmatprep.subr.bf16.mxu0 %v3975_v18 }
 0x125   : > { %v2442_v37 = vsel %vm2433_vm15, %v2439_v33, %v2441_v2  ;;  %v2440_v42 = vsel %vm2433_vm15, %v2437_v40, %v2439_v33 }
 0x126   : > { %3583 = vmatmul.mubr.bf16.gmra.mrb[16].mxu0 %v2064_v5 }
 0x127   : > { %3602 = vmatprep.mubr.msk.bf16.mxu0 %vm3976_vm10, %v3975_v18 }
 0x12b   : > { %3459 = vmatmul.mubr.bf16.vlgmr.msra.gmra.mrb[0].mxu1 %v4514_v44  ;;  %v2247_v44 = vor.u32 %v2246_v15, %v2243_v26 }
 0x12c   : > { %3462 = vmatprep.mubr.msk.bf16.mxu1 %vm3976_vm10, %v3975_v18  ;;  %3666 = vmatpush3.bf16.msra.mxu1 %v3939_v49 }
 0x12d   : > { %3659 = vmatprep.subr.bf16.mxu1 %v3975_v18  ;;  %v2248_v8 = vsel %vm2222_vm0, %v2238_v61, %v2247_v44 }
 0x12e   : > { %3603 = vmatmul.mubr.bf16.vlgmr.msra.gmra.mrb[0].mxu0 %v2239_v6 }
 0x12f   : > { %3623 = vmatpush3.bf16.msra.mxu0 %v3939_v49  ;;  %3606 = vmatprep.mubr.msk.bf16.mxu0 %vm3976_vm10, %v3975_v18 }
 0x130   : > { %3624 = vmatprep.subr.bf16.mxu0 %v3975_v18  ;;  %3667 = vmatpush3.bf16.msra.mxu1 %v3940_v39 }
 0x131   : > { %3660 = vmatprep.subr.bf16.mxu1 %v3975_v18 }
 0x133   : > { %3625 = vmatpush3.bf16.msra.mxu0 %v3940_v39  ;;  %3463 = vmatmul.mubr.bf16.gmra.mrb[4].mxu1 %v4529_v47  ;;  %v2256_v47 = vor.u32 %v2255_v57, %v2252_v22 }
 0x134   : > { %3626 = vmatprep.subr.bf16.mxu0 %v3975_v18  ;;  %3466 = vmatprep.mubr.msk.bf16.mxu1 %vm3976_vm10, %v3975_v18 }
 0x135   : > { %3668 = vmatpush3.bf16.msra.mxu1 %v3941_v43  ;;  %v2257_v35 = vsel %vm2222_vm0, %v2247_v44, %v2256_v47  ;;  %v2266_v36 = vsel %vm2222_vm0, %v2256_v47, %v2265_v17 }
 0x136   : > { %3607 = vmatmul.mubr.bf16.gmra.mrb[4].mxu0 %v2248_v8  ;;  %3661 = vmatprep.subr.bf16.mxu1 %v3975_v18 }
 0x137   : > { %3627 = vmatpush3.bf16.msra.mxu0 %v3941_v43  ;;  %3610 = vmatprep.mubr.msk.bf16.mxu0 %vm3976_vm10, %v3975_v18 }
 0x138   : > { %3628 = vmatprep.subr.bf16.mxu0 %v3975_v18 }
 0x139   : > { %3669 = vmatpush3.bf16.msra.mxu1 %v3942_v54 }
 0x13a   : > { %3662 = vmatprep.subr.bf16.mxu1 %v3975_v18 }
 0x13b   : > { %3629 = vmatpush3.bf16.msra.mxu0 %v3942_v54  ;;  %3467 = vmatmul.mubr.bf16.gmra.mrb[8].mxu1 %v4536_v1  ;;  %v3947_v1 = vld [vmem:[#allocation2 + $0x30] ss:$0 sps:$4 sm:$0x77]  }
 0x13c   : > { %3630 = vmatprep.subr.bf16.mxu0 %v3975_v18  ;;  %3470 = vmatprep.mubr.msk.bf16.mxu1 %vm3976_vm10, %v3975_v18  ;;  %v2268_v62 = vshrl.u32 %v3947_v1, 16  ;;  %v2271_v32 = vshll.u32 %v3947_v1, 16 }
 0x13d   : > { %3670 = vmatpush3.bf16.msra.mxu1 %v3943_v11 }
 0x13e   : > { %3611 = vmatmul.mubr.bf16.gmra.mrb[8].mxu0 %v2257_v35  ;;  %3663 = vmatprep.subr.bf16.mxu1 %v3975_v18  ;;  %v2273_v27 = vrot.slane %v2271_v32, 3 }
 0x13f   : > { %3631 = vmatpush3.bf16.msra.mxu0 %v3943_v11  ;;  %3614 = vmatprep.mubr.msk.bf16.mxu0 %vm3976_vm10, %v3975_v18 }
 0x140   : > { %3632 = vmatprep.subr.bf16.mxu0 %v3975_v18 }
 0x141   : > { %3671 = vmatpush3.bf16.msra.mxu1 %v3944_v31 }
 0x142   : > { %3664 = vmatprep.subr.bf16.mxu1 %v3975_v18 }
 0x143   : > { %3471 = vmatmul.mubr.bf16.gmra.mrb[12].mxu1 %v4553_v19  ;;  %3633 = vmatpush3.bf16.msra.mxu0 %v3944_v31  ;;  %v2270_v19 = vrot.slane %v2268_v62, 2 }
 0x144   : > { %3634 = vmatprep.subr.bf16.mxu0 %v3975_v18  ;;  %3474 = vmatprep.mubr.msk.bf16.mxu1 %vm3976_vm10, %v3975_v18 }
 0x145   : > { %3672 = vmatpush3.bf16.msra.mxu1 %v3945_v55  ;;  %v2274_v48 = vor.u32 %v2273_v27, %v2270_v19 }
 0x146   : > { %3615 = vmatmul.mubr.bf16.gmra.mrb[12].mxu0 %v2266_v36  ;;  %3665 = vmatprep.subr.bf16.mxu1 %v3975_v18 }
 0x147   : > { %3635 = vmatpush3.bf16.msra.mxu0 %v3945_v55  ;;  %3618 = vmatprep.mubr.msk.bf16.mxu0 %vm3976_vm10, %v3975_v18  ;;  %v2275_v58 = vsel %vm2222_vm0, %v2265_v17, %v2274_v48 }
 0x148   : > { %3636 = vmatprep.subr.bf16.mxu0 %v3975_v18 }
 0x149   : > { %3673 = vmatpush3.bf16.msra.mxu1 %v3948_v16 }
 0x14b   : > { %3475 = vmatmul.mubr.bf16.gmra.mrb[16].mxu1 %v4556_v21  ;;  %3637 = vmatpush3.bf16.msra.mxu0 %v3948_v16  ;;  %v2443_v21 = vrot.slane %v3947_v1, 3 }
 0x14c   : > { %3650 = vmatprep.mubr.msk.bf16.mxu1 %vm3976_vm10, %v3975_v18 }
 0x14d   : > { %v2444_v4 = vsel %vm2433_vm15, %v2441_v2, %v2443_v21 }
 0x14e   : > { %3619 = vmatmul.mubr.bf16.gmra.mrb[16].mxu0 %v2275_v58 }
 0x14f   : > { %3638 = vmatprep.mubr.msk.bf16.mxu0 %vm3976_vm10, %v3975_v18 }
 0x153   : > { %3651 = vmatmul.mubr.bf16.vlgmr.msra.gmra.mrb[20].mxu1 %v2442_v37 }
 0x154   : > { %3654 = vmatprep.mubr.msk.bf16.mxu1 %vm3976_vm10, %v3975_v18 }
 0x156   : > { %3639 = vmatmul.mubr.bf16.vlgmr.msra.gmra.mrb[0].mxu0 %v4569_v41 }
 0x157   : > { %3642 = vmatprep.mubr.msk.bf16.mxu0 %vm3976_vm10, %v3975_v18 }
 0x15b   : > { %3655 = vmatmul.mubr.bf16.gmra.mrb[24].mxu1 %v2444_v4 }
 0x15e   : > { %3643 = vmatmul.mubr.bf16.gmra.mrb[4].mxu0 %v4574_v12 }
 0x15f   : > { %3646 = vmatprep.mubr.msk.bf16.mxu0 %vm3976_vm10, %v3975_v18  ;;  %vm4961_vm10 = vcmp.eq.s32.totalorder %v4246_v63, 1 }
 0x166   : > { %3647 = vmatmul.mubr.bf16.gmra.mrb[8].mxu0 %v2440_v42 }
 0x1fe   : > { %v1569_v13 = vpop.f32.mrb[0].mxu1 }
 0x1ff   : > { %v3460_v60 = vpop.f32.mrb[1].mxu1 }
 0x200   : > { %v1572_v41 = vpop.f32.mrb[2].mxu1 }
 0x201   : > { %v3461_v5 = vpop.f32.mrb[3].mxu1 }
 0x206   : > { %v1577_v10 = vpop.f32.mrb[4].mxu1 }
 0x207   : > { %v3464_v3 = vpop.f32.mrb[5].mxu1 }
 0x208   : > { %v4880_v38 = vpop.f32.mrb[6].mxu1 }
 0x209   : > { %v3465_v20 = vpop.f32.mrb[7].mxu1 }
 0x20e   : > { %v4882_v49 = vpop.f32.mrb[8].mxu1 }
 0x20f   : > { %v3468_v12 = vpop.f32.mrb[9].mxu1 }
 0x210   : > { %v4884_v61 = vpop.f32.mrb[10].mxu1 }
 0x211   : > { %v3469_v18 = vpop.f32.mrb[11].mxu1 }
 0x216   : > { %v1593_v23 = vpop.f32.mrb[12].mxu1 }
 0x217   : > { %v3472_v52 = vpop.f32.mrb[13].mxu1 }
 0x218   : > { %v1596_v53 = vpop.f32.mrb[14].mxu1 }
 0x219   : > { %v2387_v40 = vpop.f32.mrb[12].mxu0  ;;  %v3473_v34 = vpop.f32.mrb[15].mxu1 }
 0x21a   : > { %v3680_v39 = vadd.f32 %v2387_v40, %v1593_v23  ;;  %v3616_v6 = vpop.f32.mrb[13].mxu0 }
 0x21b   : > { %v2390_v26 = vpop.f32.mrb[14].mxu0 }
 0x21c   : > { %v3682_v15 = vadd.f32 %v2390_v26, %v1596_v53  ;;  %v3617_v44 = vpop.f32.mrb[15].mxu0 }
 0x21e   : > { %v1601_v43 = vpop.f32.mrb[16].mxu1 }
 0x21f   : > { %v3476_v51 = vpop.f32.mrb[17].mxu1 }
 0x220   : > { %v1604_v29 = vpop.f32.mrb[18].mxu1 }
 0x221   : > { %v2395_v8 = vpop.f32.mrb[16].mxu0  ;;  %v3477_v54 = vpop.f32.mrb[19].mxu1 }
 0x222   : > { %v3684_v22 = vadd.f32 %v2395_v8, %v1601_v43  ;;  %v3620_v57 = vpop.f32.mrb[17].mxu0 }
 0x223   : > { %v2398_v47 = vpop.f32.mrb[18].mxu0 }
 0x224   : > { %v3686_v11 = vadd.f32 %v2398_v47, %v1604_v29  ;;  %v3621_v7 = vpop.f32.mrb[19].mxu0 }
 0x226   : > { %v2556_v50 = vpop.f32.mrb[20].mxu1 }
 0x227   : > { %v3681_v35 = vadd.f32 %v3680_v39, %v2556_v50  ;;  %v3652_v9 = vpop.f32.mrb[21].mxu1 }
 0x228   : > { %v2559_v30 = vpop.f32.mrb[22].mxu1 }
 0x229   : > { %v2532_v31 = vpop.f32.mrb[0].mxu0  ;;  %v3683_v1 = vadd.f32 %v3682_v15, %v2559_v30  ;;  %v3653_v17 = vpop.f32.mrb[23].mxu1  ;;  %v2587_v32 = vsel %vm572_vm14, %v3681_v35, 0.0 }
 0x22a   : > { %v3674_v55 = vadd.f32 %v2532_v31, %v1569_v13  ;;  %v3640_v62 = vpop.f32.mrb[1].mxu0  ;;  %v2663_v50 = vmul.f32 %v2587_v32, %v2587_v32 }
 0x22b   : > { %v2535_v36 = vpop.f32.mrb[2].mxu0  ;;  %v2588_v16 = vsel %vm573_vm7, %v3683_v1, 0.0 }
 0x22c   : > { %v2581_v19 = vsel %vm566_vm6, %v3674_v55, 0.0  ;;  %v3675_v27 = vadd.f32 %v2535_v36, %v1572_v41  ;;  %v3202_v48 = vpack.c.bf16 %v2588_v16, %v2587_v32  ;;  %v3641_v58 = vpop.f32.mrb[3].mxu0  ;;  %v2664_v9 = vmul.f32 %v2588_v16, %v2588_v16 }
 0x22d   : > { %v2657_v24 = vmul.f32 %v2581_v19, %v2581_v19 }
 0x22e   : > { %v2582_v2 = vsel %vm567_vm1, %v3675_v27, 0.0  ;;  %3215 = vst [vmem:[%s4893_s14 + $0x18] sm:$0xff] %v3202_v48   ;;  %v2564_v33 = vpop.f32.mrb[24].mxu1  ;;  %vm4962_vm1 = vcmp.eq.s32.totalorder %v4273_v25, 1 }
 0x22f   : > { %v3187_v37 = vpack.c.bf16 %v2582_v2, %v2581_v19  ;;  %v2641_v21 = vadd.f32 %v2582_v2, %v2581_v19  ;;  %v2658_v4 = vmul.f32 %v2582_v2, %v2582_v2  ;;  %v3685_v42 = vadd.f32 %v3684_v22, %v2564_v33  ;;  %v3656_v13 = vpop.f32.mrb[25].mxu1 }
 0x230   : > { %v2567_v56 = vpop.f32.mrb[26].mxu1 }
 0x231   : > { %3188 = vst [vmem:[%s4893_s14] sm:$0xff] %v3187_v37   ;;  %v2667_v60 = vadd.f32 %v2658_v4, %v2657_v24  ;;  %v2540_v46 = vpop.f32.mrb[4].mxu0  ;;  %v3687_v5 = vadd.f32 %v3686_v11, %v2567_v56  ;;  %v3657_v41 = vpop.f32.mrb[27].mxu1  ;;  %v2589_v28 = vsel %vm574_vm9, %v3685_v42, 0.0 }
 0x232   : > { %v3676_v3 = vadd.f32 %v2540_v46, %v1577_v10  ;;  %v3644_v20 = vpop.f32.mrb[5].mxu0  ;;  %v2665_v31 = vmul.f32 %v2589_v28, %v2589_v28 }
 0x233   : > { %v2543_v12 = vpop.f32.mrb[6].mxu0  ;;  %v2590_v18 = vsel %vm575_vm4, %v3687_v5, 0.0 }
 0x234   : > { %v2583_v23 = vsel %vm568_vm5, %v3676_v3, 0.0  ;;  %v3677_v52 = vadd.f32 %v2543_v12, %v4880_v38  ;;  %v3207_v53 = vpack.c.bf16 %v2590_v18, %v2589_v28  ;;  %v3645_v40 = vpop.f32.mrb[7].mxu0  ;;  %v2666_v17 = vmul.f32 %v2590_v18, %v2590_v18 }
 0x235   : > { %v2642_v34 = vadd.f32 %v2641_v21, %v2583_v23  ;;  %v2659_v39 = vmul.f32 %v2583_v23, %v2583_v23 }
 0x236   : > { %v2584_v10 = vsel %vm569_vm11, %v3677_v52, 0.0  ;;  %3216 = vst [vmem:[%s4893_s14 + $0x20] sm:$0xff] %v3207_v53  }
 0x237   : > { %v2668_v14 = vadd.f32 %v2667_v60, %v2659_v39  ;;  %v3192_v6 = vpack.c.bf16 %v2584_v10, %v2583_v23  ;;  %v2643_v26 = vadd.f32 %v2642_v34, %v2584_v10  ;;  %v2660_v15 = vmul.f32 %v2584_v10, %v2584_v10 }
 0x239   : > { %3213 = vst [vmem:[%s4893_s14 + $0x8] sm:$0xff] %v3192_v6   ;;  %v2669_v59 = vadd.f32 %v2668_v14, %v2660_v15  ;;  %v2548_v44 = vpop.f32.mrb[8].mxu0 }
 0x23a   : > { %v3678_v45 = vadd.f32 %v2548_v44, %v4882_v49  ;;  %v3648_v43 = vpop.f32.mrb[9].mxu0 }
 0x23b   : > { %v2551_v38 = vpop.f32.mrb[10].mxu0 }
 0x23c   : > { %v2585_v51 = vsel %vm4961_vm10, %v3678_v45, 0.0  ;;  %v3679_v29 = vadd.f32 %v2551_v38, %v4884_v61  ;;  %v3649_v0 = vpop.f32.mrb[11].mxu0 }
 0x23d   : > { %v2644_v8 = vadd.f32 %v2643_v26, %v2585_v51  ;;  %v2661_v54 = vmul.f32 %v2585_v51, %v2585_v51 }
 0x23e   : > { %v2586_v22 = vsel %vm4962_vm1, %v3679_v29, 0.0 }
 0x23f   : > { %v2670_v57 = vadd.f32 %v2669_v59, %v2661_v54  ;;  %v3197_v47 = vpack.c.bf16 %v2586_v22, %v2585_v51  ;;  %v2645_v11 = vadd.f32 %v2644_v8, %v2586_v22  ;;  %v2662_v7 = vmul.f32 %v2586_v22, %v2586_v22 }
 0x241   : > { %3214 = vst [vmem:[%s4893_s14 + $0x10] sm:$0xff] %v3197_v47   ;;  %v2646_v49 = vadd.f32 %v2645_v11, %v2587_v32  ;;  %v2671_v35 = vadd.f32 %v2670_v57, %v2662_v7 }
 0x243   : > { %v2647_v30 = vadd.f32 %v2646_v49, %v2588_v16  ;;  %v2672_v63 = vadd.f32 %v2671_v35, %v2663_v50 }
 0x245   : > { %v2648_v61 = vadd.f32 %v2647_v30, %v2589_v28  ;;  %v2673_v1 = vadd.f32 %v2672_v63, %v2664_v9 }
 0x247   : > { %v2649_v55 = vadd.f32 %v2648_v61, %v2590_v18  ;;  %v2674_v25 = vadd.f32 %v2673_v1, %v2665_v31 }
 0x249   : > { %v2650_v62 = vrot.slane %v2649_v55, 4  ;;  %v2675_v36 = vadd.f32 %v2674_v25, %v2666_v17 }
 0x24b   : > { %v2651_v19 = vadd.f32 %v2650_v62, %v2649_v55  ;;  %v2676_v27 = vrot.slane %v2675_v36, 4 }
 0x24d   : > { %v2652_v48 = vrot.slane %v2651_v19, 2  ;;  %v2677_v58 = vadd.f32 %v2676_v27, %v2675_v36 }
 0x24f   : > { %v2653_v24 = vadd.f32 %v2652_v48, %v2651_v19  ;;  %v2678_v32 = vrot.slane %v2677_v58, 2 }
 0x251   : > { %v2654_v2 = vrot.slane %v2653_v24, 1  ;;  %v2679_v33 = vadd.f32 %v2678_v32, %v2677_v58 }
 0x253   : > { %v2655_v16 = vadd.f32 %v2654_v2, %v2653_v24  ;;  %v2680_v37 = vrot.slane %v2679_v33, 1 }
 0x255   : > { %2656 = vst [vmem:[%s432_s16] sm:$0x1] %v2655_v16  ;;  %v2681_v21 = vadd.f32 %v2680_v37, %v2679_v33 }
 0x257   : > { %2682 = vst [vmem:[%s438_s19] sm:$0x1] %v2681_v21 }
 0x258 PF: > { %s19_s29 = sadd.s32 1, %s3972_s29   ;;  %s4963_s27 = smov %s3968_s28 }
 0x259   : > { %p16_p5 = scmp.ge.s32.totalorder %s19_s29, 4   ;;  %s4964_s28 = smov %s4966_s30 }
 0x25b   :  { %18 = sbr.rel (!%p16_p5) target bundleno = 2 (0x2), region = 113 }

</bundles_post_ra>
